<compile_context>
chip_gen: v5e
topology: v5e:2x2
jax: 0.10.0
libtpu: 0.0.40
codegen_flags: <defaults>
</compile_context>

<pallas_src>
import jax
import jax.numpy as jnp
from jax.experimental import pallas as pl
from jax.experimental.pallas import tpu as pltpu


def lstm_wavefront_kernel(x_ref, w_ih0_ref, w_hh0_ref, b0_ref,
                          w_ihr_ref, w_hhr_ref, br_ref,
                          w_fc_ref, b_fc_ref, out_ref):
    """Wavefront stacked-LSTM + FC forward, fully unrolled (no grid, no scratch).

    x_ref:    (T, B, D)      bf16  time-major input
    w_ih0:    (D, 4H)        bf16  layer-0 input weights (transposed, g cols x2)
    w_hh0:    (H, 4H)        bf16  layer-0 recurrent weights (transposed, g cols x2)
    b0:       (1, 4H)        f32   layer-0 combined bias (b_ih + b_hh, g cols x2)
    w_ihr:    (L-1, H, 4H)   bf16  layers 1..L-1 input weights
    w_hhr:    (L-1, H, 4H)   bf16  layers 1..L-1 recurrent weights
    br:       (L-1, 1, 4H)   f32   layers 1..L-1 combined biases
    w_fc:     (H, O_pad)     f32   final linear (zero-padded to 128 lanes)
    b_fc:     (1, O_pad)     f32
    out_ref:  (B, O_pad)     f32
    """
    T, B, _ = x_ref.shape
    H = w_hh0_ref.shape[0]
    L = 1 + w_ihr_ref.shape[0]

    def cell(h_prev, c_prev, inp_bf16, w_ih, w_hh, b):
        # Two back-to-back MXU pushes; both LHS operands were produced one
        # super-step earlier, so neither lengthens the dependent chain.
        gates = (jnp.dot(h_prev.astype(jnp.bfloat16), w_hh,
                         preferred_element_type=jnp.float32)
                 + jnp.dot(inp_bf16, w_ih, preferred_element_type=jnp.float32)
                 + b)
        s = jax.nn.sigmoid(gates)             # single full-vreg EUP push
        i = s[:, 0 * H:1 * H]
        f = s[:, 1 * H:2 * H]
        g = 2.0 * s[:, 2 * H:3 * H] - 1.0     # == tanh(z_g): g cols pre-scaled x2
        o = s[:, 3 * H:4 * H]
        c_new = f * c_prev + i * g
        h_new = o * jnp.tanh(c_new)
        return h_new, c_new

    zeros = jnp.zeros((B, H), jnp.float32)
    hs = [zeros] * L                           # hs[l] = latest h of layer l
    cs = [zeros] * L                           # cs[l] = latest c of layer l

    # Wavefront: at super-step s, layer l computes timestep t = s - l.  Every
    # value read below (hs/cs and the layer-below hidden) was produced at
    # super-step s-1, so all active cells in a super-step are independent.
    for s_step in range(T + L - 1):
        new_hs = list(hs)
        new_cs = list(cs)
        for l in range(max(0, s_step - T + 1), min(L, s_step + 1)):
            t = s_step - l
            if l == 0:
                inp = x_ref[t]                              # (B, D) bf16
                w_ih = w_ih0_ref[...]
                w_hh = w_hh0_ref[...]
                b = b0_ref[...]
            else:
                inp = hs[l - 1].astype(jnp.bfloat16)        # (B, H)
                w_ih = w_ihr_ref[l - 1]
                w_hh = w_hhr_ref[l - 1]
                b = br_ref[l - 1]
            new_hs[l], new_cs[l] = cell(hs[l], cs[l], inp, w_ih, w_hh, b)
        hs, cs = new_hs, new_cs

    # FC on the top layer's final hidden state (lane-dense padded output).
    out_ref[...] = (jnp.dot(hs[L - 1], w_fc_ref[...],
                            preferred_element_type=jnp.float32)
                    + b_fc_ref[...]).astype(out_ref.dtype)


def _scale_g_cols(a):
    """Scale the g-gate block (columns 2H:3H of the last, 4H-wide axis) by 2."""
    h = a.shape[-1] // 4
    scale = jnp.concatenate([jnp.ones((2 * h,), a.dtype),
                             jnp.full((h,), 2, a.dtype),
                             jnp.ones((h,), a.dtype)])
    return a * scale


@jax.jit
def lstm_model_forward(x, params):
    """x: (B, T, D_in) batch_first, like PyTorch. Returns (B, output_size) f32."""
    (w_ih0_t, w_hh0_t, b0, w_ihr, w_hhr, br, w_fc_t, b_fc) = params
    B, T, D = x.shape
    H = w_hh0_t.shape[0]
    L = 1 + w_ihr.shape[0]
    O = w_fc_t.shape[1]
    O_pad = ((O + 127) // 128) * 128

    # Kernel-side parameter prep (tiny, fused by XLA): g-gate columns
    # pre-scaled by 2 (power of two -> exact), matmul operands cast to bf16,
    # FC padded to a lane-dense width.
    w_ih0_k = _scale_g_cols(w_ih0_t).astype(jnp.bfloat16)    # (D, 4H)
    w_hh0_k = _scale_g_cols(w_hh0_t).astype(jnp.bfloat16)    # (H, 4H)
    b0_k = _scale_g_cols(b0)                                 # (1, 4H) f32
    w_ihr_k = _scale_g_cols(w_ihr).astype(jnp.bfloat16)      # (L-1, H, 4H)
    w_hhr_k = _scale_g_cols(w_hhr).astype(jnp.bfloat16)      # (L-1, H, 4H)
    br_k = _scale_g_cols(br)                                 # (L-1, 1, 4H) f32
    w_fc_k = jnp.zeros((H, O_pad), jnp.float32).at[:, :O].set(w_fc_t)
    b_fc_k = jnp.zeros((1, O_pad), jnp.float32).at[:, :O].set(b_fc)

    # Time-major (leading-t) layout: each x[t] read in the kernel is a
    # tile-aligned block at sublane 0.
    x_k = jnp.transpose(x, (1, 0, 2)).astype(jnp.bfloat16)   # (T, B, D)

    flops = (2 * T * B * (H + D) * 4 * H                 # layer-0 cells
             + 2 * (L - 1) * T * B * (2 * H) * 4 * H     # layers 1..L-1 cells
             + 2 * B * H * O_pad)                        # fc
    transcendentals = L * T * B * 5 * H                  # sigmoid(4H) + tanh(H)
    operands = (x_k, w_ih0_k, w_hh0_k, b0_k, w_ihr_k, w_hhr_k, br_k,
                w_fc_k, b_fc_k)
    bytes_accessed = int(sum(int(a.size) * a.dtype.itemsize for a in operands)
                         + B * O_pad * 4)

    vmem = pl.BlockSpec(memory_space=pltpu.MemorySpace.VMEM)
    # Total operands + live state are ~100 KiB: trivially VMEM-resident on
    # v5e/v6e/v7x; no grid, no streaming, no cross-core split (latency-bound).
    out_pad = pl.pallas_call(
        lstm_wavefront_kernel,
        out_shape=jax.ShapeDtypeStruct((B, O_pad), jnp.float32),
        in_specs=[vmem] * 9,
        out_specs=vmem,
        compiler_params=pltpu.CompilerParams(
            vmem_limit_bytes=4 * 1024 * 1024),
        cost_estimate=pl.CostEstimate(flops=flops,
                                      transcendentals=transcendentals,
                                      bytes_accessed=bytes_accessed),
    )(*operands)
    return out_pad[:, :O]


def init_params(key, input_size, hidden_size, num_layers, output_size):
    """Deterministic PyTorch-style init: U(-1/sqrt(H), 1/sqrt(H))."""
    H = hidden_size
    k = 1.0 / jnp.sqrt(jnp.float32(H))
    keys = jax.random.split(key, 4 * num_layers + 2)

    def u(kk, shape):
        return jax.random.uniform(kk, shape, jnp.float32, -k, k)

    # layer 0
    w_ih0 = u(keys[0], (4 * H, input_size))
    w_hh0 = u(keys[1], (4 * H, H))
    b_ih0 = u(keys[2], (4 * H,))
    b_hh0 = u(keys[3], (4 * H,))
    w_ih0_t = w_ih0.T                              # (D, 4H)
    w_hh0_t = w_hh0.T                              # (H, 4H)
    b0 = (b_ih0 + b_hh0).reshape(1, 4 * H)

    # layers 1..L-1
    w_ihr_list, w_hhr_list, br_list = [], [], []
    for l in range(1, num_layers):
        kk = keys[4 * l:4 * l + 4]
        w_ih = u(kk[0], (4 * H, H))
        w_hh = u(kk[1], (4 * H, H))
        b_ih = u(kk[2], (4 * H,))
        b_hh = u(kk[3], (4 * H,))
        w_ihr_list.append(w_ih.T)
        w_hhr_list.append(w_hh.T)
        br_list.append((b_ih + b_hh).reshape(1, 4 * H))
    w_ihr = jnp.stack(w_ihr_list)                  # (L-1, H, 4H)
    w_hhr = jnp.stack(w_hhr_list)                  # (L-1, H, 4H)
    br = jnp.stack(br_list)                        # (L-1, 1, 4H)

    # fc: Linear(H, O), PyTorch default init U(-1/sqrt(H), 1/sqrt(H))
    w_fc = u(keys[-2], (output_size, H))
    b_fc = u(keys[-1], (output_size,))
    w_fc_t = w_fc.T                                # (H, O)
    b_fc2 = b_fc.reshape(1, output_size)

    return (w_ih0_t, w_hh0_t, b0, w_ihr, w_hhr, br, w_fc_t, b_fc2)


def lstm_model_reference(x, params):
    """Pure-JAX f32 reference of the PyTorch forward, for correctness checking."""
    (w_ih0_t, w_hh0_t, b0, w_ihr, w_hhr, br, w_fc_t, b_fc) = params
    B, T, _ = x.shape
    H = w_hh0_t.shape[0]
    L = 1 + w_ihr.shape[0]

    def run_layer(inp, w_ih_t, w_hh_t, b):
        h = jnp.zeros((B, H), jnp.float32)
        c = jnp.zeros((B, H), jnp.float32)
        outs = []
        for t in range(T):
            gates = inp[:, t, :] @ w_ih_t + h @ w_hh_t + b
            i = jax.nn.sigmoid(gates[:, 0 * H:1 * H])
            f = jax.nn.sigmoid(gates[:, 1 * H:2 * H])
            g = jnp.tanh(gates[:, 2 * H:3 * H])
            o = jax.nn.sigmoid(gates[:, 3 * H:4 * H])
            c = f * c + i * g
            h = o * jnp.tanh(c)
            outs.append(h)
        return jnp.stack(outs, axis=1)

    cur = run_layer(x, w_ih0_t, w_hh0_t, b0)
    for l in range(L - 1):
        cur = run_layer(cur, w_ihr[l], w_hhr[l], br[l])
    return cur[:, -1, :] @ w_fc_t + b_fc


if __name__ == "__main__":
    # Small shapes consistent with the module: hidden=32, 5 LSTM layers, 5 classes.
    B, T, D_IN = 2, 8, 16
    HIDDEN = 32
    NUM_LAYERS = 5
    OUTPUT = 5  # len(labels) + 1

    key = jax.random.PRNGKey(0)
    k_x, k_p = jax.random.split(key)
    x = jax.random.normal(k_x, (B, T, D_IN), jnp.float32)  # (batch, seq, input)
    params = init_params(k_p, D_IN, HIDDEN, NUM_LAYERS, OUTPUT)

    out = lstm_model_forward(x, params)
    out = jax.block_until_ready(out)

    ref = lstm_model_reference(x, params)
    assert out.shape == (B, OUTPUT)
    # bf16 MXU operands (f32 accumulation / f32 gate math) -> loosened tolerance.
    assert jnp.allclose(out, ref, atol=2e-2, rtol=2e-2), (out, ref)

    print("KERNEL_OK")
</pallas_src>

<mosaic_0001>
module attributes {stable_mosaic.version = 11 : i64} {
  func.func @lstm_wavefront_kernel(%arg0: memref<8x2x16xbf16, #tpu.memory_space<vmem>>, %arg1: memref<16x128xbf16, #tpu.memory_space<vmem>>, %arg2: memref<32x128xbf16, #tpu.memory_space<vmem>>, %arg3: memref<1x128xf32, #tpu.memory_space<vmem>>, %arg4: memref<4x32x128xbf16, #tpu.memory_space<vmem>>, %arg5: memref<4x32x128xbf16, #tpu.memory_space<vmem>>, %arg6: memref<4x1x128xf32, #tpu.memory_space<vmem>>, %arg7: memref<32x128xf32, #tpu.memory_space<vmem>>, %arg8: memref<1x128xf32, #tpu.memory_space<vmem>>, %arg9: memref<2x128xf32, #tpu.memory_space<vmem>>) attributes {dimension_semantics = [], scalar_prefetch = 0 : i64, scratch_operands = 0 : i64, tpu.core_type = #tpu.core_type<tc>} {
    %cst = arith.constant 0.000000e+00 : f32
    %0 = vector.broadcast %cst : f32 to vector<2x32xf32>
    %c0 = arith.constant 0 : index
    %c0_0 = arith.constant 0 : index
    %c0_1 = arith.constant 0 : index
    %1 = vector.load %arg0[%c0, %c0_0, %c0_1] : memref<8x2x16xbf16, #tpu.memory_space<vmem>>, vector<1x2x16xbf16>
    %2 = vector.shape_cast %1 : vector<1x2x16xbf16> to vector<2x16xbf16>
    %c0_2 = arith.constant 0 : index
    %c0_3 = arith.constant 0 : index
    %3 = vector.load %arg1[%c0_2, %c0_3] : memref<16x128xbf16, #tpu.memory_space<vmem>>, vector<16x128xbf16>
    %c0_4 = arith.constant 0 : index
    %c0_5 = arith.constant 0 : index
    %4 = vector.load %arg2[%c0_4, %c0_5] : memref<32x128xbf16, #tpu.memory_space<vmem>>, vector<32x128xbf16>
    %c0_6 = arith.constant 0 : index
    %c0_7 = arith.constant 0 : index
    %5 = vector.load %arg3[%c0_6, %c0_7] : memref<1x128xf32, #tpu.memory_space<vmem>>, vector<1x128xf32>
    %6 = arith.truncf %0 : vector<2x32xf32> to vector<2x32xbf16>
    %cst_8 = arith.constant dense<0.000000e+00> : vector<2x128xf32>
    %7 = tpu.matmul %6, %4, %cst_8 {dimension_numbers = #tpu.dot_dimension_numbers<[1], [0], [0], [1], [0, 0, 1, 1], [], []>} : vector<2x32xbf16>, vector<32x128xbf16>, vector<2x128xf32> -> vector<2x128xf32>
    %cst_9 = arith.constant dense<0.000000e+00> : vector<2x128xf32>
    %8 = tpu.matmul %2, %3, %cst_9 {dimension_numbers = #tpu.dot_dimension_numbers<[1], [0], [0], [1], [0, 0, 1, 1], [], []>} : vector<2x16xbf16>, vector<16x128xbf16>, vector<2x128xf32> -> vector<2x128xf32>
    %9 = arith.addf %7, %8 : vector<2x128xf32>
    %10 = vector.broadcast %5 : vector<1x128xf32> to vector<2x128xf32>
    %11 = arith.addf %9, %10 : vector<2x128xf32>
    %12 = arith.negf %11 : vector<2x128xf32>
    %13 = math.exp %12 : vector<2x128xf32>
    %cst_10 = arith.constant 1.000000e+00 : f32
    %14 = vector.broadcast %cst_10 : f32 to vector<2x128xf32>
    %15 = arith.addf %14, %13 : vector<2x128xf32>
    %16 = arith.divf %14, %15 : vector<2x128xf32>
    %17 = vector.extract_strided_slice %16 {offsets = [0, 0], sizes = [2, 32], strides = [1, 1]} : vector<2x128xf32> to vector<2x32xf32>
    %18 = vector.extract_strided_slice %16 {offsets = [0, 32], sizes = [2, 32], strides = [1, 1]} : vector<2x128xf32> to vector<2x32xf32>
    %19 = vector.extract_strided_slice %16 {offsets = [0, 64], sizes = [2, 32], strides = [1, 1]} : vector<2x128xf32> to vector<2x32xf32>
    %cst_11 = arith.constant 2.000000e+00 : f32
    %20 = vector.broadcast %cst_11 : f32 to vector<2x32xf32>
    %21 = arith.mulf %20, %19 : vector<2x32xf32>
    %cst_12 = arith.constant 1.000000e+00 : f32
    %22 = vector.broadcast %cst_12 : f32 to vector<2x32xf32>
    %23 = arith.subf %21, %22 : vector<2x32xf32>
    %24 = vector.extract_strided_slice %16 {offsets = [0, 96], sizes = [2, 32], strides = [1, 1]} : vector<2x128xf32> to vector<2x32xf32>
    %25 = arith.mulf %18, %0 : vector<2x32xf32>
    %26 = arith.mulf %17, %23 : vector<2x32xf32>
    %27 = arith.addf %25, %26 : vector<2x32xf32>
    %28 = math.tanh %27 : vector<2x32xf32>
    %29 = arith.mulf %24, %28 : vector<2x32xf32>
    %c1 = arith.constant 1 : index
    %c0_13 = arith.constant 0 : index
    %c0_14 = arith.constant 0 : index
    %30 = vector.load %arg0[%c1, %c0_13, %c0_14] : memref<8x2x16xbf16, #tpu.memory_space<vmem>>, vector<1x2x16xbf16>
    %31 = vector.shape_cast %30 : vector<1x2x16xbf16> to vector<2x16xbf16>
    %c0_15 = arith.constant 0 : index
    %c0_16 = arith.constant 0 : index
    %32 = vector.load %arg1[%c0_15, %c0_16] : memref<16x128xbf16, #tpu.memory_space<vmem>>, vector<16x128xbf16>
    %c0_17 = arith.constant 0 : index
    %c0_18 = arith.constant 0 : index
    %33 = vector.load %arg2[%c0_17, %c0_18] : memref<32x128xbf16, #tpu.memory_space<vmem>>, vector<32x128xbf16>
    %c0_19 = arith.constant 0 : index
    %c0_20 = arith.constant 0 : index
    %34 = vector.load %arg3[%c0_19, %c0_20] : memref<1x128xf32, #tpu.memory_space<vmem>>, vector<1x128xf32>
    %35 = arith.truncf %29 : vector<2x32xf32> to vector<2x32xbf16>
    %cst_21 = arith.constant dense<0.000000e+00> : vector<2x128xf32>
    %36 = tpu.matmul %35, %33, %cst_21 {dimension_numbers = #tpu.dot_dimension_numbers<[1], [0], [0], [1], [0, 0, 1, 1], [], []>} : vector<2x32xbf16>, vector<32x128xbf16>, vector<2x128xf32> -> vector<2x128xf32>
    %cst_22 = arith.constant dense<0.000000e+00> : vector<2x128xf32>
    %37 = tpu.matmul %31, %32, %cst_22 {dimension_numbers = #tpu.dot_dimension_numbers<[1], [0], [0], [1], [0, 0, 1, 1], [], []>} : vector<2x16xbf16>, vector<16x128xbf16>, vector<2x128xf32> -> vector<2x128xf32>
    %38 = arith.addf %36, %37 : vector<2x128xf32>
    %39 = vector.broadcast %34 : vector<1x128xf32> to vector<2x128xf32>
    %40 = arith.addf %38, %39 : vector<2x128xf32>
    %41 = arith.negf %40 : vector<2x128xf32>
    %42 = math.exp %41 : vector<2x128xf32>
    %cst_23 = arith.constant 1.000000e+00 : f32
    %43 = vector.broadcast %cst_23 : f32 to vector<2x128xf32>
    %44 = arith.addf %43, %42 : vector<2x128xf32>
    %45 = arith.divf %43, %44 : vector<2x128xf32>
    %46 = vector.extract_strided_slice %45 {offsets = [0, 0], sizes = [2, 32], strides = [1, 1]} : vector<2x128xf32> to vector<2x32xf32>
    %47 = vector.extract_strided_slice %45 {offsets = [0, 32], sizes = [2, 32], strides = [1, 1]} : vector<2x128xf32> to vector<2x32xf32>
    %48 = vector.extract_strided_slice %45 {offsets = [0, 64], sizes = [2, 32], strides = [1, 1]} : vector<2x128xf32> to vector<2x32xf32>
    %cst_24 = arith.constant 2.000000e+00 : f32
    %49 = vector.broadcast %cst_24 : f32 to vector<2x32xf32>
    %50 = arith.mulf %49, %48 : vector<2x32xf32>
    %cst_25 = arith.constant 1.000000e+00 : f32
    %51 = vector.broadcast %cst_25 : f32 to vector<2x32xf32>
    %52 = arith.subf %50, %51 : vector<2x32xf32>
    %53 = vector.extract_strided_slice %45 {offsets = [0, 96], sizes = [2, 32], strides = [1, 1]} : vector<2x128xf32> to vector<2x32xf32>
    %54 = arith.mulf %47, %27 : vector<2x32xf32>
    %55 = arith.mulf %46, %52 : vector<2x32xf32>
    %56 = arith.addf %54, %55 : vector<2x32xf32>
    %57 = math.tanh %56 : vector<2x32xf32>
    %58 = arith.mulf %53, %57 : vector<2x32xf32>
    %59 = arith.truncf %29 : vector<2x32xf32> to vector<2x32xbf16>
    %c0_26 = arith.constant 0 : index
    %c0_27 = arith.constant 0 : index
    %c0_28 = arith.constant 0 : index
    %60 = vector.load %arg4[%c0_26, %c0_27, %c0_28] : memref<4x32x128xbf16, #tpu.memory_space<vmem>>, vector<1x32x128xbf16>
    %61 = vector.shape_cast %60 : vector<1x32x128xbf16> to vector<32x128xbf16>
    %c0_29 = arith.constant 0 : index
    %c0_30 = arith.constant 0 : index
    %c0_31 = arith.constant 0 : index
    %62 = vector.load %arg5[%c0_29, %c0_30, %c0_31] : memref<4x32x128xbf16, #tpu.memory_space<vmem>>, vector<1x32x128xbf16>
    %63 = vector.shape_cast %62 : vector<1x32x128xbf16> to vector<32x128xbf16>
    %c0_32 = arith.constant 0 : index
    %c0_33 = arith.constant 0 : index
    %c0_34 = arith.constant 0 : index
    %64 = vector.load %arg6[%c0_32, %c0_33, %c0_34] : memref<4x1x128xf32, #tpu.memory_space<vmem>>, vector<1x1x128xf32>
    %65 = vector.shape_cast %64 : vector<1x1x128xf32> to vector<1x128xf32>
    %66 = arith.truncf %0 : vector<2x32xf32> to vector<2x32xbf16>
    %cst_35 = arith.constant dense<0.000000e+00> : vector<2x128xf32>
    %67 = tpu.matmul %66, %63, %cst_35 {dimension_numbers = #tpu.dot_dimension_numbers<[1], [0], [0], [1], [0, 0, 1, 1], [], []>} : vector<2x32xbf16>, vector<32x128xbf16>, vector<2x128xf32> -> vector<2x128xf32>
    %cst_36 = arith.constant dense<0.000000e+00> : vector<2x128xf32>
    %68 = tpu.matmul %59, %61, %cst_36 {dimension_numbers = #tpu.dot_dimension_numbers<[1], [0], [0], [1], [0, 0, 1, 1], [], []>} : vector<2x32xbf16>, vector<32x128xbf16>, vector<2x128xf32> -> vector<2x128xf32>
    %69 = arith.addf %67, %68 : vector<2x128xf32>
    %70 = vector.broadcast %65 : vector<1x128xf32> to vector<2x128xf32>
    %71 = arith.addf %69, %70 : vector<2x128xf32>
    %72 = arith.negf %71 : vector<2x128xf32>
    %73 = math.exp %72 : vector<2x128xf32>
    %cst_37 = arith.constant 1.000000e+00 : f32
    %74 = vector.broadcast %cst_37 : f32 to vector<2x128xf32>
    %75 = arith.addf %74, %73 : vector<2x128xf32>
    %76 = arith.divf %74, %75 : vector<2x128xf32>
    %77 = vector.extract_strided_slice %76 {offsets = [0, 0], sizes = [2, 32], strides = [1, 1]} : vector<2x128xf32> to vector<2x32xf32>
    %78 = vector.extract_strided_slice %76 {offsets = [0, 32], sizes = [2, 32], strides = [1, 1]} : vector<2x128xf32> to vector<2x32xf32>
    %79 = vector.extract_strided_slice %76 {offsets = [0, 64], sizes = [2, 32], strides = [1, 1]} : vector<2x128xf32> to vector<2x32xf32>
    %cst_38 = arith.constant 2.000000e+00 : f32
    %80 = vector.broadcast %cst_38 : f32 to vector<2x32xf32>
    %81 = arith.mulf %80, %79 : vector<2x32xf32>
    %cst_39 = arith.constant 1.000000e+00 : f32
    %82 = vector.broadcast %cst_39 : f32 to vector<2x32xf32>
    %83 = arith.subf %81, %82 : vector<2x32xf32>
    %84 = vector.extract_strided_slice %76 {offsets = [0, 96], sizes = [2, 32], strides = [1, 1]} : vector<2x128xf32> to vector<2x32xf32>
    %85 = arith.mulf %78, %0 : vector<2x32xf32>
    %86 = arith.mulf %77, %83 : vector<2x32xf32>
    %87 = arith.addf %85, %86 : vector<2x32xf32>
    %88 = math.tanh %87 : vector<2x32xf32>
    %89 = arith.mulf %84, %88 : vector<2x32xf32>
    %c2 = arith.constant 2 : index
    %c0_40 = arith.constant 0 : index
    %c0_41 = arith.constant 0 : index
    %90 = vector.load %arg0[%c2, %c0_40, %c0_41] : memref<8x2x16xbf16, #tpu.memory_space<vmem>>, vector<1x2x16xbf16>
    %91 = vector.shape_cast %90 : vector<1x2x16xbf16> to vector<2x16xbf16>
    %c0_42 = arith.constant 0 : index
    %c0_43 = arith.constant 0 : index
    %92 = vector.load %arg1[%c0_42, %c0_43] : memref<16x128xbf16, #tpu.memory_space<vmem>>, vector<16x128xbf16>
    %c0_44 = arith.constant 0 : index
    %c0_45 = arith.constant 0 : index
    %93 = vector.load %arg2[%c0_44, %c0_45] : memref<32x128xbf16, #tpu.memory_space<vmem>>, vector<32x128xbf16>
    %c0_46 = arith.constant 0 : index
    %c0_47 = arith.constant 0 : index
    %94 = vector.load %arg3[%c0_46, %c0_47] : memref<1x128xf32, #tpu.memory_space<vmem>>, vector<1x128xf32>
    %95 = arith.truncf %58 : vector<2x32xf32> to vector<2x32xbf16>
    %cst_48 = arith.constant dense<0.000000e+00> : vector<2x128xf32>
    %96 = tpu.matmul %95, %93, %cst_48 {dimension_numbers = #tpu.dot_dimension_numbers<[1], [0], [0], [1], [0, 0, 1, 1], [], []>} : vector<2x32xbf16>, vector<32x128xbf16>, vector<2x128xf32> -> vector<2x128xf32>
    %cst_49 = arith.constant dense<0.000000e+00> : vector<2x128xf32>
    %97 = tpu.matmul %91, %92, %cst_49 {dimension_numbers = #tpu.dot_dimension_numbers<[1], [0], [0], [1], [0, 0, 1, 1], [], []>} : vector<2x16xbf16>, vector<16x128xbf16>, vector<2x128xf32> -> vector<2x128xf32>
    %98 = arith.addf %96, %97 : vector<2x128xf32>
    %99 = vector.broadcast %94 : vector<1x128xf32> to vector<2x128xf32>
    %100 = arith.addf %98, %99 : vector<2x128xf32>
    %101 = arith.negf %100 : vector<2x128xf32>
    %102 = math.exp %101 : vector<2x128xf32>
    %cst_50 = arith.constant 1.000000e+00 : f32
    %103 = vector.broadcast %cst_50 : f32 to vector<2x128xf32>
    %104 = arith.addf %103, %102 : vector<2x128xf32>
    %105 = arith.divf %103, %104 : vector<2x128xf32>
    %106 = vector.extract_strided_slice %105 {offsets = [0, 0], sizes = [2, 32], strides = [1, 1]} : vector<2x128xf32> to vector<2x32xf32>
    %107 = vector.extract_strided_slice %105 {offsets = [0, 32], sizes = [2, 32], strides = [1, 1]} : vector<2x128xf32> to vector<2x32xf32>
    %108 = vector.extract_strided_slice %105 {offsets = [0, 64], sizes = [2, 32], strides = [1, 1]} : vector<2x128xf32> to vector<2x32xf32>
    %cst_51 = arith.constant 2.000000e+00 : f32
    %109 = vector.broadcast %cst_51 : f32 to vector<2x32xf32>
    %110 = arith.mulf %109, %108 : vector<2x32xf32>
    %cst_52 = arith.constant 1.000000e+00 : f32
    %111 = vector.broadcast %cst_52 : f32 to vector<2x32xf32>
    %112 = arith.subf %110, %111 : vector<2x32xf32>
    %113 = vector.extract_strided_slice %105 {offsets = [0, 96], sizes = [2, 32], strides = [1, 1]} : vector<2x128xf32> to vector<2x32xf32>
    %114 = arith.mulf %107, %56 : vector<2x32xf32>
    %115 = arith.mulf %106, %112 : vector<2x32xf32>
    %116 = arith.addf %114, %115 : vector<2x32xf32>
    %117 = math.tanh %116 : vector<2x32xf32>
    %118 = arith.mulf %113, %117 : vector<2x32xf32>
    %119 = arith.truncf %58 : vector<2x32xf32> to vector<2x32xbf16>
    %c0_53 = arith.constant 0 : index
    %c0_54 = arith.constant 0 : index
    %c0_55 = arith.constant 0 : index
    %120 = vector.load %arg4[%c0_53, %c0_54, %c0_55] : memref<4x32x128xbf16, #tpu.memory_space<vmem>>, vector<1x32x128xbf16>
    %121 = vector.shape_cast %120 : vector<1x32x128xbf16> to vector<32x128xbf16>
    %c0_56 = arith.constant 0 : index
    %c0_57 = arith.constant 0 : index
    %c0_58 = arith.constant 0 : index
    %122 = vector.load %arg5[%c0_56, %c0_57, %c0_58] : memref<4x32x128xbf16, #tpu.memory_space<vmem>>, vector<1x32x128xbf16>
    %123 = vector.shape_cast %122 : vector<1x32x128xbf16> to vector<32x128xbf16>
    %c0_59 = arith.constant 0 : index
    %c0_60 = arith.constant 0 : index
    %c0_61 = arith.constant 0 : index
    %124 = vector.load %arg6[%c0_59, %c0_60, %c0_61] : memref<4x1x128xf32, #tpu.memory_space<vmem>>, vector<1x1x128xf32>
    %125 = vector.shape_cast %124 : vector<1x1x128xf32> to vector<1x128xf32>
    %126 = arith.truncf %89 : vector<2x32xf32> to vector<2x32xbf16>
    %cst_62 = arith.constant dense<0.000000e+00> : vector<2x128xf32>
    %127 = tpu.matmul %126, %123, %cst_62 {dimension_numbers = #tpu.dot_dimension_numbers<[1], [0], [0], [1], [0, 0, 1, 1], [], []>} : vector<2x32xbf16>, vector<32x128xbf16>, vector<2x128xf32> -> vector<2x128xf32>
    %cst_63 = arith.constant dense<0.000000e+00> : vector<2x128xf32>
    %128 = tpu.matmul %119, %121, %cst_63 {dimension_numbers = #tpu.dot_dimension_numbers<[1], [0], [0], [1], [0, 0, 1, 1], [], []>} : vector<2x32xbf16>, vector<32x128xbf16>, vector<2x128xf32> -> vector<2x128xf32>
    %129 = arith.addf %127, %128 : vector<2x128xf32>
    %130 = vector.broadcast %125 : vector<1x128xf32> to vector<2x128xf32>
    %131 = arith.addf %129, %130 : vector<2x128xf32>
    %132 = arith.negf %131 : vector<2x128xf32>
    %133 = math.exp %132 : vector<2x128xf32>
    %cst_64 = arith.constant 1.000000e+00 : f32
    %134 = vector.broadcast %cst_64 : f32 to vector<2x128xf32>
    %135 = arith.addf %134, %133 : vector<2x128xf32>
    %136 = arith.divf %134, %135 : vector<2x128xf32>
    %137 = vector.extract_strided_slice %136 {offsets = [0, 0], sizes = [2, 32], strides = [1, 1]} : vector<2x128xf32> to vector<2x32xf32>
    %138 = vector.extract_strided_slice %136 {offsets = [0, 32], sizes = [2, 32], strides = [1, 1]} : vector<2x128xf32> to vector<2x32xf32>
    %139 = vector.extract_strided_slice %136 {offsets = [0, 64], sizes = [2, 32], strides = [1, 1]} : vector<2x128xf32> to vector<2x32xf32>
    %cst_65 = arith.constant 2.000000e+00 : f32
    %140 = vector.broadcast %cst_65 : f32 to vector<2x32xf32>
    %141 = arith.mulf %140, %139 : vector<2x32xf32>
    %cst_66 = arith.constant 1.000000e+00 : f32
    %142 = vector.broadcast %cst_66 : f32 to vector<2x32xf32>
    %143 = arith.subf %141, %142 : vector<2x32xf32>
    %144 = vector.extract_strided_slice %136 {offsets = [0, 96], sizes = [2, 32], strides = [1, 1]} : vector<2x128xf32> to vector<2x32xf32>
    %145 = arith.mulf %138, %87 : vector<2x32xf32>
    %146 = arith.mulf %137, %143 : vector<2x32xf32>
    %147 = arith.addf %145, %146 : vector<2x32xf32>
    %148 = math.tanh %147 : vector<2x32xf32>
    %149 = arith.mulf %144, %148 : vector<2x32xf32>
    %150 = arith.truncf %89 : vector<2x32xf32> to vector<2x32xbf16>
    %c1_67 = arith.constant 1 : index
    %c0_68 = arith.constant 0 : index
    %c0_69 = arith.constant 0 : index
    %151 = vector.load %arg4[%c1_67, %c0_68, %c0_69] : memref<4x32x128xbf16, #tpu.memory_space<vmem>>, vector<1x32x128xbf16>
    %152 = vector.shape_cast %151 : vector<1x32x128xbf16> to vector<32x128xbf16>
    %c1_70 = arith.constant 1 : index
    %c0_71 = arith.constant 0 : index
    %c0_72 = arith.constant 0 : index
    %153 = vector.load %arg5[%c1_70, %c0_71, %c0_72] : memref<4x32x128xbf16, #tpu.memory_space<vmem>>, vector<1x32x128xbf16>
    %154 = vector.shape_cast %153 : vector<1x32x128xbf16> to vector<32x128xbf16>
    %c1_73 = arith.constant 1 : index
    %c0_74 = arith.constant 0 : index
    %c0_75 = arith.constant 0 : index
    %155 = vector.load %arg6[%c1_73, %c0_74, %c0_75] : memref<4x1x128xf32, #tpu.memory_space<vmem>>, vector<1x1x128xf32>
    %156 = vector.shape_cast %155 : vector<1x1x128xf32> to vector<1x128xf32>
    %157 = arith.truncf %0 : vector<2x32xf32> to vector<2x32xbf16>
    %cst_76 = arith.constant dense<0.000000e+00> : vector<2x128xf32>
    %158 = tpu.matmul %157, %154, %cst_76 {dimension_numbers = #tpu.dot_dimension_numbers<[1], [0], [0], [1], [0, 0, 1, 1], [], []>} : vector<2x32xbf16>, vector<32x128xbf16>, vector<2x128xf32> -> vector<2x128xf32>
    %cst_77 = arith.constant dense<0.000000e+00> : vector<2x128xf32>
    %159 = tpu.matmul %150, %152, %cst_77 {dimension_numbers = #tpu.dot_dimension_numbers<[1], [0], [0], [1], [0, 0, 1, 1], [], []>} : vector<2x32xbf16>, vector<32x128xbf16>, vector<2x128xf32> -> vector<2x128xf32>
    %160 = arith.addf %158, %159 : vector<2x128xf32>
    %161 = vector.broadcast %156 : vector<1x128xf32> to vector<2x128xf32>
    %162 = arith.addf %160, %161 : vector<2x128xf32>
    %163 = arith.negf %162 : vector<2x128xf32>
    %164 = math.exp %163 : vector<2x128xf32>
    %cst_78 = arith.constant 1.000000e+00 : f32
    %165 = vector.broadcast %cst_78 : f32 to vector<2x128xf32>
    %166 = arith.addf %165, %164 : vector<2x128xf32>
    %167 = arith.divf %165, %166 : vector<2x128xf32>
    %168 = vector.extract_strided_slice %167 {offsets = [0, 0], sizes = [2, 32], strides = [1, 1]} : vector<2x128xf32> to vector<2x32xf32>
    %169 = vector.extract_strided_slice %167 {offsets = [0, 32], sizes = [2, 32], strides = [1, 1]} : vector<2x128xf32> to vector<2x32xf32>
    %170 = vector.extract_strided_slice %167 {offsets = [0, 64], sizes = [2, 32], strides = [1, 1]} : vector<2x128xf32> to vector<2x32xf32>
    %cst_79 = arith.constant 2.000000e+00 : f32
    %171 = vector.broadcast %cst_79 : f32 to vector<2x32xf32>
    %172 = arith.mulf %171, %170 : vector<2x32xf32>
    %cst_80 = arith.constant 1.000000e+00 : f32
    %173 = vector.broadcast %cst_80 : f32 to vector<2x32xf32>
    %174 = arith.subf %172, %173 : vector<2x32xf32>
    %175 = vector.extract_strided_slice %167 {offsets = [0, 96], sizes = [2, 32], strides = [1, 1]} : vector<2x128xf32> to vector<2x32xf32>
    %176 = arith.mulf %169, %0 : vector<2x32xf32>
    %177 = arith.mulf %168, %174 : vector<2x32xf32>
    %178 = arith.addf %176, %177 : vector<2x32xf32>
    %179 = math.tanh %178 : vector<2x32xf32>
    %180 = arith.mulf %175, %179 : vector<2x32xf32>
    %c3 = arith.constant 3 : index
    %c0_81 = arith.constant 0 : index
    %c0_82 = arith.constant 0 : index
    %181 = vector.load %arg0[%c3, %c0_81, %c0_82] : memref<8x2x16xbf16, #tpu.memory_space<vmem>>, vector<1x2x16xbf16>
    %182 = vector.shape_cast %181 : vector<1x2x16xbf16> to vector<2x16xbf16>
    %c0_83 = arith.constant 0 : index
    %c0_84 = arith.constant 0 : index
    %183 = vector.load %arg1[%c0_83, %c0_84] : memref<16x128xbf16, #tpu.memory_space<vmem>>, vector<16x128xbf16>
    %c0_85 = arith.constant 0 : index
    %c0_86 = arith.constant 0 : index
    %184 = vector.load %arg2[%c0_85, %c0_86] : memref<32x128xbf16, #tpu.memory_space<vmem>>, vector<32x128xbf16>
    %c0_87 = arith.constant 0 : index
    %c0_88 = arith.constant 0 : index
    %185 = vector.load %arg3[%c0_87, %c0_88] : memref<1x128xf32, #tpu.memory_space<vmem>>, vector<1x128xf32>
    %186 = arith.truncf %118 : vector<2x32xf32> to vector<2x32xbf16>
    %cst_89 = arith.constant dense<0.000000e+00> : vector<2x128xf32>
    %187 = tpu.matmul %186, %184, %cst_89 {dimension_numbers = #tpu.dot_dimension_numbers<[1], [0], [0], [1], [0, 0, 1, 1], [], []>} : vector<2x32xbf16>, vector<32x128xbf16>, vector<2x128xf32> -> vector<2x128xf32>
    %cst_90 = arith.constant dense<0.000000e+00> : vector<2x128xf32>
    %188 = tpu.matmul %182, %183, %cst_90 {dimension_numbers = #tpu.dot_dimension_numbers<[1], [0], [0], [1], [0, 0, 1, 1], [], []>} : vector<2x16xbf16>, vector<16x128xbf16>, vector<2x128xf32> -> vector<2x128xf32>
    %189 = arith.addf %187, %188 : vector<2x128xf32>
    %190 = vector.broadcast %185 : vector<1x128xf32> to vector<2x128xf32>
    %191 = arith.addf %189, %190 : vector<2x128xf32>
    %192 = arith.negf %191 : vector<2x128xf32>
    %193 = math.exp %192 : vector<2x128xf32>
    %cst_91 = arith.constant 1.000000e+00 : f32
    %194 = vector.broadcast %cst_91 : f32 to vector<2x128xf32>
    %195 = arith.addf %194, %193 : vector<2x128xf32>
    %196 = arith.divf %194, %195 : vector<2x128xf32>
    %197 = vector.extract_strided_slice %196 {offsets = [0, 0], sizes = [2, 32], strides = [1, 1]} : vector<2x128xf32> to vector<2x32xf32>
    %198 = vector.extract_strided_slice %196 {offsets = [0, 32], sizes = [2, 32], strides = [1, 1]} : vector<2x128xf32> to vector<2x32xf32>
    %199 = vector.extract_strided_slice %196 {offsets = [0, 64], sizes = [2, 32], strides = [1, 1]} : vector<2x128xf32> to vector<2x32xf32>
    %cst_92 = arith.constant 2.000000e+00 : f32
    %200 = vector.broadcast %cst_92 : f32 to vector<2x32xf32>
    %201 = arith.mulf %200, %199 : vector<2x32xf32>
    %cst_93 = arith.constant 1.000000e+00 : f32
    %202 = vector.broadcast %cst_93 : f32 to vector<2x32xf32>
    %203 = arith.subf %201, %202 : vector<2x32xf32>
    %204 = vector.extract_strided_slice %196 {offsets = [0, 96], sizes = [2, 32], strides = [1, 1]} : vector<2x128xf32> to vector<2x32xf32>
    %205 = arith.mulf %198, %116 : vector<2x32xf32>
    %206 = arith.mulf %197, %203 : vector<2x32xf32>
    %207 = arith.addf %205, %206 : vector<2x32xf32>
    %208 = math.tanh %207 : vector<2x32xf32>
    %209 = arith.mulf %204, %208 : vector<2x32xf32>
    %210 = arith.truncf %118 : vector<2x32xf32> to vector<2x32xbf16>
    %c0_94 = arith.constant 0 : index
    %c0_95 = arith.constant 0 : index
    %c0_96 = arith.constant 0 : index
    %211 = vector.load %arg4[%c0_94, %c0_95, %c0_96] : memref<4x32x128xbf16, #tpu.memory_space<vmem>>, vector<1x32x128xbf16>
    %212 = vector.shape_cast %211 : vector<1x32x128xbf16> to vector<32x128xbf16>
    %c0_97 = arith.constant 0 : index
    %c0_98 = arith.constant 0 : index
    %c0_99 = arith.constant 0 : index
    %213 = vector.load %arg5[%c0_97, %c0_98, %c0_99] : memref<4x32x128xbf16, #tpu.memory_space<vmem>>, vector<1x32x128xbf16>
    %214 = vector.shape_cast %213 : vector<1x32x128xbf16> to vector<32x128xbf16>
    %c0_100 = arith.constant 0 : index
    %c0_101 = arith.constant 0 : index
    %c0_102 = arith.constant 0 : index
    %215 = vector.load %arg6[%c0_100, %c0_101, %c0_102] : memref<4x1x128xf32, #tpu.memory_space<vmem>>, vector<1x1x128xf32>
    %216 = vector.shape_cast %215 : vector<1x1x128xf32> to vector<1x128xf32>
    %217 = arith.truncf %149 : vector<2x32xf32> to vector<2x32xbf16>
    %cst_103 = arith.constant dense<0.000000e+00> : vector<2x128xf32>
    %218 = tpu.matmul %217, %214, %cst_103 {dimension_numbers = #tpu.dot_dimension_numbers<[1], [0], [0], [1], [0, 0, 1, 1], [], []>} : vector<2x32xbf16>, vector<32x128xbf16>, vector<2x128xf32> -> vector<2x128xf32>
    %cst_104 = arith.constant dense<0.000000e+00> : vector<2x128xf32>
    %219 = tpu.matmul %210, %212, %cst_104 {dimension_numbers = #tpu.dot_dimension_numbers<[1], [0], [0], [1], [0, 0, 1, 1], [], []>} : vector<2x32xbf16>, vector<32x128xbf16>, vector<2x128xf32> -> vector<2x128xf32>
    %220 = arith.addf %218, %219 : vector<2x128xf32>
    %221 = vector.broadcast %216 : vector<1x128xf32> to vector<2x128xf32>
    %222 = arith.addf %220, %221 : vector<2x128xf32>
    %223 = arith.negf %222 : vector<2x128xf32>
    %224 = math.exp %223 : vector<2x128xf32>
    %cst_105 = arith.constant 1.000000e+00 : f32
    %225 = vector.broadcast %cst_105 : f32 to vector<2x128xf32>
    %226 = arith.addf %225, %224 : vector<2x128xf32>
    %227 = arith.divf %225, %226 : vector<2x128xf32>
    %228 = vector.extract_strided_slice %227 {offsets = [0, 0], sizes = [2, 32], strides = [1, 1]} : vector<2x128xf32> to vector<2x32xf32>
    %229 = vector.extract_strided_slice %227 {offsets = [0, 32], sizes = [2, 32], strides = [1, 1]} : vector<2x128xf32> to vector<2x32xf32>
    %230 = vector.extract_strided_slice %227 {offsets = [0, 64], sizes = [2, 32], strides = [1, 1]} : vector<2x128xf32> to vector<2x32xf32>
    %cst_106 = arith.constant 2.000000e+00 : f32
    %231 = vector.broadcast %cst_106 : f32 to vector<2x32xf32>
    %232 = arith.mulf %231, %230 : vector<2x32xf32>
    %cst_107 = arith.constant 1.000000e+00 : f32
    %233 = vector.broadcast %cst_107 : f32 to vector<2x32xf32>
    %234 = arith.subf %232, %233 : vector<2x32xf32>
    %235 = vector.extract_strided_slice %227 {offsets = [0, 96], sizes = [2, 32], strides = [1, 1]} : vector<2x128xf32> to vector<2x32xf32>
    %236 = arith.mulf %229, %147 : vector<2x32xf32>
    %237 = arith.mulf %228, %234 : vector<2x32xf32>
    %238 = arith.addf %236, %237 : vector<2x32xf32>
    %239 = math.tanh %238 : vector<2x32xf32>
    %240 = arith.mulf %235, %239 : vector<2x32xf32>
    %241 = arith.truncf %149 : vector<2x32xf32> to vector<2x32xbf16>
    %c1_108 = arith.constant 1 : index
    %c0_109 = arith.constant 0 : index
    %c0_110 = arith.constant 0 : index
    %242 = vector.load %arg4[%c1_108, %c0_109, %c0_110] : memref<4x32x128xbf16, #tpu.memory_space<vmem>>, vector<1x32x128xbf16>
    %243 = vector.shape_cast %242 : vector<1x32x128xbf16> to vector<32x128xbf16>
    %c1_111 = arith.constant 1 : index
    %c0_112 = arith.constant 0 : index
    %c0_113 = arith.constant 0 : index
    %244 = vector.load %arg5[%c1_111, %c0_112, %c0_113] : memref<4x32x128xbf16, #tpu.memory_space<vmem>>, vector<1x32x128xbf16>
    %245 = vector.shape_cast %244 : vector<1x32x128xbf16> to vector<32x128xbf16>
    %c1_114 = arith.constant 1 : index
    %c0_115 = arith.constant 0 : index
    %c0_116 = arith.constant 0 : index
    %246 = vector.load %arg6[%c1_114, %c0_115, %c0_116] : memref<4x1x128xf32, #tpu.memory_space<vmem>>, vector<1x1x128xf32>
    %247 = vector.shape_cast %246 : vector<1x1x128xf32> to vector<1x128xf32>
    %248 = arith.truncf %180 : vector<2x32xf32> to vector<2x32xbf16>
    %cst_117 = arith.constant dense<0.000000e+00> : vector<2x128xf32>
    %249 = tpu.matmul %248, %245, %cst_117 {dimension_numbers = #tpu.dot_dimension_numbers<[1], [0], [0], [1], [0, 0, 1, 1], [], []>} : vector<2x32xbf16>, vector<32x128xbf16>, vector<2x128xf32> -> vector<2x128xf32>
    %cst_118 = arith.constant dense<0.000000e+00> : vector<2x128xf32>
    %250 = tpu.matmul %241, %243, %cst_118 {dimension_numbers = #tpu.dot_dimension_numbers<[1], [0], [0], [1], [0, 0, 1, 1], [], []>} : vector<2x32xbf16>, vector<32x128xbf16>, vector<2x128xf32> -> vector<2x128xf32>
    %251 = arith.addf %249, %250 : vector<2x128xf32>
    %252 = vector.broadcast %247 : vector<1x128xf32> to vector<2x128xf32>
    %253 = arith.addf %251, %252 : vector<2x128xf32>
    %254 = arith.negf %253 : vector<2x128xf32>
    %255 = math.exp %254 : vector<2x128xf32>
    %cst_119 = arith.constant 1.000000e+00 : f32
    %256 = vector.broadcast %cst_119 : f32 to vector<2x128xf32>
    %257 = arith.addf %256, %255 : vector<2x128xf32>
    %258 = arith.divf %256, %257 : vector<2x128xf32>
    %259 = vector.extract_strided_slice %258 {offsets = [0, 0], sizes = [2, 32], strides = [1, 1]} : vector<2x128xf32> to vector<2x32xf32>
    %260 = vector.extract_strided_slice %258 {offsets = [0, 32], sizes = [2, 32], strides = [1, 1]} : vector<2x128xf32> to vector<2x32xf32>
    %261 = vector.extract_strided_slice %258 {offsets = [0, 64], sizes = [2, 32], strides = [1, 1]} : vector<2x128xf32> to vector<2x32xf32>
    %cst_120 = arith.constant 2.000000e+00 : f32
    %262 = vector.broadcast %cst_120 : f32 to vector<2x32xf32>
    %263 = arith.mulf %262, %261 : vector<2x32xf32>
    %cst_121 = arith.constant 1.000000e+00 : f32
    %264 = vector.broadcast %cst_121 : f32 to vector<2x32xf32>
    %265 = arith.subf %263, %264 : vector<2x32xf32>
    %266 = vector.extract_strided_slice %258 {offsets = [0, 96], sizes = [2, 32], strides = [1, 1]} : vector<2x128xf32> to vector<2x32xf32>
    %267 = arith.mulf %260, %178 : vector<2x32xf32>
    %268 = arith.mulf %259, %265 : vector<2x32xf32>
    %269 = arith.addf %267, %268 : vector<2x32xf32>
    %270 = math.tanh %269 : vector<2x32xf32>
    %271 = arith.mulf %266, %270 : vector<2x32xf32>
    %272 = arith.truncf %180 : vector<2x32xf32> to vector<2x32xbf16>
    %c2_122 = arith.constant 2 : index
    %c0_123 = arith.constant 0 : index
    %c0_124 = arith.constant 0 : index
    %273 = vector.load %arg4[%c2_122, %c0_123, %c0_124] : memref<4x32x128xbf16, #tpu.memory_space<vmem>>, vector<1x32x128xbf16>
    %274 = vector.shape_cast %273 : vector<1x32x128xbf16> to vector<32x128xbf16>
    %c2_125 = arith.constant 2 : index
    %c0_126 = arith.constant 0 : index
    %c0_127 = arith.constant 0 : index
    %275 = vector.load %arg5[%c2_125, %c0_126, %c0_127] : memref<4x32x128xbf16, #tpu.memory_space<vmem>>, vector<1x32x128xbf16>
    %276 = vector.shape_cast %275 : vector<1x32x128xbf16> to vector<32x128xbf16>
    %c2_128 = arith.constant 2 : index
    %c0_129 = arith.constant 0 : index
    %c0_130 = arith.constant 0 : index
    %277 = vector.load %arg6[%c2_128, %c0_129, %c0_130] : memref<4x1x128xf32, #tpu.memory_space<vmem>>, vector<1x1x128xf32>
    %278 = vector.shape_cast %277 : vector<1x1x128xf32> to vector<1x128xf32>
    %279 = arith.truncf %0 : vector<2x32xf32> to vector<2x32xbf16>
    %cst_131 = arith.constant dense<0.000000e+00> : vector<2x128xf32>
    %280 = tpu.matmul %279, %276, %cst_131 {dimension_numbers = #tpu.dot_dimension_numbers<[1], [0], [0], [1], [0, 0, 1, 1], [], []>} : vector<2x32xbf16>, vector<32x128xbf16>, vector<2x128xf32> -> vector<2x128xf32>
    %cst_132 = arith.constant dense<0.000000e+00> : vector<2x128xf32>
    %281 = tpu.matmul %272, %274, %cst_132 {dimension_numbers = #tpu.dot_dimension_numbers<[1], [0], [0], [1], [0, 0, 1, 1], [], []>} : vector<2x32xbf16>, vector<32x128xbf16>, vector<2x128xf32> -> vector<2x128xf32>
    %282 = arith.addf %280, %281 : vector<2x128xf32>
    %283 = vector.broadcast %278 : vector<1x128xf32> to vector<2x128xf32>
    %284 = arith.addf %282, %283 : vector<2x128xf32>
    %285 = arith.negf %284 : vector<2x128xf32>
    %286 = math.exp %285 : vector<2x128xf32>
    %cst_133 = arith.constant 1.000000e+00 : f32
    %287 = vector.broadcast %cst_133 : f32 to vector<2x128xf32>
    %288 = arith.addf %287, %286 : vector<2x128xf32>
    %289 = arith.divf %287, %288 : vector<2x128xf32>
    %290 = vector.extract_strided_slice %289 {offsets = [0, 0], sizes = [2, 32], strides = [1, 1]} : vector<2x128xf32> to vector<2x32xf32>
    %291 = vector.extract_strided_slice %289 {offsets = [0, 32], sizes = [2, 32], strides = [1, 1]} : vector<2x128xf32> to vector<2x32xf32>
    %292 = vector.extract_strided_slice %289 {offsets = [0, 64], sizes = [2, 32], strides = [1, 1]} : vector<2x128xf32> to vector<2x32xf32>
    %cst_134 = arith.constant 2.000000e+00 : f32
    %293 = vector.broadcast %cst_134 : f32 to vector<2x32xf32>
    %294 = arith.mulf %293, %292 : vector<2x32xf32>
    %cst_135 = arith.constant 1.000000e+00 : f32
    %295 = vector.broadcast %cst_135 : f32 to vector<2x32xf32>
    %296 = arith.subf %294, %295 : vector<2x32xf32>
    %297 = vector.extract_strided_slice %289 {offsets = [0, 96], sizes = [2, 32], strides = [1, 1]} : vector<2x128xf32> to vector<2x32xf32>
    %298 = arith.mulf %291, %0 : vector<2x32xf32>
    %299 = arith.mulf %290, %296 : vector<2x32xf32>
    %300 = arith.addf %298, %299 : vector<2x32xf32>
    %301 = math.tanh %300 : vector<2x32xf32>
    %302 = arith.mulf %297, %301 : vector<2x32xf32>
    %c4 = arith.constant 4 : index
    %c0_136 = arith.constant 0 : index
    %c0_137 = arith.constant 0 : index
    %303 = vector.load %arg0[%c4, %c0_136, %c0_137] : memref<8x2x16xbf16, #tpu.memory_space<vmem>>, vector<1x2x16xbf16>
    %304 = vector.shape_cast %303 : vector<1x2x16xbf16> to vector<2x16xbf16>
    %c0_138 = arith.constant 0 : index
    %c0_139 = arith.constant 0 : index
    %305 = vector.load %arg1[%c0_138, %c0_139] : memref<16x128xbf16, #tpu.memory_space<vmem>>, vector<16x128xbf16>
    %c0_140 = arith.constant 0 : index
    %c0_141 = arith.constant 0 : index
    %306 = vector.load %arg2[%c0_140, %c0_141] : memref<32x128xbf16, #tpu.memory_space<vmem>>, vector<32x128xbf16>
    %c0_142 = arith.constant 0 : index
    %c0_143 = arith.constant 0 : index
    %307 = vector.load %arg3[%c0_142, %c0_143] : memref<1x128xf32, #tpu.memory_space<vmem>>, vector<1x128xf32>
    %308 = arith.truncf %209 : vector<2x32xf32> to vector<2x32xbf16>
    %cst_144 = arith.constant dense<0.000000e+00> : vector<2x128xf32>
    %309 = tpu.matmul %308, %306, %cst_144 {dimension_numbers = #tpu.dot_dimension_numbers<[1], [0], [0], [1], [0, 0, 1, 1], [], []>} : vector<2x32xbf16>, vector<32x128xbf16>, vector<2x128xf32> -> vector<2x128xf32>
    %cst_145 = arith.constant dense<0.000000e+00> : vector<2x128xf32>
    %310 = tpu.matmul %304, %305, %cst_145 {dimension_numbers = #tpu.dot_dimension_numbers<[1], [0], [0], [1], [0, 0, 1, 1], [], []>} : vector<2x16xbf16>, vector<16x128xbf16>, vector<2x128xf32> -> vector<2x128xf32>
    %311 = arith.addf %309, %310 : vector<2x128xf32>
    %312 = vector.broadcast %307 : vector<1x128xf32> to vector<2x128xf32>
    %313 = arith.addf %311, %312 : vector<2x128xf32>
    %314 = arith.negf %313 : vector<2x128xf32>
    %315 = math.exp %314 : vector<2x128xf32>
    %cst_146 = arith.constant 1.000000e+00 : f32
    %316 = vector.broadcast %cst_146 : f32 to vector<2x128xf32>
    %317 = arith.addf %316, %315 : vector<2x128xf32>
    %318 = arith.divf %316, %317 : vector<2x128xf32>
    %319 = vector.extract_strided_slice %318 {offsets = [0, 0], sizes = [2, 32], strides = [1, 1]} : vector<2x128xf32> to vector<2x32xf32>
    %320 = vector.extract_strided_slice %318 {offsets = [0, 32], sizes = [2, 32], strides = [1, 1]} : vector<2x128xf32> to vector<2x32xf32>
    %321 = vector.extract_strided_slice %318 {offsets = [0, 64], sizes = [2, 32], strides = [1, 1]} : vector<2x128xf32> to vector<2x32xf32>
    %cst_147 = arith.constant 2.000000e+00 : f32
    %322 = vector.broadcast %cst_147 : f32 to vector<2x32xf32>
    %323 = arith.mulf %322, %321 : vector<2x32xf32>
    %cst_148 = arith.constant 1.000000e+00 : f32
    %324 = vector.broadcast %cst_148 : f32 to vector<2x32xf32>
    %325 = arith.subf %323, %324 : vector<2x32xf32>
    %326 = vector.extract_strided_slice %318 {offsets = [0, 96], sizes = [2, 32], strides = [1, 1]} : vector<2x128xf32> to vector<2x32xf32>
    %327 = arith.mulf %320, %207 : vector<2x32xf32>
    %328 = arith.mulf %319, %325 : vector<2x32xf32>
    %329 = arith.addf %327, %328 : vector<2x32xf32>
    %330 = math.tanh %329 : vector<2x32xf32>
    %331 = arith.mulf %326, %330 : vector<2x32xf32>
    %332 = arith.truncf %209 : vector<2x32xf32> to vector<2x32xbf16>
    %c0_149 = arith.constant 0 : index
    %c0_150 = arith.constant 0 : index
    %c0_151 = arith.constant 0 : index
    %333 = vector.load %arg4[%c0_149, %c0_150, %c0_151] : memref<4x32x128xbf16, #tpu.memory_space<vmem>>, vector<1x32x128xbf16>
    %334 = vector.shape_cast %333 : vector<1x32x128xbf16> to vector<32x128xbf16>
    %c0_152 = arith.constant 0 : index
    %c0_153 = arith.constant 0 : index
    %c0_154 = arith.constant 0 : index
    %335 = vector.load %arg5[%c0_152, %c0_153, %c0_154] : memref<4x32x128xbf16, #tpu.memory_space<vmem>>, vector<1x32x128xbf16>
    %336 = vector.shape_cast %335 : vector<1x32x128xbf16> to vector<32x128xbf16>
    %c0_155 = arith.constant 0 : index
    %c0_156 = arith.constant 0 : index
    %c0_157 = arith.constant 0 : index
    %337 = vector.load %arg6[%c0_155, %c0_156, %c0_157] : memref<4x1x128xf32, #tpu.memory_space<vmem>>, vector<1x1x128xf32>
    %338 = vector.shape_cast %337 : vector<1x1x128xf32> to vector<1x128xf32>
    %339 = arith.truncf %240 : vector<2x32xf32> to vector<2x32xbf16>
    %cst_158 = arith.constant dense<0.000000e+00> : vector<2x128xf32>
    %340 = tpu.matmul %339, %336, %cst_158 {dimension_numbers = #tpu.dot_dimension_numbers<[1], [0], [0], [1], [0, 0, 1, 1], [], []>} : vector<2x32xbf16>, vector<32x128xbf16>, vector<2x128xf32> -> vector<2x128xf32>
    %cst_159 = arith.constant dense<0.000000e+00> : vector<2x128xf32>
    %341 = tpu.matmul %332, %334, %cst_159 {dimension_numbers = #tpu.dot_dimension_numbers<[1], [0], [0], [1], [0, 0, 1, 1], [], []>} : vector<2x32xbf16>, vector<32x128xbf16>, vector<2x128xf32> -> vector<2x128xf32>
    %342 = arith.addf %340, %341 : vector<2x128xf32>
    %343 = vector.broadcast %338 : vector<1x128xf32> to vector<2x128xf32>
    %344 = arith.addf %342, %343 : vector<2x128xf32>
    %345 = arith.negf %344 : vector<2x128xf32>
    %346 = math.exp %345 : vector<2x128xf32>
    %cst_160 = arith.constant 1.000000e+00 : f32
    %347 = vector.broadcast %cst_160 : f32 to vector<2x128xf32>
    %348 = arith.addf %347, %346 : vector<2x128xf32>
    %349 = arith.divf %347, %348 : vector<2x128xf32>
    %350 = vector.extract_strided_slice %349 {offsets = [0, 0], sizes = [2, 32], strides = [1, 1]} : vector<2x128xf32> to vector<2x32xf32>
    %351 = vector.extract_strided_slice %349 {offsets = [0, 32], sizes = [2, 32], strides = [1, 1]} : vector<2x128xf32> to vector<2x32xf32>
    %352 = vector.extract_strided_slice %349 {offsets = [0, 64], sizes = [2, 32], strides = [1, 1]} : vector<2x128xf32> to vector<2x32xf32>
    %cst_161 = arith.constant 2.000000e+00 : f32
    %353 = vector.broadcast %cst_161 : f32 to vector<2x32xf32>
    %354 = arith.mulf %353, %352 : vector<2x32xf32>
    %cst_162 = arith.constant 1.000000e+00 : f32
    %355 = vector.broadcast %cst_162 : f32 to vector<2x32xf32>
    %356 = arith.subf %354, %355 : vector<2x32xf32>
    %357 = vector.extract_strided_slice %349 {offsets = [0, 96], sizes = [2, 32], strides = [1, 1]} : vector<2x128xf32> to vector<2x32xf32>
    %358 = arith.mulf %351, %238 : vector<2x32xf32>
    %359 = arith.mulf %350, %356 : vector<2x32xf32>
    %360 = arith.addf %358, %359 : vector<2x32xf32>
    %361 = math.tanh %360 : vector<2x32xf32>
    %362 = arith.mulf %357, %361 : vector<2x32xf32>
    %363 = arith.truncf %240 : vector<2x32xf32> to vector<2x32xbf16>
    %c1_163 = arith.constant 1 : index
    %c0_164 = arith.constant 0 : index
    %c0_165 = arith.constant 0 : index
    %364 = vector.load %arg4[%c1_163, %c0_164, %c0_165] : memref<4x32x128xbf16, #tpu.memory_space<vmem>>, vector<1x32x128xbf16>
    %365 = vector.shape_cast %364 : vector<1x32x128xbf16> to vector<32x128xbf16>
    %c1_166 = arith.constant 1 : index
    %c0_167 = arith.constant 0 : index
    %c0_168 = arith.constant 0 : index
    %366 = vector.load %arg5[%c1_166, %c0_167, %c0_168] : memref<4x32x128xbf16, #tpu.memory_space<vmem>>, vector<1x32x128xbf16>
    %367 = vector.shape_cast %366 : vector<1x32x128xbf16> to vector<32x128xbf16>
    %c1_169 = arith.constant 1 : index
    %c0_170 = arith.constant 0 : index
    %c0_171 = arith.constant 0 : index
    %368 = vector.load %arg6[%c1_169, %c0_170, %c0_171] : memref<4x1x128xf32, #tpu.memory_space<vmem>>, vector<1x1x128xf32>
    %369 = vector.shape_cast %368 : vector<1x1x128xf32> to vector<1x128xf32>
    %370 = arith.truncf %271 : vector<2x32xf32> to vector<2x32xbf16>
    %cst_172 = arith.constant dense<0.000000e+00> : vector<2x128xf32>
    %371 = tpu.matmul %370, %367, %cst_172 {dimension_numbers = #tpu.dot_dimension_numbers<[1], [0], [0], [1], [0, 0, 1, 1], [], []>} : vector<2x32xbf16>, vector<32x128xbf16>, vector<2x128xf32> -> vector<2x128xf32>
    %cst_173 = arith.constant dense<0.000000e+00> : vector<2x128xf32>
    %372 = tpu.matmul %363, %365, %cst_173 {dimension_numbers = #tpu.dot_dimension_numbers<[1], [0], [0], [1], [0, 0, 1, 1], [], []>} : vector<2x32xbf16>, vector<32x128xbf16>, vector<2x128xf32> -> vector<2x128xf32>
    %373 = arith.addf %371, %372 : vector<2x128xf32>
    %374 = vector.broadcast %369 : vector<1x128xf32> to vector<2x128xf32>
    %375 = arith.addf %373, %374 : vector<2x128xf32>
    %376 = arith.negf %375 : vector<2x128xf32>
    %377 = math.exp %376 : vector<2x128xf32>
    %cst_174 = arith.constant 1.000000e+00 : f32
    %378 = vector.broadcast %cst_174 : f32 to vector<2x128xf32>
    %379 = arith.addf %378, %377 : vector<2x128xf32>
    %380 = arith.divf %378, %379 : vector<2x128xf32>
    %381 = vector.extract_strided_slice %380 {offsets = [0, 0], sizes = [2, 32], strides = [1, 1]} : vector<2x128xf32> to vector<2x32xf32>
    %382 = vector.extract_strided_slice %380 {offsets = [0, 32], sizes = [2, 32], strides = [1, 1]} : vector<2x128xf32> to vector<2x32xf32>
    %383 = vector.extract_strided_slice %380 {offsets = [0, 64], sizes = [2, 32], strides = [1, 1]} : vector<2x128xf32> to vector<2x32xf32>
    %cst_175 = arith.constant 2.000000e+00 : f32
    %384 = vector.broadcast %cst_175 : f32 to vector<2x32xf32>
    %385 = arith.mulf %384, %383 : vector<2x32xf32>
    %cst_176 = arith.constant 1.000000e+00 : f32
    %386 = vector.broadcast %cst_176 : f32 to vector<2x32xf32>
    %387 = arith.subf %385, %386 : vector<2x32xf32>
    %388 = vector.extract_strided_slice %380 {offsets = [0, 96], sizes = [2, 32], strides = [1, 1]} : vector<2x128xf32> to vector<2x32xf32>
    %389 = arith.mulf %382, %269 : vector<2x32xf32>
    %390 = arith.mulf %381, %387 : vector<2x32xf32>
    %391 = arith.addf %389, %390 : vector<2x32xf32>
    %392 = math.tanh %391 : vector<2x32xf32>
    %393 = arith.mulf %388, %392 : vector<2x32xf32>
    %394 = arith.truncf %271 : vector<2x32xf32> to vector<2x32xbf16>
    %c2_177 = arith.constant 2 : index
    %c0_178 = arith.constant 0 : index
    %c0_179 = arith.constant 0 : index
    %395 = vector.load %arg4[%c2_177, %c0_178, %c0_179] : memref<4x32x128xbf16, #tpu.memory_space<vmem>>, vector<1x32x128xbf16>
    %396 = vector.shape_cast %395 : vector<1x32x128xbf16> to vector<32x128xbf16>
    %c2_180 = arith.constant 2 : index
    %c0_181 = arith.constant 0 : index
    %c0_182 = arith.constant 0 : index
    %397 = vector.load %arg5[%c2_180, %c0_181, %c0_182] : memref<4x32x128xbf16, #tpu.memory_space<vmem>>, vector<1x32x128xbf16>
    %398 = vector.shape_cast %397 : vector<1x32x128xbf16> to vector<32x128xbf16>
    %c2_183 = arith.constant 2 : index
    %c0_184 = arith.constant 0 : index
    %c0_185 = arith.constant 0 : index
    %399 = vector.load %arg6[%c2_183, %c0_184, %c0_185] : memref<4x1x128xf32, #tpu.memory_space<vmem>>, vector<1x1x128xf32>
    %400 = vector.shape_cast %399 : vector<1x1x128xf32> to vector<1x128xf32>
    %401 = arith.truncf %302 : vector<2x32xf32> to vector<2x32xbf16>
    %cst_186 = arith.constant dense<0.000000e+00> : vector<2x128xf32>
    %402 = tpu.matmul %401, %398, %cst_186 {dimension_numbers = #tpu.dot_dimension_numbers<[1], [0], [0], [1], [0, 0, 1, 1], [], []>} : vector<2x32xbf16>, vector<32x128xbf16>, vector<2x128xf32> -> vector<2x128xf32>
    %cst_187 = arith.constant dense<0.000000e+00> : vector<2x128xf32>
    %403 = tpu.matmul %394, %396, %cst_187 {dimension_numbers = #tpu.dot_dimension_numbers<[1], [0], [0], [1], [0, 0, 1, 1], [], []>} : vector<2x32xbf16>, vector<32x128xbf16>, vector<2x128xf32> -> vector<2x128xf32>
    %404 = arith.addf %402, %403 : vector<2x128xf32>
    %405 = vector.broadcast %400 : vector<1x128xf32> to vector<2x128xf32>
    %406 = arith.addf %404, %405 : vector<2x128xf32>
    %407 = arith.negf %406 : vector<2x128xf32>
    %408 = math.exp %407 : vector<2x128xf32>
    %cst_188 = arith.constant 1.000000e+00 : f32
    %409 = vector.broadcast %cst_188 : f32 to vector<2x128xf32>
    %410 = arith.addf %409, %408 : vector<2x128xf32>
    %411 = arith.divf %409, %410 : vector<2x128xf32>
    %412 = vector.extract_strided_slice %411 {offsets = [0, 0], sizes = [2, 32], strides = [1, 1]} : vector<2x128xf32> to vector<2x32xf32>
    %413 = vector.extract_strided_slice %411 {offsets = [0, 32], sizes = [2, 32], strides = [1, 1]} : vector<2x128xf32> to vector<2x32xf32>
    %414 = vector.extract_strided_slice %411 {offsets = [0, 64], sizes = [2, 32], strides = [1, 1]} : vector<2x128xf32> to vector<2x32xf32>
    %cst_189 = arith.constant 2.000000e+00 : f32
    %415 = vector.broadcast %cst_189 : f32 to vector<2x32xf32>
    %416 = arith.mulf %415, %414 : vector<2x32xf32>
    %cst_190 = arith.constant 1.000000e+00 : f32
    %417 = vector.broadcast %cst_190 : f32 to vector<2x32xf32>
    %418 = arith.subf %416, %417 : vector<2x32xf32>
    %419 = vector.extract_strided_slice %411 {offsets = [0, 96], sizes = [2, 32], strides = [1, 1]} : vector<2x128xf32> to vector<2x32xf32>
    %420 = arith.mulf %413, %300 : vector<2x32xf32>
    %421 = arith.mulf %412, %418 : vector<2x32xf32>
    %422 = arith.addf %420, %421 : vector<2x32xf32>
    %423 = math.tanh %422 : vector<2x32xf32>
    %424 = arith.mulf %419, %423 : vector<2x32xf32>
    %425 = arith.truncf %302 : vector<2x32xf32> to vector<2x32xbf16>
    %c3_191 = arith.constant 3 : index
    %c0_192 = arith.constant 0 : index
    %c0_193 = arith.constant 0 : index
    %426 = vector.load %arg4[%c3_191, %c0_192, %c0_193] : memref<4x32x128xbf16, #tpu.memory_space<vmem>>, vector<1x32x128xbf16>
    %427 = vector.shape_cast %426 : vector<1x32x128xbf16> to vector<32x128xbf16>
    %c3_194 = arith.constant 3 : index
    %c0_195 = arith.constant 0 : index
    %c0_196 = arith.constant 0 : index
    %428 = vector.load %arg5[%c3_194, %c0_195, %c0_196] : memref<4x32x128xbf16, #tpu.memory_space<vmem>>, vector<1x32x128xbf16>
    %429 = vector.shape_cast %428 : vector<1x32x128xbf16> to vector<32x128xbf16>
    %c3_197 = arith.constant 3 : index
    %c0_198 = arith.constant 0 : index
    %c0_199 = arith.constant 0 : index
    %430 = vector.load %arg6[%c3_197, %c0_198, %c0_199] : memref<4x1x128xf32, #tpu.memory_space<vmem>>, vector<1x1x128xf32>
    %431 = vector.shape_cast %430 : vector<1x1x128xf32> to vector<1x128xf32>
    %432 = arith.truncf %0 : vector<2x32xf32> to vector<2x32xbf16>
    %cst_200 = arith.constant dense<0.000000e+00> : vector<2x128xf32>
    %433 = tpu.matmul %432, %429, %cst_200 {dimension_numbers = #tpu.dot_dimension_numbers<[1], [0], [0], [1], [0, 0, 1, 1], [], []>} : vector<2x32xbf16>, vector<32x128xbf16>, vector<2x128xf32> -> vector<2x128xf32>
    %cst_201 = arith.constant dense<0.000000e+00> : vector<2x128xf32>
    %434 = tpu.matmul %425, %427, %cst_201 {dimension_numbers = #tpu.dot_dimension_numbers<[1], [0], [0], [1], [0, 0, 1, 1], [], []>} : vector<2x32xbf16>, vector<32x128xbf16>, vector<2x128xf32> -> vector<2x128xf32>
    %435 = arith.addf %433, %434 : vector<2x128xf32>
    %436 = vector.broadcast %431 : vector<1x128xf32> to vector<2x128xf32>
    %437 = arith.addf %435, %436 : vector<2x128xf32>
    %438 = arith.negf %437 : vector<2x128xf32>
    %439 = math.exp %438 : vector<2x128xf32>
    %cst_202 = arith.constant 1.000000e+00 : f32
    %440 = vector.broadcast %cst_202 : f32 to vector<2x128xf32>
    %441 = arith.addf %440, %439 : vector<2x128xf32>
    %442 = arith.divf %440, %441 : vector<2x128xf32>
    %443 = vector.extract_strided_slice %442 {offsets = [0, 0], sizes = [2, 32], strides = [1, 1]} : vector<2x128xf32> to vector<2x32xf32>
    %444 = vector.extract_strided_slice %442 {offsets = [0, 32], sizes = [2, 32], strides = [1, 1]} : vector<2x128xf32> to vector<2x32xf32>
    %445 = vector.extract_strided_slice %442 {offsets = [0, 64], sizes = [2, 32], strides = [1, 1]} : vector<2x128xf32> to vector<2x32xf32>
    %cst_203 = arith.constant 2.000000e+00 : f32
    %446 = vector.broadcast %cst_203 : f32 to vector<2x32xf32>
    %447 = arith.mulf %446, %445 : vector<2x32xf32>
    %cst_204 = arith.constant 1.000000e+00 : f32
    %448 = vector.broadcast %cst_204 : f32 to vector<2x32xf32>
    %449 = arith.subf %447, %448 : vector<2x32xf32>
    %450 = vector.extract_strided_slice %442 {offsets = [0, 96], sizes = [2, 32], strides = [1, 1]} : vector<2x128xf32> to vector<2x32xf32>
    %451 = arith.mulf %444, %0 : vector<2x32xf32>
    %452 = arith.mulf %443, %449 : vector<2x32xf32>
    %453 = arith.addf %451, %452 : vector<2x32xf32>
    %454 = math.tanh %453 : vector<2x32xf32>
    %455 = arith.mulf %450, %454 : vector<2x32xf32>
    %c5 = arith.constant 5 : index
    %c0_205 = arith.constant 0 : index
    %c0_206 = arith.constant 0 : index
    %456 = vector.load %arg0[%c5, %c0_205, %c0_206] : memref<8x2x16xbf16, #tpu.memory_space<vmem>>, vector<1x2x16xbf16>
    %457 = vector.shape_cast %456 : vector<1x2x16xbf16> to vector<2x16xbf16>
    %c0_207 = arith.constant 0 : index
    %c0_208 = arith.constant 0 : index
    %458 = vector.load %arg1[%c0_207, %c0_208] : memref<16x128xbf16, #tpu.memory_space<vmem>>, vector<16x128xbf16>
    %c0_209 = arith.constant 0 : index
    %c0_210 = arith.constant 0 : index
    %459 = vector.load %arg2[%c0_209, %c0_210] : memref<32x128xbf16, #tpu.memory_space<vmem>>, vector<32x128xbf16>
    %c0_211 = arith.constant 0 : index
    %c0_212 = arith.constant 0 : index
    %460 = vector.load %arg3[%c0_211, %c0_212] : memref<1x128xf32, #tpu.memory_space<vmem>>, vector<1x128xf32>
    %461 = arith.truncf %331 : vector<2x32xf32> to vector<2x32xbf16>
    %cst_213 = arith.constant dense<0.000000e+00> : vector<2x128xf32>
    %462 = tpu.matmul %461, %459, %cst_213 {dimension_numbers = #tpu.dot_dimension_numbers<[1], [0], [0], [1], [0, 0, 1, 1], [], []>} : vector<2x32xbf16>, vector<32x128xbf16>, vector<2x128xf32> -> vector<2x128xf32>
    %cst_214 = arith.constant dense<0.000000e+00> : vector<2x128xf32>
    %463 = tpu.matmul %457, %458, %cst_214 {dimension_numbers = #tpu.dot_dimension_numbers<[1], [0], [0], [1], [0, 0, 1, 1], [], []>} : vector<2x16xbf16>, vector<16x128xbf16>, vector<2x128xf32> -> vector<2x128xf32>
    %464 = arith.addf %462, %463 : vector<2x128xf32>
    %465 = vector.broadcast %460 : vector<1x128xf32> to vector<2x128xf32>
    %466 = arith.addf %464, %465 : vector<2x128xf32>
    %467 = arith.negf %466 : vector<2x128xf32>
    %468 = math.exp %467 : vector<2x128xf32>
    %cst_215 = arith.constant 1.000000e+00 : f32
    %469 = vector.broadcast %cst_215 : f32 to vector<2x128xf32>
    %470 = arith.addf %469, %468 : vector<2x128xf32>
    %471 = arith.divf %469, %470 : vector<2x128xf32>
    %472 = vector.extract_strided_slice %471 {offsets = [0, 0], sizes = [2, 32], strides = [1, 1]} : vector<2x128xf32> to vector<2x32xf32>
    %473 = vector.extract_strided_slice %471 {offsets = [0, 32], sizes = [2, 32], strides = [1, 1]} : vector<2x128xf32> to vector<2x32xf32>
    %474 = vector.extract_strided_slice %471 {offsets = [0, 64], sizes = [2, 32], strides = [1, 1]} : vector<2x128xf32> to vector<2x32xf32>
    %cst_216 = arith.constant 2.000000e+00 : f32
    %475 = vector.broadcast %cst_216 : f32 to vector<2x32xf32>
    %476 = arith.mulf %475, %474 : vector<2x32xf32>
    %cst_217 = arith.constant 1.000000e+00 : f32
    %477 = vector.broadcast %cst_217 : f32 to vector<2x32xf32>
    %478 = arith.subf %476, %477 : vector<2x32xf32>
    %479 = vector.extract_strided_slice %471 {offsets = [0, 96], sizes = [2, 32], strides = [1, 1]} : vector<2x128xf32> to vector<2x32xf32>
    %480 = arith.mulf %473, %329 : vector<2x32xf32>
    %481 = arith.mulf %472, %478 : vector<2x32xf32>
    %482 = arith.addf %480, %481 : vector<2x32xf32>
    %483 = math.tanh %482 : vector<2x32xf32>
    %484 = arith.mulf %479, %483 : vector<2x32xf32>
    %485 = arith.truncf %331 : vector<2x32xf32> to vector<2x32xbf16>
    %c0_218 = arith.constant 0 : index
    %c0_219 = arith.constant 0 : index
    %c0_220 = arith.constant 0 : index
    %486 = vector.load %arg4[%c0_218, %c0_219, %c0_220] : memref<4x32x128xbf16, #tpu.memory_space<vmem>>, vector<1x32x128xbf16>
    %487 = vector.shape_cast %486 : vector<1x32x128xbf16> to vector<32x128xbf16>
    %c0_221 = arith.constant 0 : index
    %c0_222 = arith.constant 0 : index
    %c0_223 = arith.constant 0 : index
    %488 = vector.load %arg5[%c0_221, %c0_222, %c0_223] : memref<4x32x128xbf16, #tpu.memory_space<vmem>>, vector<1x32x128xbf16>
    %489 = vector.shape_cast %488 : vector<1x32x128xbf16> to vector<32x128xbf16>
    %c0_224 = arith.constant 0 : index
    %c0_225 = arith.constant 0 : index
    %c0_226 = arith.constant 0 : index
    %490 = vector.load %arg6[%c0_224, %c0_225, %c0_226] : memref<4x1x128xf32, #tpu.memory_space<vmem>>, vector<1x1x128xf32>
    %491 = vector.shape_cast %490 : vector<1x1x128xf32> to vector<1x128xf32>
    %492 = arith.truncf %362 : vector<2x32xf32> to vector<2x32xbf16>
    %cst_227 = arith.constant dense<0.000000e+00> : vector<2x128xf32>
    %493 = tpu.matmul %492, %489, %cst_227 {dimension_numbers = #tpu.dot_dimension_numbers<[1], [0], [0], [1], [0, 0, 1, 1], [], []>} : vector<2x32xbf16>, vector<32x128xbf16>, vector<2x128xf32> -> vector<2x128xf32>
    %cst_228 = arith.constant dense<0.000000e+00> : vector<2x128xf32>
    %494 = tpu.matmul %485, %487, %cst_228 {dimension_numbers = #tpu.dot_dimension_numbers<[1], [0], [0], [1], [0, 0, 1, 1], [], []>} : vector<2x32xbf16>, vector<32x128xbf16>, vector<2x128xf32> -> vector<2x128xf32>
    %495 = arith.addf %493, %494 : vector<2x128xf32>
    %496 = vector.broadcast %491 : vector<1x128xf32> to vector<2x128xf32>
    %497 = arith.addf %495, %496 : vector<2x128xf32>
    %498 = arith.negf %497 : vector<2x128xf32>
    %499 = math.exp %498 : vector<2x128xf32>
    %cst_229 = arith.constant 1.000000e+00 : f32
    %500 = vector.broadcast %cst_229 : f32 to vector<2x128xf32>
    %501 = arith.addf %500, %499 : vector<2x128xf32>
    %502 = arith.divf %500, %501 : vector<2x128xf32>
    %503 = vector.extract_strided_slice %502 {offsets = [0, 0], sizes = [2, 32], strides = [1, 1]} : vector<2x128xf32> to vector<2x32xf32>
    %504 = vector.extract_strided_slice %502 {offsets = [0, 32], sizes = [2, 32], strides = [1, 1]} : vector<2x128xf32> to vector<2x32xf32>
    %505 = vector.extract_strided_slice %502 {offsets = [0, 64], sizes = [2, 32], strides = [1, 1]} : vector<2x128xf32> to vector<2x32xf32>
    %cst_230 = arith.constant 2.000000e+00 : f32
    %506 = vector.broadcast %cst_230 : f32 to vector<2x32xf32>
    %507 = arith.mulf %506, %505 : vector<2x32xf32>
    %cst_231 = arith.constant 1.000000e+00 : f32
    %508 = vector.broadcast %cst_231 : f32 to vector<2x32xf32>
    %509 = arith.subf %507, %508 : vector<2x32xf32>
    %510 = vector.extract_strided_slice %502 {offsets = [0, 96], sizes = [2, 32], strides = [1, 1]} : vector<2x128xf32> to vector<2x32xf32>
    %511 = arith.mulf %504, %360 : vector<2x32xf32>
    %512 = arith.mulf %503, %509 : vector<2x32xf32>
    %513 = arith.addf %511, %512 : vector<2x32xf32>
    %514 = math.tanh %513 : vector<2x32xf32>
    %515 = arith.mulf %510, %514 : vector<2x32xf32>
    %516 = arith.truncf %362 : vector<2x32xf32> to vector<2x32xbf16>
    %c1_232 = arith.constant 1 : index
    %c0_233 = arith.constant 0 : index
    %c0_234 = arith.constant 0 : index
    %517 = vector.load %arg4[%c1_232, %c0_233, %c0_234] : memref<4x32x128xbf16, #tpu.memory_space<vmem>>, vector<1x32x128xbf16>
    %518 = vector.shape_cast %517 : vector<1x32x128xbf16> to vector<32x128xbf16>
    %c1_235 = arith.constant 1 : index
    %c0_236 = arith.constant 0 : index
    %c0_237 = arith.constant 0 : index
    %519 = vector.load %arg5[%c1_235, %c0_236, %c0_237] : memref<4x32x128xbf16, #tpu.memory_space<vmem>>, vector<1x32x128xbf16>
    %520 = vector.shape_cast %519 : vector<1x32x128xbf16> to vector<32x128xbf16>
    %c1_238 = arith.constant 1 : index
    %c0_239 = arith.constant 0 : index
    %c0_240 = arith.constant 0 : index
    %521 = vector.load %arg6[%c1_238, %c0_239, %c0_240] : memref<4x1x128xf32, #tpu.memory_space<vmem>>, vector<1x1x128xf32>
    %522 = vector.shape_cast %521 : vector<1x1x128xf32> to vector<1x128xf32>
    %523 = arith.truncf %393 : vector<2x32xf32> to vector<2x32xbf16>
    %cst_241 = arith.constant dense<0.000000e+00> : vector<2x128xf32>
    %524 = tpu.matmul %523, %520, %cst_241 {dimension_numbers = #tpu.dot_dimension_numbers<[1], [0], [0], [1], [0, 0, 1, 1], [], []>} : vector<2x32xbf16>, vector<32x128xbf16>, vector<2x128xf32> -> vector<2x128xf32>
    %cst_242 = arith.constant dense<0.000000e+00> : vector<2x128xf32>
    %525 = tpu.matmul %516, %518, %cst_242 {dimension_numbers = #tpu.dot_dimension_numbers<[1], [0], [0], [1], [0, 0, 1, 1], [], []>} : vector<2x32xbf16>, vector<32x128xbf16>, vector<2x128xf32> -> vector<2x128xf32>
    %526 = arith.addf %524, %525 : vector<2x128xf32>
    %527 = vector.broadcast %522 : vector<1x128xf32> to vector<2x128xf32>
    %528 = arith.addf %526, %527 : vector<2x128xf32>
    %529 = arith.negf %528 : vector<2x128xf32>
    %530 = math.exp %529 : vector<2x128xf32>
    %cst_243 = arith.constant 1.000000e+00 : f32
    %531 = vector.broadcast %cst_243 : f32 to vector<2x128xf32>
    %532 = arith.addf %531, %530 : vector<2x128xf32>
    %533 = arith.divf %531, %532 : vector<2x128xf32>
    %534 = vector.extract_strided_slice %533 {offsets = [0, 0], sizes = [2, 32], strides = [1, 1]} : vector<2x128xf32> to vector<2x32xf32>
    %535 = vector.extract_strided_slice %533 {offsets = [0, 32], sizes = [2, 32], strides = [1, 1]} : vector<2x128xf32> to vector<2x32xf32>
    %536 = vector.extract_strided_slice %533 {offsets = [0, 64], sizes = [2, 32], strides = [1, 1]} : vector<2x128xf32> to vector<2x32xf32>
    %cst_244 = arith.constant 2.000000e+00 : f32
    %537 = vector.broadcast %cst_244 : f32 to vector<2x32xf32>
    %538 = arith.mulf %537, %536 : vector<2x32xf32>
    %cst_245 = arith.constant 1.000000e+00 : f32
    %539 = vector.broadcast %cst_245 : f32 to vector<2x32xf32>
    %540 = arith.subf %538, %539 : vector<2x32xf32>
    %541 = vector.extract_strided_slice %533 {offsets = [0, 96], sizes = [2, 32], strides = [1, 1]} : vector<2x128xf32> to vector<2x32xf32>
    %542 = arith.mulf %535, %391 : vector<2x32xf32>
    %543 = arith.mulf %534, %540 : vector<2x32xf32>
    %544 = arith.addf %542, %543 : vector<2x32xf32>
    %545 = math.tanh %544 : vector<2x32xf32>
    %546 = arith.mulf %541, %545 : vector<2x32xf32>
    %547 = arith.truncf %393 : vector<2x32xf32> to vector<2x32xbf16>
    %c2_246 = arith.constant 2 : index
    %c0_247 = arith.constant 0 : index
    %c0_248 = arith.constant 0 : index
    %548 = vector.load %arg4[%c2_246, %c0_247, %c0_248] : memref<4x32x128xbf16, #tpu.memory_space<vmem>>, vector<1x32x128xbf16>
    %549 = vector.shape_cast %548 : vector<1x32x128xbf16> to vector<32x128xbf16>
    %c2_249 = arith.constant 2 : index
    %c0_250 = arith.constant 0 : index
    %c0_251 = arith.constant 0 : index
    %550 = vector.load %arg5[%c2_249, %c0_250, %c0_251] : memref<4x32x128xbf16, #tpu.memory_space<vmem>>, vector<1x32x128xbf16>
    %551 = vector.shape_cast %550 : vector<1x32x128xbf16> to vector<32x128xbf16>
    %c2_252 = arith.constant 2 : index
    %c0_253 = arith.constant 0 : index
    %c0_254 = arith.constant 0 : index
    %552 = vector.load %arg6[%c2_252, %c0_253, %c0_254] : memref<4x1x128xf32, #tpu.memory_space<vmem>>, vector<1x1x128xf32>
    %553 = vector.shape_cast %552 : vector<1x1x128xf32> to vector<1x128xf32>
    %554 = arith.truncf %424 : vector<2x32xf32> to vector<2x32xbf16>
    %cst_255 = arith.constant dense<0.000000e+00> : vector<2x128xf32>
    %555 = tpu.matmul %554, %551, %cst_255 {dimension_numbers = #tpu.dot_dimension_numbers<[1], [0], [0], [1], [0, 0, 1, 1], [], []>} : vector<2x32xbf16>, vector<32x128xbf16>, vector<2x128xf32> -> vector<2x128xf32>
    %cst_256 = arith.constant dense<0.000000e+00> : vector<2x128xf32>
    %556 = tpu.matmul %547, %549, %cst_256 {dimension_numbers = #tpu.dot_dimension_numbers<[1], [0], [0], [1], [0, 0, 1, 1], [], []>} : vector<2x32xbf16>, vector<32x128xbf16>, vector<2x128xf32> -> vector<2x128xf32>
    %557 = arith.addf %555, %556 : vector<2x128xf32>
    %558 = vector.broadcast %553 : vector<1x128xf32> to vector<2x128xf32>
    %559 = arith.addf %557, %558 : vector<2x128xf32>
    %560 = arith.negf %559 : vector<2x128xf32>
    %561 = math.exp %560 : vector<2x128xf32>
    %cst_257 = arith.constant 1.000000e+00 : f32
    %562 = vector.broadcast %cst_257 : f32 to vector<2x128xf32>
    %563 = arith.addf %562, %561 : vector<2x128xf32>
    %564 = arith.divf %562, %563 : vector<2x128xf32>
    %565 = vector.extract_strided_slice %564 {offsets = [0, 0], sizes = [2, 32], strides = [1, 1]} : vector<2x128xf32> to vector<2x32xf32>
    %566 = vector.extract_strided_slice %564 {offsets = [0, 32], sizes = [2, 32], strides = [1, 1]} : vector<2x128xf32> to vector<2x32xf32>
    %567 = vector.extract_strided_slice %564 {offsets = [0, 64], sizes = [2, 32], strides = [1, 1]} : vector<2x128xf32> to vector<2x32xf32>
    %cst_258 = arith.constant 2.000000e+00 : f32
    %568 = vector.broadcast %cst_258 : f32 to vector<2x32xf32>
    %569 = arith.mulf %568, %567 : vector<2x32xf32>
    %cst_259 = arith.constant 1.000000e+00 : f32
    %570 = vector.broadcast %cst_259 : f32 to vector<2x32xf32>
    %571 = arith.subf %569, %570 : vector<2x32xf32>
    %572 = vector.extract_strided_slice %564 {offsets = [0, 96], sizes = [2, 32], strides = [1, 1]} : vector<2x128xf32> to vector<2x32xf32>
    %573 = arith.mulf %566, %422 : vector<2x32xf32>
    %574 = arith.mulf %565, %571 : vector<2x32xf32>
    %575 = arith.addf %573, %574 : vector<2x32xf32>
    %576 = math.tanh %575 : vector<2x32xf32>
    %577 = arith.mulf %572, %576 : vector<2x32xf32>
    %578 = arith.truncf %424 : vector<2x32xf32> to vector<2x32xbf16>
    %c3_260 = arith.constant 3 : index
    %c0_261 = arith.constant 0 : index
    %c0_262 = arith.constant 0 : index
    %579 = vector.load %arg4[%c3_260, %c0_261, %c0_262] : memref<4x32x128xbf16, #tpu.memory_space<vmem>>, vector<1x32x128xbf16>
    %580 = vector.shape_cast %579 : vector<1x32x128xbf16> to vector<32x128xbf16>
    %c3_263 = arith.constant 3 : index
    %c0_264 = arith.constant 0 : index
    %c0_265 = arith.constant 0 : index
    %581 = vector.load %arg5[%c3_263, %c0_264, %c0_265] : memref<4x32x128xbf16, #tpu.memory_space<vmem>>, vector<1x32x128xbf16>
    %582 = vector.shape_cast %581 : vector<1x32x128xbf16> to vector<32x128xbf16>
    %c3_266 = arith.constant 3 : index
    %c0_267 = arith.constant 0 : index
    %c0_268 = arith.constant 0 : index
    %583 = vector.load %arg6[%c3_266, %c0_267, %c0_268] : memref<4x1x128xf32, #tpu.memory_space<vmem>>, vector<1x1x128xf32>
    %584 = vector.shape_cast %583 : vector<1x1x128xf32> to vector<1x128xf32>
    %585 = arith.truncf %455 : vector<2x32xf32> to vector<2x32xbf16>
    %cst_269 = arith.constant dense<0.000000e+00> : vector<2x128xf32>
    %586 = tpu.matmul %585, %582, %cst_269 {dimension_numbers = #tpu.dot_dimension_numbers<[1], [0], [0], [1], [0, 0, 1, 1], [], []>} : vector<2x32xbf16>, vector<32x128xbf16>, vector<2x128xf32> -> vector<2x128xf32>
    %cst_270 = arith.constant dense<0.000000e+00> : vector<2x128xf32>
    %587 = tpu.matmul %578, %580, %cst_270 {dimension_numbers = #tpu.dot_dimension_numbers<[1], [0], [0], [1], [0, 0, 1, 1], [], []>} : vector<2x32xbf16>, vector<32x128xbf16>, vector<2x128xf32> -> vector<2x128xf32>
    %588 = arith.addf %586, %587 : vector<2x128xf32>
    %589 = vector.broadcast %584 : vector<1x128xf32> to vector<2x128xf32>
    %590 = arith.addf %588, %589 : vector<2x128xf32>
    %591 = arith.negf %590 : vector<2x128xf32>
    %592 = math.exp %591 : vector<2x128xf32>
    %cst_271 = arith.constant 1.000000e+00 : f32
    %593 = vector.broadcast %cst_271 : f32 to vector<2x128xf32>
    %594 = arith.addf %593, %592 : vector<2x128xf32>
    %595 = arith.divf %593, %594 : vector<2x128xf32>
    %596 = vector.extract_strided_slice %595 {offsets = [0, 0], sizes = [2, 32], strides = [1, 1]} : vector<2x128xf32> to vector<2x32xf32>
    %597 = vector.extract_strided_slice %595 {offsets = [0, 32], sizes = [2, 32], strides = [1, 1]} : vector<2x128xf32> to vector<2x32xf32>
    %598 = vector.extract_strided_slice %595 {offsets = [0, 64], sizes = [2, 32], strides = [1, 1]} : vector<2x128xf32> to vector<2x32xf32>
    %cst_272 = arith.constant 2.000000e+00 : f32
    %599 = vector.broadcast %cst_272 : f32 to vector<2x32xf32>
    %600 = arith.mulf %599, %598 : vector<2x32xf32>
    %cst_273 = arith.constant 1.000000e+00 : f32
    %601 = vector.broadcast %cst_273 : f32 to vector<2x32xf32>
    %602 = arith.subf %600, %601 : vector<2x32xf32>
    %603 = vector.extract_strided_slice %595 {offsets = [0, 96], sizes = [2, 32], strides = [1, 1]} : vector<2x128xf32> to vector<2x32xf32>
    %604 = arith.mulf %597, %453 : vector<2x32xf32>
    %605 = arith.mulf %596, %602 : vector<2x32xf32>
    %606 = arith.addf %604, %605 : vector<2x32xf32>
    %607 = math.tanh %606 : vector<2x32xf32>
    %608 = arith.mulf %603, %607 : vector<2x32xf32>
    %c6 = arith.constant 6 : index
    %c0_274 = arith.constant 0 : index
    %c0_275 = arith.constant 0 : index
    %609 = vector.load %arg0[%c6, %c0_274, %c0_275] : memref<8x2x16xbf16, #tpu.memory_space<vmem>>, vector<1x2x16xbf16>
    %610 = vector.shape_cast %609 : vector<1x2x16xbf16> to vector<2x16xbf16>
    %c0_276 = arith.constant 0 : index
    %c0_277 = arith.constant 0 : index
    %611 = vector.load %arg1[%c0_276, %c0_277] : memref<16x128xbf16, #tpu.memory_space<vmem>>, vector<16x128xbf16>
    %c0_278 = arith.constant 0 : index
    %c0_279 = arith.constant 0 : index
    %612 = vector.load %arg2[%c0_278, %c0_279] : memref<32x128xbf16, #tpu.memory_space<vmem>>, vector<32x128xbf16>
    %c0_280 = arith.constant 0 : index
    %c0_281 = arith.constant 0 : index
    %613 = vector.load %arg3[%c0_280, %c0_281] : memref<1x128xf32, #tpu.memory_space<vmem>>, vector<1x128xf32>
    %614 = arith.truncf %484 : vector<2x32xf32> to vector<2x32xbf16>
    %cst_282 = arith.constant dense<0.000000e+00> : vector<2x128xf32>
    %615 = tpu.matmul %614, %612, %cst_282 {dimension_numbers = #tpu.dot_dimension_numbers<[1], [0], [0], [1], [0, 0, 1, 1], [], []>} : vector<2x32xbf16>, vector<32x128xbf16>, vector<2x128xf32> -> vector<2x128xf32>
    %cst_283 = arith.constant dense<0.000000e+00> : vector<2x128xf32>
    %616 = tpu.matmul %610, %611, %cst_283 {dimension_numbers = #tpu.dot_dimension_numbers<[1], [0], [0], [1], [0, 0, 1, 1], [], []>} : vector<2x16xbf16>, vector<16x128xbf16>, vector<2x128xf32> -> vector<2x128xf32>
    %617 = arith.addf %615, %616 : vector<2x128xf32>
    %618 = vector.broadcast %613 : vector<1x128xf32> to vector<2x128xf32>
    %619 = arith.addf %617, %618 : vector<2x128xf32>
    %620 = arith.negf %619 : vector<2x128xf32>
    %621 = math.exp %620 : vector<2x128xf32>
    %cst_284 = arith.constant 1.000000e+00 : f32
    %622 = vector.broadcast %cst_284 : f32 to vector<2x128xf32>
    %623 = arith.addf %622, %621 : vector<2x128xf32>
    %624 = arith.divf %622, %623 : vector<2x128xf32>
    %625 = vector.extract_strided_slice %624 {offsets = [0, 0], sizes = [2, 32], strides = [1, 1]} : vector<2x128xf32> to vector<2x32xf32>
    %626 = vector.extract_strided_slice %624 {offsets = [0, 32], sizes = [2, 32], strides = [1, 1]} : vector<2x128xf32> to vector<2x32xf32>
    %627 = vector.extract_strided_slice %624 {offsets = [0, 64], sizes = [2, 32], strides = [1, 1]} : vector<2x128xf32> to vector<2x32xf32>
    %cst_285 = arith.constant 2.000000e+00 : f32
    %628 = vector.broadcast %cst_285 : f32 to vector<2x32xf32>
    %629 = arith.mulf %628, %627 : vector<2x32xf32>
    %cst_286 = arith.constant 1.000000e+00 : f32
    %630 = vector.broadcast %cst_286 : f32 to vector<2x32xf32>
    %631 = arith.subf %629, %630 : vector<2x32xf32>
    %632 = vector.extract_strided_slice %624 {offsets = [0, 96], sizes = [2, 32], strides = [1, 1]} : vector<2x128xf32> to vector<2x32xf32>
    %633 = arith.mulf %626, %482 : vector<2x32xf32>
    %634 = arith.mulf %625, %631 : vector<2x32xf32>
    %635 = arith.addf %633, %634 : vector<2x32xf32>
    %636 = math.tanh %635 : vector<2x32xf32>
    %637 = arith.mulf %632, %636 : vector<2x32xf32>
    %638 = arith.truncf %484 : vector<2x32xf32> to vector<2x32xbf16>
    %c0_287 = arith.constant 0 : index
    %c0_288 = arith.constant 0 : index
    %c0_289 = arith.constant 0 : index
    %639 = vector.load %arg4[%c0_287, %c0_288, %c0_289] : memref<4x32x128xbf16, #tpu.memory_space<vmem>>, vector<1x32x128xbf16>
    %640 = vector.shape_cast %639 : vector<1x32x128xbf16> to vector<32x128xbf16>
    %c0_290 = arith.constant 0 : index
    %c0_291 = arith.constant 0 : index
    %c0_292 = arith.constant 0 : index
    %641 = vector.load %arg5[%c0_290, %c0_291, %c0_292] : memref<4x32x128xbf16, #tpu.memory_space<vmem>>, vector<1x32x128xbf16>
    %642 = vector.shape_cast %641 : vector<1x32x128xbf16> to vector<32x128xbf16>
    %c0_293 = arith.constant 0 : index
    %c0_294 = arith.constant 0 : index
    %c0_295 = arith.constant 0 : index
    %643 = vector.load %arg6[%c0_293, %c0_294, %c0_295] : memref<4x1x128xf32, #tpu.memory_space<vmem>>, vector<1x1x128xf32>
    %644 = vector.shape_cast %643 : vector<1x1x128xf32> to vector<1x128xf32>
    %645 = arith.truncf %515 : vector<2x32xf32> to vector<2x32xbf16>
    %cst_296 = arith.constant dense<0.000000e+00> : vector<2x128xf32>
    %646 = tpu.matmul %645, %642, %cst_296 {dimension_numbers = #tpu.dot_dimension_numbers<[1], [0], [0], [1], [0, 0, 1, 1], [], []>} : vector<2x32xbf16>, vector<32x128xbf16>, vector<2x128xf32> -> vector<2x128xf32>
    %cst_297 = arith.constant dense<0.000000e+00> : vector<2x128xf32>
    %647 = tpu.matmul %638, %640, %cst_297 {dimension_numbers = #tpu.dot_dimension_numbers<[1], [0], [0], [1], [0, 0, 1, 1], [], []>} : vector<2x32xbf16>, vector<32x128xbf16>, vector<2x128xf32> -> vector<2x128xf32>
    %648 = arith.addf %646, %647 : vector<2x128xf32>
    %649 = vector.broadcast %644 : vector<1x128xf32> to vector<2x128xf32>
    %650 = arith.addf %648, %649 : vector<2x128xf32>
    %651 = arith.negf %650 : vector<2x128xf32>
    %652 = math.exp %651 : vector<2x128xf32>
    %cst_298 = arith.constant 1.000000e+00 : f32
    %653 = vector.broadcast %cst_298 : f32 to vector<2x128xf32>
    %654 = arith.addf %653, %652 : vector<2x128xf32>
    %655 = arith.divf %653, %654 : vector<2x128xf32>
    %656 = vector.extract_strided_slice %655 {offsets = [0, 0], sizes = [2, 32], strides = [1, 1]} : vector<2x128xf32> to vector<2x32xf32>
    %657 = vector.extract_strided_slice %655 {offsets = [0, 32], sizes = [2, 32], strides = [1, 1]} : vector<2x128xf32> to vector<2x32xf32>
    %658 = vector.extract_strided_slice %655 {offsets = [0, 64], sizes = [2, 32], strides = [1, 1]} : vector<2x128xf32> to vector<2x32xf32>
    %cst_299 = arith.constant 2.000000e+00 : f32
    %659 = vector.broadcast %cst_299 : f32 to vector<2x32xf32>
    %660 = arith.mulf %659, %658 : vector<2x32xf32>
    %cst_300 = arith.constant 1.000000e+00 : f32
    %661 = vector.broadcast %cst_300 : f32 to vector<2x32xf32>
    %662 = arith.subf %660, %661 : vector<2x32xf32>
    %663 = vector.extract_strided_slice %655 {offsets = [0, 96], sizes = [2, 32], strides = [1, 1]} : vector<2x128xf32> to vector<2x32xf32>
    %664 = arith.mulf %657, %513 : vector<2x32xf32>
    %665 = arith.mulf %656, %662 : vector<2x32xf32>
    %666 = arith.addf %664, %665 : vector<2x32xf32>
    %667 = math.tanh %666 : vector<2x32xf32>
    %668 = arith.mulf %663, %667 : vector<2x32xf32>
    %669 = arith.truncf %515 : vector<2x32xf32> to vector<2x32xbf16>
    %c1_301 = arith.constant 1 : index
    %c0_302 = arith.constant 0 : index
    %c0_303 = arith.constant 0 : index
    %670 = vector.load %arg4[%c1_301, %c0_302, %c0_303] : memref<4x32x128xbf16, #tpu.memory_space<vmem>>, vector<1x32x128xbf16>
    %671 = vector.shape_cast %670 : vector<1x32x128xbf16> to vector<32x128xbf16>
    %c1_304 = arith.constant 1 : index
    %c0_305 = arith.constant 0 : index
    %c0_306 = arith.constant 0 : index
    %672 = vector.load %arg5[%c1_304, %c0_305, %c0_306] : memref<4x32x128xbf16, #tpu.memory_space<vmem>>, vector<1x32x128xbf16>
    %673 = vector.shape_cast %672 : vector<1x32x128xbf16> to vector<32x128xbf16>
    %c1_307 = arith.constant 1 : index
    %c0_308 = arith.constant 0 : index
    %c0_309 = arith.constant 0 : index
    %674 = vector.load %arg6[%c1_307, %c0_308, %c0_309] : memref<4x1x128xf32, #tpu.memory_space<vmem>>, vector<1x1x128xf32>
    %675 = vector.shape_cast %674 : vector<1x1x128xf32> to vector<1x128xf32>
    %676 = arith.truncf %546 : vector<2x32xf32> to vector<2x32xbf16>
    %cst_310 = arith.constant dense<0.000000e+00> : vector<2x128xf32>
    %677 = tpu.matmul %676, %673, %cst_310 {dimension_numbers = #tpu.dot_dimension_numbers<[1], [0], [0], [1], [0, 0, 1, 1], [], []>} : vector<2x32xbf16>, vector<32x128xbf16>, vector<2x128xf32> -> vector<2x128xf32>
    %cst_311 = arith.constant dense<0.000000e+00> : vector<2x128xf32>
    %678 = tpu.matmul %669, %671, %cst_311 {dimension_numbers = #tpu.dot_dimension_numbers<[1], [0], [0], [1], [0, 0, 1, 1], [], []>} : vector<2x32xbf16>, vector<32x128xbf16>, vector<2x128xf32> -> vector<2x128xf32>
    %679 = arith.addf %677, %678 : vector<2x128xf32>
    %680 = vector.broadcast %675 : vector<1x128xf32> to vector<2x128xf32>
    %681 = arith.addf %679, %680 : vector<2x128xf32>
    %682 = arith.negf %681 : vector<2x128xf32>
    %683 = math.exp %682 : vector<2x128xf32>
    %cst_312 = arith.constant 1.000000e+00 : f32
    %684 = vector.broadcast %cst_312 : f32 to vector<2x128xf32>
    %685 = arith.addf %684, %683 : vector<2x128xf32>
    %686 = arith.divf %684, %685 : vector<2x128xf32>
    %687 = vector.extract_strided_slice %686 {offsets = [0, 0], sizes = [2, 32], strides = [1, 1]} : vector<2x128xf32> to vector<2x32xf32>
    %688 = vector.extract_strided_slice %686 {offsets = [0, 32], sizes = [2, 32], strides = [1, 1]} : vector<2x128xf32> to vector<2x32xf32>
    %689 = vector.extract_strided_slice %686 {offsets = [0, 64], sizes = [2, 32], strides = [1, 1]} : vector<2x128xf32> to vector<2x32xf32>
    %cst_313 = arith.constant 2.000000e+00 : f32
    %690 = vector.broadcast %cst_313 : f32 to vector<2x32xf32>
    %691 = arith.mulf %690, %689 : vector<2x32xf32>
    %cst_314 = arith.constant 1.000000e+00 : f32
    %692 = vector.broadcast %cst_314 : f32 to vector<2x32xf32>
    %693 = arith.subf %691, %692 : vector<2x32xf32>
    %694 = vector.extract_strided_slice %686 {offsets = [0, 96], sizes = [2, 32], strides = [1, 1]} : vector<2x128xf32> to vector<2x32xf32>
    %695 = arith.mulf %688, %544 : vector<2x32xf32>
    %696 = arith.mulf %687, %693 : vector<2x32xf32>
    %697 = arith.addf %695, %696 : vector<2x32xf32>
    %698 = math.tanh %697 : vector<2x32xf32>
    %699 = arith.mulf %694, %698 : vector<2x32xf32>
    %700 = arith.truncf %546 : vector<2x32xf32> to vector<2x32xbf16>
    %c2_315 = arith.constant 2 : index
    %c0_316 = arith.constant 0 : index
    %c0_317 = arith.constant 0 : index
    %701 = vector.load %arg4[%c2_315, %c0_316, %c0_317] : memref<4x32x128xbf16, #tpu.memory_space<vmem>>, vector<1x32x128xbf16>
    %702 = vector.shape_cast %701 : vector<1x32x128xbf16> to vector<32x128xbf16>
    %c2_318 = arith.constant 2 : index
    %c0_319 = arith.constant 0 : index
    %c0_320 = arith.constant 0 : index
    %703 = vector.load %arg5[%c2_318, %c0_319, %c0_320] : memref<4x32x128xbf16, #tpu.memory_space<vmem>>, vector<1x32x128xbf16>
    %704 = vector.shape_cast %703 : vector<1x32x128xbf16> to vector<32x128xbf16>
    %c2_321 = arith.constant 2 : index
    %c0_322 = arith.constant 0 : index
    %c0_323 = arith.constant 0 : index
    %705 = vector.load %arg6[%c2_321, %c0_322, %c0_323] : memref<4x1x128xf32, #tpu.memory_space<vmem>>, vector<1x1x128xf32>
    %706 = vector.shape_cast %705 : vector<1x1x128xf32> to vector<1x128xf32>
    %707 = arith.truncf %577 : vector<2x32xf32> to vector<2x32xbf16>
    %cst_324 = arith.constant dense<0.000000e+00> : vector<2x128xf32>
    %708 = tpu.matmul %707, %704, %cst_324 {dimension_numbers = #tpu.dot_dimension_numbers<[1], [0], [0], [1], [0, 0, 1, 1], [], []>} : vector<2x32xbf16>, vector<32x128xbf16>, vector<2x128xf32> -> vector<2x128xf32>
    %cst_325 = arith.constant dense<0.000000e+00> : vector<2x128xf32>
    %709 = tpu.matmul %700, %702, %cst_325 {dimension_numbers = #tpu.dot_dimension_numbers<[1], [0], [0], [1], [0, 0, 1, 1], [], []>} : vector<2x32xbf16>, vector<32x128xbf16>, vector<2x128xf32> -> vector<2x128xf32>
    %710 = arith.addf %708, %709 : vector<2x128xf32>
    %711 = vector.broadcast %706 : vector<1x128xf32> to vector<2x128xf32>
    %712 = arith.addf %710, %711 : vector<2x128xf32>
    %713 = arith.negf %712 : vector<2x128xf32>
    %714 = math.exp %713 : vector<2x128xf32>
    %cst_326 = arith.constant 1.000000e+00 : f32
    %715 = vector.broadcast %cst_326 : f32 to vector<2x128xf32>
    %716 = arith.addf %715, %714 : vector<2x128xf32>
    %717 = arith.divf %715, %716 : vector<2x128xf32>
    %718 = vector.extract_strided_slice %717 {offsets = [0, 0], sizes = [2, 32], strides = [1, 1]} : vector<2x128xf32> to vector<2x32xf32>
    %719 = vector.extract_strided_slice %717 {offsets = [0, 32], sizes = [2, 32], strides = [1, 1]} : vector<2x128xf32> to vector<2x32xf32>
    %720 = vector.extract_strided_slice %717 {offsets = [0, 64], sizes = [2, 32], strides = [1, 1]} : vector<2x128xf32> to vector<2x32xf32>
    %cst_327 = arith.constant 2.000000e+00 : f32
    %721 = vector.broadcast %cst_327 : f32 to vector<2x32xf32>
    %722 = arith.mulf %721, %720 : vector<2x32xf32>
    %cst_328 = arith.constant 1.000000e+00 : f32
    %723 = vector.broadcast %cst_328 : f32 to vector<2x32xf32>
    %724 = arith.subf %722, %723 : vector<2x32xf32>
    %725 = vector.extract_strided_slice %717 {offsets = [0, 96], sizes = [2, 32], strides = [1, 1]} : vector<2x128xf32> to vector<2x32xf32>
    %726 = arith.mulf %719, %575 : vector<2x32xf32>
    %727 = arith.mulf %718, %724 : vector<2x32xf32>
    %728 = arith.addf %726, %727 : vector<2x32xf32>
    %729 = math.tanh %728 : vector<2x32xf32>
    %730 = arith.mulf %725, %729 : vector<2x32xf32>
    %731 = arith.truncf %577 : vector<2x32xf32> to vector<2x32xbf16>
    %c3_329 = arith.constant 3 : index
    %c0_330 = arith.constant 0 : index
    %c0_331 = arith.constant 0 : index
    %732 = vector.load %arg4[%c3_329, %c0_330, %c0_331] : memref<4x32x128xbf16, #tpu.memory_space<vmem>>, vector<1x32x128xbf16>
    %733 = vector.shape_cast %732 : vector<1x32x128xbf16> to vector<32x128xbf16>
    %c3_332 = arith.constant 3 : index
    %c0_333 = arith.constant 0 : index
    %c0_334 = arith.constant 0 : index
    %734 = vector.load %arg5[%c3_332, %c0_333, %c0_334] : memref<4x32x128xbf16, #tpu.memory_space<vmem>>, vector<1x32x128xbf16>
    %735 = vector.shape_cast %734 : vector<1x32x128xbf16> to vector<32x128xbf16>
    %c3_335 = arith.constant 3 : index
    %c0_336 = arith.constant 0 : index
    %c0_337 = arith.constant 0 : index
    %736 = vector.load %arg6[%c3_335, %c0_336, %c0_337] : memref<4x1x128xf32, #tpu.memory_space<vmem>>, vector<1x1x128xf32>
    %737 = vector.shape_cast %736 : vector<1x1x128xf32> to vector<1x128xf32>
    %738 = arith.truncf %608 : vector<2x32xf32> to vector<2x32xbf16>
    %cst_338 = arith.constant dense<0.000000e+00> : vector<2x128xf32>
    %739 = tpu.matmul %738, %735, %cst_338 {dimension_numbers = #tpu.dot_dimension_numbers<[1], [0], [0], [1], [0, 0, 1, 1], [], []>} : vector<2x32xbf16>, vector<32x128xbf16>, vector<2x128xf32> -> vector<2x128xf32>
    %cst_339 = arith.constant dense<0.000000e+00> : vector<2x128xf32>
    %740 = tpu.matmul %731, %733, %cst_339 {dimension_numbers = #tpu.dot_dimension_numbers<[1], [0], [0], [1], [0, 0, 1, 1], [], []>} : vector<2x32xbf16>, vector<32x128xbf16>, vector<2x128xf32> -> vector<2x128xf32>
    %741 = arith.addf %739, %740 : vector<2x128xf32>
    %742 = vector.broadcast %737 : vector<1x128xf32> to vector<2x128xf32>
    %743 = arith.addf %741, %742 : vector<2x128xf32>
    %744 = arith.negf %743 : vector<2x128xf32>
    %745 = math.exp %744 : vector<2x128xf32>
    %cst_340 = arith.constant 1.000000e+00 : f32
    %746 = vector.broadcast %cst_340 : f32 to vector<2x128xf32>
    %747 = arith.addf %746, %745 : vector<2x128xf32>
    %748 = arith.divf %746, %747 : vector<2x128xf32>
    %749 = vector.extract_strided_slice %748 {offsets = [0, 0], sizes = [2, 32], strides = [1, 1]} : vector<2x128xf32> to vector<2x32xf32>
    %750 = vector.extract_strided_slice %748 {offsets = [0, 32], sizes = [2, 32], strides = [1, 1]} : vector<2x128xf32> to vector<2x32xf32>
    %751 = vector.extract_strided_slice %748 {offsets = [0, 64], sizes = [2, 32], strides = [1, 1]} : vector<2x128xf32> to vector<2x32xf32>
    %cst_341 = arith.constant 2.000000e+00 : f32
    %752 = vector.broadcast %cst_341 : f32 to vector<2x32xf32>
    %753 = arith.mulf %752, %751 : vector<2x32xf32>
    %cst_342 = arith.constant 1.000000e+00 : f32
    %754 = vector.broadcast %cst_342 : f32 to vector<2x32xf32>
    %755 = arith.subf %753, %754 : vector<2x32xf32>
    %756 = vector.extract_strided_slice %748 {offsets = [0, 96], sizes = [2, 32], strides = [1, 1]} : vector<2x128xf32> to vector<2x32xf32>
    %757 = arith.mulf %750, %606 : vector<2x32xf32>
    %758 = arith.mulf %749, %755 : vector<2x32xf32>
    %759 = arith.addf %757, %758 : vector<2x32xf32>
    %760 = math.tanh %759 : vector<2x32xf32>
    %761 = arith.mulf %756, %760 : vector<2x32xf32>
    %c7 = arith.constant 7 : index
    %c0_343 = arith.constant 0 : index
    %c0_344 = arith.constant 0 : index
    %762 = vector.load %arg0[%c7, %c0_343, %c0_344] : memref<8x2x16xbf16, #tpu.memory_space<vmem>>, vector<1x2x16xbf16>
    %763 = vector.shape_cast %762 : vector<1x2x16xbf16> to vector<2x16xbf16>
    %c0_345 = arith.constant 0 : index
    %c0_346 = arith.constant 0 : index
    %764 = vector.load %arg1[%c0_345, %c0_346] : memref<16x128xbf16, #tpu.memory_space<vmem>>, vector<16x128xbf16>
    %c0_347 = arith.constant 0 : index
    %c0_348 = arith.constant 0 : index
    %765 = vector.load %arg2[%c0_347, %c0_348] : memref<32x128xbf16, #tpu.memory_space<vmem>>, vector<32x128xbf16>
    %c0_349 = arith.constant 0 : index
    %c0_350 = arith.constant 0 : index
    %766 = vector.load %arg3[%c0_349, %c0_350] : memref<1x128xf32, #tpu.memory_space<vmem>>, vector<1x128xf32>
    %767 = arith.truncf %637 : vector<2x32xf32> to vector<2x32xbf16>
    %cst_351 = arith.constant dense<0.000000e+00> : vector<2x128xf32>
    %768 = tpu.matmul %767, %765, %cst_351 {dimension_numbers = #tpu.dot_dimension_numbers<[1], [0], [0], [1], [0, 0, 1, 1], [], []>} : vector<2x32xbf16>, vector<32x128xbf16>, vector<2x128xf32> -> vector<2x128xf32>
    %cst_352 = arith.constant dense<0.000000e+00> : vector<2x128xf32>
    %769 = tpu.matmul %763, %764, %cst_352 {dimension_numbers = #tpu.dot_dimension_numbers<[1], [0], [0], [1], [0, 0, 1, 1], [], []>} : vector<2x16xbf16>, vector<16x128xbf16>, vector<2x128xf32> -> vector<2x128xf32>
    %770 = arith.addf %768, %769 : vector<2x128xf32>
    %771 = vector.broadcast %766 : vector<1x128xf32> to vector<2x128xf32>
    %772 = arith.addf %770, %771 : vector<2x128xf32>
    %773 = arith.negf %772 : vector<2x128xf32>
    %774 = math.exp %773 : vector<2x128xf32>
    %cst_353 = arith.constant 1.000000e+00 : f32
    %775 = vector.broadcast %cst_353 : f32 to vector<2x128xf32>
    %776 = arith.addf %775, %774 : vector<2x128xf32>
    %777 = arith.divf %775, %776 : vector<2x128xf32>
    %778 = vector.extract_strided_slice %777 {offsets = [0, 0], sizes = [2, 32], strides = [1, 1]} : vector<2x128xf32> to vector<2x32xf32>
    %779 = vector.extract_strided_slice %777 {offsets = [0, 32], sizes = [2, 32], strides = [1, 1]} : vector<2x128xf32> to vector<2x32xf32>
    %780 = vector.extract_strided_slice %777 {offsets = [0, 64], sizes = [2, 32], strides = [1, 1]} : vector<2x128xf32> to vector<2x32xf32>
    %cst_354 = arith.constant 2.000000e+00 : f32
    %781 = vector.broadcast %cst_354 : f32 to vector<2x32xf32>
    %782 = arith.mulf %781, %780 : vector<2x32xf32>
    %cst_355 = arith.constant 1.000000e+00 : f32
    %783 = vector.broadcast %cst_355 : f32 to vector<2x32xf32>
    %784 = arith.subf %782, %783 : vector<2x32xf32>
    %785 = vector.extract_strided_slice %777 {offsets = [0, 96], sizes = [2, 32], strides = [1, 1]} : vector<2x128xf32> to vector<2x32xf32>
    %786 = arith.mulf %779, %635 : vector<2x32xf32>
    %787 = arith.mulf %778, %784 : vector<2x32xf32>
    %788 = arith.addf %786, %787 : vector<2x32xf32>
    %789 = math.tanh %788 : vector<2x32xf32>
    %790 = arith.mulf %785, %789 : vector<2x32xf32>
    %791 = arith.truncf %637 : vector<2x32xf32> to vector<2x32xbf16>
    %c0_356 = arith.constant 0 : index
    %c0_357 = arith.constant 0 : index
    %c0_358 = arith.constant 0 : index
    %792 = vector.load %arg4[%c0_356, %c0_357, %c0_358] : memref<4x32x128xbf16, #tpu.memory_space<vmem>>, vector<1x32x128xbf16>
    %793 = vector.shape_cast %792 : vector<1x32x128xbf16> to vector<32x128xbf16>
    %c0_359 = arith.constant 0 : index
    %c0_360 = arith.constant 0 : index
    %c0_361 = arith.constant 0 : index
    %794 = vector.load %arg5[%c0_359, %c0_360, %c0_361] : memref<4x32x128xbf16, #tpu.memory_space<vmem>>, vector<1x32x128xbf16>
    %795 = vector.shape_cast %794 : vector<1x32x128xbf16> to vector<32x128xbf16>
    %c0_362 = arith.constant 0 : index
    %c0_363 = arith.constant 0 : index
    %c0_364 = arith.constant 0 : index
    %796 = vector.load %arg6[%c0_362, %c0_363, %c0_364] : memref<4x1x128xf32, #tpu.memory_space<vmem>>, vector<1x1x128xf32>
    %797 = vector.shape_cast %796 : vector<1x1x128xf32> to vector<1x128xf32>
    %798 = arith.truncf %668 : vector<2x32xf32> to vector<2x32xbf16>
    %cst_365 = arith.constant dense<0.000000e+00> : vector<2x128xf32>
    %799 = tpu.matmul %798, %795, %cst_365 {dimension_numbers = #tpu.dot_dimension_numbers<[1], [0], [0], [1], [0, 0, 1, 1], [], []>} : vector<2x32xbf16>, vector<32x128xbf16>, vector<2x128xf32> -> vector<2x128xf32>
    %cst_366 = arith.constant dense<0.000000e+00> : vector<2x128xf32>
    %800 = tpu.matmul %791, %793, %cst_366 {dimension_numbers = #tpu.dot_dimension_numbers<[1], [0], [0], [1], [0, 0, 1, 1], [], []>} : vector<2x32xbf16>, vector<32x128xbf16>, vector<2x128xf32> -> vector<2x128xf32>
    %801 = arith.addf %799, %800 : vector<2x128xf32>
    %802 = vector.broadcast %797 : vector<1x128xf32> to vector<2x128xf32>
    %803 = arith.addf %801, %802 : vector<2x128xf32>
    %804 = arith.negf %803 : vector<2x128xf32>
    %805 = math.exp %804 : vector<2x128xf32>
    %cst_367 = arith.constant 1.000000e+00 : f32
    %806 = vector.broadcast %cst_367 : f32 to vector<2x128xf32>
    %807 = arith.addf %806, %805 : vector<2x128xf32>
    %808 = arith.divf %806, %807 : vector<2x128xf32>
    %809 = vector.extract_strided_slice %808 {offsets = [0, 0], sizes = [2, 32], strides = [1, 1]} : vector<2x128xf32> to vector<2x32xf32>
    %810 = vector.extract_strided_slice %808 {offsets = [0, 32], sizes = [2, 32], strides = [1, 1]} : vector<2x128xf32> to vector<2x32xf32>
    %811 = vector.extract_strided_slice %808 {offsets = [0, 64], sizes = [2, 32], strides = [1, 1]} : vector<2x128xf32> to vector<2x32xf32>
    %cst_368 = arith.constant 2.000000e+00 : f32
    %812 = vector.broadcast %cst_368 : f32 to vector<2x32xf32>
    %813 = arith.mulf %812, %811 : vector<2x32xf32>
    %cst_369 = arith.constant 1.000000e+00 : f32
    %814 = vector.broadcast %cst_369 : f32 to vector<2x32xf32>
    %815 = arith.subf %813, %814 : vector<2x32xf32>
    %816 = vector.extract_strided_slice %808 {offsets = [0, 96], sizes = [2, 32], strides = [1, 1]} : vector<2x128xf32> to vector<2x32xf32>
    %817 = arith.mulf %810, %666 : vector<2x32xf32>
    %818 = arith.mulf %809, %815 : vector<2x32xf32>
    %819 = arith.addf %817, %818 : vector<2x32xf32>
    %820 = math.tanh %819 : vector<2x32xf32>
    %821 = arith.mulf %816, %820 : vector<2x32xf32>
    %822 = arith.truncf %668 : vector<2x32xf32> to vector<2x32xbf16>
    %c1_370 = arith.constant 1 : index
    %c0_371 = arith.constant 0 : index
    %c0_372 = arith.constant 0 : index
    %823 = vector.load %arg4[%c1_370, %c0_371, %c0_372] : memref<4x32x128xbf16, #tpu.memory_space<vmem>>, vector<1x32x128xbf16>
    %824 = vector.shape_cast %823 : vector<1x32x128xbf16> to vector<32x128xbf16>
    %c1_373 = arith.constant 1 : index
    %c0_374 = arith.constant 0 : index
    %c0_375 = arith.constant 0 : index
    %825 = vector.load %arg5[%c1_373, %c0_374, %c0_375] : memref<4x32x128xbf16, #tpu.memory_space<vmem>>, vector<1x32x128xbf16>
    %826 = vector.shape_cast %825 : vector<1x32x128xbf16> to vector<32x128xbf16>
    %c1_376 = arith.constant 1 : index
    %c0_377 = arith.constant 0 : index
    %c0_378 = arith.constant 0 : index
    %827 = vector.load %arg6[%c1_376, %c0_377, %c0_378] : memref<4x1x128xf32, #tpu.memory_space<vmem>>, vector<1x1x128xf32>
    %828 = vector.shape_cast %827 : vector<1x1x128xf32> to vector<1x128xf32>
    %829 = arith.truncf %699 : vector<2x32xf32> to vector<2x32xbf16>
    %cst_379 = arith.constant dense<0.000000e+00> : vector<2x128xf32>
    %830 = tpu.matmul %829, %826, %cst_379 {dimension_numbers = #tpu.dot_dimension_numbers<[1], [0], [0], [1], [0, 0, 1, 1], [], []>} : vector<2x32xbf16>, vector<32x128xbf16>, vector<2x128xf32> -> vector<2x128xf32>
    %cst_380 = arith.constant dense<0.000000e+00> : vector<2x128xf32>
    %831 = tpu.matmul %822, %824, %cst_380 {dimension_numbers = #tpu.dot_dimension_numbers<[1], [0], [0], [1], [0, 0, 1, 1], [], []>} : vector<2x32xbf16>, vector<32x128xbf16>, vector<2x128xf32> -> vector<2x128xf32>
    %832 = arith.addf %830, %831 : vector<2x128xf32>
    %833 = vector.broadcast %828 : vector<1x128xf32> to vector<2x128xf32>
    %834 = arith.addf %832, %833 : vector<2x128xf32>
    %835 = arith.negf %834 : vector<2x128xf32>
    %836 = math.exp %835 : vector<2x128xf32>
    %cst_381 = arith.constant 1.000000e+00 : f32
    %837 = vector.broadcast %cst_381 : f32 to vector<2x128xf32>
    %838 = arith.addf %837, %836 : vector<2x128xf32>
    %839 = arith.divf %837, %838 : vector<2x128xf32>
    %840 = vector.extract_strided_slice %839 {offsets = [0, 0], sizes = [2, 32], strides = [1, 1]} : vector<2x128xf32> to vector<2x32xf32>
    %841 = vector.extract_strided_slice %839 {offsets = [0, 32], sizes = [2, 32], strides = [1, 1]} : vector<2x128xf32> to vector<2x32xf32>
    %842 = vector.extract_strided_slice %839 {offsets = [0, 64], sizes = [2, 32], strides = [1, 1]} : vector<2x128xf32> to vector<2x32xf32>
    %cst_382 = arith.constant 2.000000e+00 : f32
    %843 = vector.broadcast %cst_382 : f32 to vector<2x32xf32>
    %844 = arith.mulf %843, %842 : vector<2x32xf32>
    %cst_383 = arith.constant 1.000000e+00 : f32
    %845 = vector.broadcast %cst_383 : f32 to vector<2x32xf32>
    %846 = arith.subf %844, %845 : vector<2x32xf32>
    %847 = vector.extract_strided_slice %839 {offsets = [0, 96], sizes = [2, 32], strides = [1, 1]} : vector<2x128xf32> to vector<2x32xf32>
    %848 = arith.mulf %841, %697 : vector<2x32xf32>
    %849 = arith.mulf %840, %846 : vector<2x32xf32>
    %850 = arith.addf %848, %849 : vector<2x32xf32>
    %851 = math.tanh %850 : vector<2x32xf32>
    %852 = arith.mulf %847, %851 : vector<2x32xf32>
    %853 = arith.truncf %699 : vector<2x32xf32> to vector<2x32xbf16>
    %c2_384 = arith.constant 2 : index
    %c0_385 = arith.constant 0 : index
    %c0_386 = arith.constant 0 : index
    %854 = vector.load %arg4[%c2_384, %c0_385, %c0_386] : memref<4x32x128xbf16, #tpu.memory_space<vmem>>, vector<1x32x128xbf16>
    %855 = vector.shape_cast %854 : vector<1x32x128xbf16> to vector<32x128xbf16>
    %c2_387 = arith.constant 2 : index
    %c0_388 = arith.constant 0 : index
    %c0_389 = arith.constant 0 : index
    %856 = vector.load %arg5[%c2_387, %c0_388, %c0_389] : memref<4x32x128xbf16, #tpu.memory_space<vmem>>, vector<1x32x128xbf16>
    %857 = vector.shape_cast %856 : vector<1x32x128xbf16> to vector<32x128xbf16>
    %c2_390 = arith.constant 2 : index
    %c0_391 = arith.constant 0 : index
    %c0_392 = arith.constant 0 : index
    %858 = vector.load %arg6[%c2_390, %c0_391, %c0_392] : memref<4x1x128xf32, #tpu.memory_space<vmem>>, vector<1x1x128xf32>
    %859 = vector.shape_cast %858 : vector<1x1x128xf32> to vector<1x128xf32>
    %860 = arith.truncf %730 : vector<2x32xf32> to vector<2x32xbf16>
    %cst_393 = arith.constant dense<0.000000e+00> : vector<2x128xf32>
    %861 = tpu.matmul %860, %857, %cst_393 {dimension_numbers = #tpu.dot_dimension_numbers<[1], [0], [0], [1], [0, 0, 1, 1], [], []>} : vector<2x32xbf16>, vector<32x128xbf16>, vector<2x128xf32> -> vector<2x128xf32>
    %cst_394 = arith.constant dense<0.000000e+00> : vector<2x128xf32>
    %862 = tpu.matmul %853, %855, %cst_394 {dimension_numbers = #tpu.dot_dimension_numbers<[1], [0], [0], [1], [0, 0, 1, 1], [], []>} : vector<2x32xbf16>, vector<32x128xbf16>, vector<2x128xf32> -> vector<2x128xf32>
    %863 = arith.addf %861, %862 : vector<2x128xf32>
    %864 = vector.broadcast %859 : vector<1x128xf32> to vector<2x128xf32>
    %865 = arith.addf %863, %864 : vector<2x128xf32>
    %866 = arith.negf %865 : vector<2x128xf32>
    %867 = math.exp %866 : vector<2x128xf32>
    %cst_395 = arith.constant 1.000000e+00 : f32
    %868 = vector.broadcast %cst_395 : f32 to vector<2x128xf32>
    %869 = arith.addf %868, %867 : vector<2x128xf32>
    %870 = arith.divf %868, %869 : vector<2x128xf32>
    %871 = vector.extract_strided_slice %870 {offsets = [0, 0], sizes = [2, 32], strides = [1, 1]} : vector<2x128xf32> to vector<2x32xf32>
    %872 = vector.extract_strided_slice %870 {offsets = [0, 32], sizes = [2, 32], strides = [1, 1]} : vector<2x128xf32> to vector<2x32xf32>
    %873 = vector.extract_strided_slice %870 {offsets = [0, 64], sizes = [2, 32], strides = [1, 1]} : vector<2x128xf32> to vector<2x32xf32>
    %cst_396 = arith.constant 2.000000e+00 : f32
    %874 = vector.broadcast %cst_396 : f32 to vector<2x32xf32>
    %875 = arith.mulf %874, %873 : vector<2x32xf32>
    %cst_397 = arith.constant 1.000000e+00 : f32
    %876 = vector.broadcast %cst_397 : f32 to vector<2x32xf32>
    %877 = arith.subf %875, %876 : vector<2x32xf32>
    %878 = vector.extract_strided_slice %870 {offsets = [0, 96], sizes = [2, 32], strides = [1, 1]} : vector<2x128xf32> to vector<2x32xf32>
    %879 = arith.mulf %872, %728 : vector<2x32xf32>
    %880 = arith.mulf %871, %877 : vector<2x32xf32>
    %881 = arith.addf %879, %880 : vector<2x32xf32>
    %882 = math.tanh %881 : vector<2x32xf32>
    %883 = arith.mulf %878, %882 : vector<2x32xf32>
    %884 = arith.truncf %730 : vector<2x32xf32> to vector<2x32xbf16>
    %c3_398 = arith.constant 3 : index
    %c0_399 = arith.constant 0 : index
    %c0_400 = arith.constant 0 : index
    %885 = vector.load %arg4[%c3_398, %c0_399, %c0_400] : memref<4x32x128xbf16, #tpu.memory_space<vmem>>, vector<1x32x128xbf16>
    %886 = vector.shape_cast %885 : vector<1x32x128xbf16> to vector<32x128xbf16>
    %c3_401 = arith.constant 3 : index
    %c0_402 = arith.constant 0 : index
    %c0_403 = arith.constant 0 : index
    %887 = vector.load %arg5[%c3_401, %c0_402, %c0_403] : memref<4x32x128xbf16, #tpu.memory_space<vmem>>, vector<1x32x128xbf16>
    %888 = vector.shape_cast %887 : vector<1x32x128xbf16> to vector<32x128xbf16>
    %c3_404 = arith.constant 3 : index
    %c0_405 = arith.constant 0 : index
    %c0_406 = arith.constant 0 : index
    %889 = vector.load %arg6[%c3_404, %c0_405, %c0_406] : memref<4x1x128xf32, #tpu.memory_space<vmem>>, vector<1x1x128xf32>
    %890 = vector.shape_cast %889 : vector<1x1x128xf32> to vector<1x128xf32>
    %891 = arith.truncf %761 : vector<2x32xf32> to vector<2x32xbf16>
    %cst_407 = arith.constant dense<0.000000e+00> : vector<2x128xf32>
    %892 = tpu.matmul %891, %888, %cst_407 {dimension_numbers = #tpu.dot_dimension_numbers<[1], [0], [0], [1], [0, 0, 1, 1], [], []>} : vector<2x32xbf16>, vector<32x128xbf16>, vector<2x128xf32> -> vector<2x128xf32>
    %cst_408 = arith.constant dense<0.000000e+00> : vector<2x128xf32>
    %893 = tpu.matmul %884, %886, %cst_408 {dimension_numbers = #tpu.dot_dimension_numbers<[1], [0], [0], [1], [0, 0, 1, 1], [], []>} : vector<2x32xbf16>, vector<32x128xbf16>, vector<2x128xf32> -> vector<2x128xf32>
    %894 = arith.addf %892, %893 : vector<2x128xf32>
    %895 = vector.broadcast %890 : vector<1x128xf32> to vector<2x128xf32>
    %896 = arith.addf %894, %895 : vector<2x128xf32>
    %897 = arith.negf %896 : vector<2x128xf32>
    %898 = math.exp %897 : vector<2x128xf32>
    %cst_409 = arith.constant 1.000000e+00 : f32
    %899 = vector.broadcast %cst_409 : f32 to vector<2x128xf32>
    %900 = arith.addf %899, %898 : vector<2x128xf32>
    %901 = arith.divf %899, %900 : vector<2x128xf32>
    %902 = vector.extract_strided_slice %901 {offsets = [0, 0], sizes = [2, 32], strides = [1, 1]} : vector<2x128xf32> to vector<2x32xf32>
    %903 = vector.extract_strided_slice %901 {offsets = [0, 32], sizes = [2, 32], strides = [1, 1]} : vector<2x128xf32> to vector<2x32xf32>
    %904 = vector.extract_strided_slice %901 {offsets = [0, 64], sizes = [2, 32], strides = [1, 1]} : vector<2x128xf32> to vector<2x32xf32>
    %cst_410 = arith.constant 2.000000e+00 : f32
    %905 = vector.broadcast %cst_410 : f32 to vector<2x32xf32>
    %906 = arith.mulf %905, %904 : vector<2x32xf32>
    %cst_411 = arith.constant 1.000000e+00 : f32
    %907 = vector.broadcast %cst_411 : f32 to vector<2x32xf32>
    %908 = arith.subf %906, %907 : vector<2x32xf32>
    %909 = vector.extract_strided_slice %901 {offsets = [0, 96], sizes = [2, 32], strides = [1, 1]} : vector<2x128xf32> to vector<2x32xf32>
    %910 = arith.mulf %903, %759 : vector<2x32xf32>
    %911 = arith.mulf %902, %908 : vector<2x32xf32>
    %912 = arith.addf %910, %911 : vector<2x32xf32>
    %913 = math.tanh %912 : vector<2x32xf32>
    %914 = arith.mulf %909, %913 : vector<2x32xf32>
    %915 = arith.truncf %790 : vector<2x32xf32> to vector<2x32xbf16>
    %c0_412 = arith.constant 0 : index
    %c0_413 = arith.constant 0 : index
    %c0_414 = arith.constant 0 : index
    %916 = vector.load %arg4[%c0_412, %c0_413, %c0_414] : memref<4x32x128xbf16, #tpu.memory_space<vmem>>, vector<1x32x128xbf16>
    %917 = vector.shape_cast %916 : vector<1x32x128xbf16> to vector<32x128xbf16>
    %c0_415 = arith.constant 0 : index
    %c0_416 = arith.constant 0 : index
    %c0_417 = arith.constant 0 : index
    %918 = vector.load %arg5[%c0_415, %c0_416, %c0_417] : memref<4x32x128xbf16, #tpu.memory_space<vmem>>, vector<1x32x128xbf16>
    %919 = vector.shape_cast %918 : vector<1x32x128xbf16> to vector<32x128xbf16>
    %c0_418 = arith.constant 0 : index
    %c0_419 = arith.constant 0 : index
    %c0_420 = arith.constant 0 : index
    %920 = vector.load %arg6[%c0_418, %c0_419, %c0_420] : memref<4x1x128xf32, #tpu.memory_space<vmem>>, vector<1x1x128xf32>
    %921 = vector.shape_cast %920 : vector<1x1x128xf32> to vector<1x128xf32>
    %922 = arith.truncf %821 : vector<2x32xf32> to vector<2x32xbf16>
    %cst_421 = arith.constant dense<0.000000e+00> : vector<2x128xf32>
    %923 = tpu.matmul %922, %919, %cst_421 {dimension_numbers = #tpu.dot_dimension_numbers<[1], [0], [0], [1], [0, 0, 1, 1], [], []>} : vector<2x32xbf16>, vector<32x128xbf16>, vector<2x128xf32> -> vector<2x128xf32>
    %cst_422 = arith.constant dense<0.000000e+00> : vector<2x128xf32>
    %924 = tpu.matmul %915, %917, %cst_422 {dimension_numbers = #tpu.dot_dimension_numbers<[1], [0], [0], [1], [0, 0, 1, 1], [], []>} : vector<2x32xbf16>, vector<32x128xbf16>, vector<2x128xf32> -> vector<2x128xf32>
    %925 = arith.addf %923, %924 : vector<2x128xf32>
    %926 = vector.broadcast %921 : vector<1x128xf32> to vector<2x128xf32>
    %927 = arith.addf %925, %926 : vector<2x128xf32>
    %928 = arith.negf %927 : vector<2x128xf32>
    %929 = math.exp %928 : vector<2x128xf32>
    %cst_423 = arith.constant 1.000000e+00 : f32
    %930 = vector.broadcast %cst_423 : f32 to vector<2x128xf32>
    %931 = arith.addf %930, %929 : vector<2x128xf32>
    %932 = arith.divf %930, %931 : vector<2x128xf32>
    %933 = vector.extract_strided_slice %932 {offsets = [0, 0], sizes = [2, 32], strides = [1, 1]} : vector<2x128xf32> to vector<2x32xf32>
    %934 = vector.extract_strided_slice %932 {offsets = [0, 32], sizes = [2, 32], strides = [1, 1]} : vector<2x128xf32> to vector<2x32xf32>
    %935 = vector.extract_strided_slice %932 {offsets = [0, 64], sizes = [2, 32], strides = [1, 1]} : vector<2x128xf32> to vector<2x32xf32>
    %cst_424 = arith.constant 2.000000e+00 : f32
    %936 = vector.broadcast %cst_424 : f32 to vector<2x32xf32>
    %937 = arith.mulf %936, %935 : vector<2x32xf32>
    %cst_425 = arith.constant 1.000000e+00 : f32
    %938 = vector.broadcast %cst_425 : f32 to vector<2x32xf32>
    %939 = arith.subf %937, %938 : vector<2x32xf32>
    %940 = vector.extract_strided_slice %932 {offsets = [0, 96], sizes = [2, 32], strides = [1, 1]} : vector<2x128xf32> to vector<2x32xf32>
    %941 = arith.mulf %934, %819 : vector<2x32xf32>
    %942 = arith.mulf %933, %939 : vector<2x32xf32>
    %943 = arith.addf %941, %942 : vector<2x32xf32>
    %944 = math.tanh %943 : vector<2x32xf32>
    %945 = arith.mulf %940, %944 : vector<2x32xf32>
    %946 = arith.truncf %821 : vector<2x32xf32> to vector<2x32xbf16>
    %c1_426 = arith.constant 1 : index
    %c0_427 = arith.constant 0 : index
    %c0_428 = arith.constant 0 : index
    %947 = vector.load %arg4[%c1_426, %c0_427, %c0_428] : memref<4x32x128xbf16, #tpu.memory_space<vmem>>, vector<1x32x128xbf16>
    %948 = vector.shape_cast %947 : vector<1x32x128xbf16> to vector<32x128xbf16>
    %c1_429 = arith.constant 1 : index
    %c0_430 = arith.constant 0 : index
    %c0_431 = arith.constant 0 : index
    %949 = vector.load %arg5[%c1_429, %c0_430, %c0_431] : memref<4x32x128xbf16, #tpu.memory_space<vmem>>, vector<1x32x128xbf16>
    %950 = vector.shape_cast %949 : vector<1x32x128xbf16> to vector<32x128xbf16>
    %c1_432 = arith.constant 1 : index
    %c0_433 = arith.constant 0 : index
    %c0_434 = arith.constant 0 : index
    %951 = vector.load %arg6[%c1_432, %c0_433, %c0_434] : memref<4x1x128xf32, #tpu.memory_space<vmem>>, vector<1x1x128xf32>
    %952 = vector.shape_cast %951 : vector<1x1x128xf32> to vector<1x128xf32>
    %953 = arith.truncf %852 : vector<2x32xf32> to vector<2x32xbf16>
    %cst_435 = arith.constant dense<0.000000e+00> : vector<2x128xf32>
    %954 = tpu.matmul %953, %950, %cst_435 {dimension_numbers = #tpu.dot_dimension_numbers<[1], [0], [0], [1], [0, 0, 1, 1], [], []>} : vector<2x32xbf16>, vector<32x128xbf16>, vector<2x128xf32> -> vector<2x128xf32>
    %cst_436 = arith.constant dense<0.000000e+00> : vector<2x128xf32>
    %955 = tpu.matmul %946, %948, %cst_436 {dimension_numbers = #tpu.dot_dimension_numbers<[1], [0], [0], [1], [0, 0, 1, 1], [], []>} : vector<2x32xbf16>, vector<32x128xbf16>, vector<2x128xf32> -> vector<2x128xf32>
    %956 = arith.addf %954, %955 : vector<2x128xf32>
    %957 = vector.broadcast %952 : vector<1x128xf32> to vector<2x128xf32>
    %958 = arith.addf %956, %957 : vector<2x128xf32>
    %959 = arith.negf %958 : vector<2x128xf32>
    %960 = math.exp %959 : vector<2x128xf32>
    %cst_437 = arith.constant 1.000000e+00 : f32
    %961 = vector.broadcast %cst_437 : f32 to vector<2x128xf32>
    %962 = arith.addf %961, %960 : vector<2x128xf32>
    %963 = arith.divf %961, %962 : vector<2x128xf32>
    %964 = vector.extract_strided_slice %963 {offsets = [0, 0], sizes = [2, 32], strides = [1, 1]} : vector<2x128xf32> to vector<2x32xf32>
    %965 = vector.extract_strided_slice %963 {offsets = [0, 32], sizes = [2, 32], strides = [1, 1]} : vector<2x128xf32> to vector<2x32xf32>
    %966 = vector.extract_strided_slice %963 {offsets = [0, 64], sizes = [2, 32], strides = [1, 1]} : vector<2x128xf32> to vector<2x32xf32>
    %cst_438 = arith.constant 2.000000e+00 : f32
    %967 = vector.broadcast %cst_438 : f32 to vector<2x32xf32>
    %968 = arith.mulf %967, %966 : vector<2x32xf32>
    %cst_439 = arith.constant 1.000000e+00 : f32
    %969 = vector.broadcast %cst_439 : f32 to vector<2x32xf32>
    %970 = arith.subf %968, %969 : vector<2x32xf32>
    %971 = vector.extract_strided_slice %963 {offsets = [0, 96], sizes = [2, 32], strides = [1, 1]} : vector<2x128xf32> to vector<2x32xf32>
    %972 = arith.mulf %965, %850 : vector<2x32xf32>
    %973 = arith.mulf %964, %970 : vector<2x32xf32>
    %974 = arith.addf %972, %973 : vector<2x32xf32>
    %975 = math.tanh %974 : vector<2x32xf32>
    %976 = arith.mulf %971, %975 : vector<2x32xf32>
    %977 = arith.truncf %852 : vector<2x32xf32> to vector<2x32xbf16>
    %c2_440 = arith.constant 2 : index
    %c0_441 = arith.constant 0 : index
    %c0_442 = arith.constant 0 : index
    %978 = vector.load %arg4[%c2_440, %c0_441, %c0_442] : memref<4x32x128xbf16, #tpu.memory_space<vmem>>, vector<1x32x128xbf16>
    %979 = vector.shape_cast %978 : vector<1x32x128xbf16> to vector<32x128xbf16>
    %c2_443 = arith.constant 2 : index
    %c0_444 = arith.constant 0 : index
    %c0_445 = arith.constant 0 : index
    %980 = vector.load %arg5[%c2_443, %c0_444, %c0_445] : memref<4x32x128xbf16, #tpu.memory_space<vmem>>, vector<1x32x128xbf16>
    %981 = vector.shape_cast %980 : vector<1x32x128xbf16> to vector<32x128xbf16>
    %c2_446 = arith.constant 2 : index
    %c0_447 = arith.constant 0 : index
    %c0_448 = arith.constant 0 : index
    %982 = vector.load %arg6[%c2_446, %c0_447, %c0_448] : memref<4x1x128xf32, #tpu.memory_space<vmem>>, vector<1x1x128xf32>
    %983 = vector.shape_cast %982 : vector<1x1x128xf32> to vector<1x128xf32>
    %984 = arith.truncf %883 : vector<2x32xf32> to vector<2x32xbf16>
    %cst_449 = arith.constant dense<0.000000e+00> : vector<2x128xf32>
    %985 = tpu.matmul %984, %981, %cst_449 {dimension_numbers = #tpu.dot_dimension_numbers<[1], [0], [0], [1], [0, 0, 1, 1], [], []>} : vector<2x32xbf16>, vector<32x128xbf16>, vector<2x128xf32> -> vector<2x128xf32>
    %cst_450 = arith.constant dense<0.000000e+00> : vector<2x128xf32>
    %986 = tpu.matmul %977, %979, %cst_450 {dimension_numbers = #tpu.dot_dimension_numbers<[1], [0], [0], [1], [0, 0, 1, 1], [], []>} : vector<2x32xbf16>, vector<32x128xbf16>, vector<2x128xf32> -> vector<2x128xf32>
    %987 = arith.addf %985, %986 : vector<2x128xf32>
    %988 = vector.broadcast %983 : vector<1x128xf32> to vector<2x128xf32>
    %989 = arith.addf %987, %988 : vector<2x128xf32>
    %990 = arith.negf %989 : vector<2x128xf32>
    %991 = math.exp %990 : vector<2x128xf32>
    %cst_451 = arith.constant 1.000000e+00 : f32
    %992 = vector.broadcast %cst_451 : f32 to vector<2x128xf32>
    %993 = arith.addf %992, %991 : vector<2x128xf32>
    %994 = arith.divf %992, %993 : vector<2x128xf32>
    %995 = vector.extract_strided_slice %994 {offsets = [0, 0], sizes = [2, 32], strides = [1, 1]} : vector<2x128xf32> to vector<2x32xf32>
    %996 = vector.extract_strided_slice %994 {offsets = [0, 32], sizes = [2, 32], strides = [1, 1]} : vector<2x128xf32> to vector<2x32xf32>
    %997 = vector.extract_strided_slice %994 {offsets = [0, 64], sizes = [2, 32], strides = [1, 1]} : vector<2x128xf32> to vector<2x32xf32>
    %cst_452 = arith.constant 2.000000e+00 : f32
    %998 = vector.broadcast %cst_452 : f32 to vector<2x32xf32>
    %999 = arith.mulf %998, %997 : vector<2x32xf32>
    %cst_453 = arith.constant 1.000000e+00 : f32
    %1000 = vector.broadcast %cst_453 : f32 to vector<2x32xf32>
    %1001 = arith.subf %999, %1000 : vector<2x32xf32>
    %1002 = vector.extract_strided_slice %994 {offsets = [0, 96], sizes = [2, 32], strides = [1, 1]} : vector<2x128xf32> to vector<2x32xf32>
    %1003 = arith.mulf %996, %881 : vector<2x32xf32>
    %1004 = arith.mulf %995, %1001 : vector<2x32xf32>
    %1005 = arith.addf %1003, %1004 : vector<2x32xf32>
    %1006 = math.tanh %1005 : vector<2x32xf32>
    %1007 = arith.mulf %1002, %1006 : vector<2x32xf32>
    %1008 = arith.truncf %883 : vector<2x32xf32> to vector<2x32xbf16>
    %c3_454 = arith.constant 3 : index
    %c0_455 = arith.constant 0 : index
    %c0_456 = arith.constant 0 : index
    %1009 = vector.load %arg4[%c3_454, %c0_455, %c0_456] : memref<4x32x128xbf16, #tpu.memory_space<vmem>>, vector<1x32x128xbf16>
    %1010 = vector.shape_cast %1009 : vector<1x32x128xbf16> to vector<32x128xbf16>
    %c3_457 = arith.constant 3 : index
    %c0_458 = arith.constant 0 : index
    %c0_459 = arith.constant 0 : index
    %1011 = vector.load %arg5[%c3_457, %c0_458, %c0_459] : memref<4x32x128xbf16, #tpu.memory_space<vmem>>, vector<1x32x128xbf16>
    %1012 = vector.shape_cast %1011 : vector<1x32x128xbf16> to vector<32x128xbf16>
    %c3_460 = arith.constant 3 : index
    %c0_461 = arith.constant 0 : index
    %c0_462 = arith.constant 0 : index
    %1013 = vector.load %arg6[%c3_460, %c0_461, %c0_462] : memref<4x1x128xf32, #tpu.memory_space<vmem>>, vector<1x1x128xf32>
    %1014 = vector.shape_cast %1013 : vector<1x1x128xf32> to vector<1x128xf32>
    %1015 = arith.truncf %914 : vector<2x32xf32> to vector<2x32xbf16>
    %cst_463 = arith.constant dense<0.000000e+00> : vector<2x128xf32>
    %1016 = tpu.matmul %1015, %1012, %cst_463 {dimension_numbers = #tpu.dot_dimension_numbers<[1], [0], [0], [1], [0, 0, 1, 1], [], []>} : vector<2x32xbf16>, vector<32x128xbf16>, vector<2x128xf32> -> vector<2x128xf32>
    %cst_464 = arith.constant dense<0.000000e+00> : vector<2x128xf32>
    %1017 = tpu.matmul %1008, %1010, %cst_464 {dimension_numbers = #tpu.dot_dimension_numbers<[1], [0], [0], [1], [0, 0, 1, 1], [], []>} : vector<2x32xbf16>, vector<32x128xbf16>, vector<2x128xf32> -> vector<2x128xf32>
    %1018 = arith.addf %1016, %1017 : vector<2x128xf32>
    %1019 = vector.broadcast %1014 : vector<1x128xf32> to vector<2x128xf32>
    %1020 = arith.addf %1018, %1019 : vector<2x128xf32>
    %1021 = arith.negf %1020 : vector<2x128xf32>
    %1022 = math.exp %1021 : vector<2x128xf32>
    %cst_465 = arith.constant 1.000000e+00 : f32
    %1023 = vector.broadcast %cst_465 : f32 to vector<2x128xf32>
    %1024 = arith.addf %1023, %1022 : vector<2x128xf32>
    %1025 = arith.divf %1023, %1024 : vector<2x128xf32>
    %1026 = vector.extract_strided_slice %1025 {offsets = [0, 0], sizes = [2, 32], strides = [1, 1]} : vector<2x128xf32> to vector<2x32xf32>
    %1027 = vector.extract_strided_slice %1025 {offsets = [0, 32], sizes = [2, 32], strides = [1, 1]} : vector<2x128xf32> to vector<2x32xf32>
    %1028 = vector.extract_strided_slice %1025 {offsets = [0, 64], sizes = [2, 32], strides = [1, 1]} : vector<2x128xf32> to vector<2x32xf32>
    %cst_466 = arith.constant 2.000000e+00 : f32
    %1029 = vector.broadcast %cst_466 : f32 to vector<2x32xf32>
    %1030 = arith.mulf %1029, %1028 : vector<2x32xf32>
    %cst_467 = arith.constant 1.000000e+00 : f32
    %1031 = vector.broadcast %cst_467 : f32 to vector<2x32xf32>
    %1032 = arith.subf %1030, %1031 : vector<2x32xf32>
    %1033 = vector.extract_strided_slice %1025 {offsets = [0, 96], sizes = [2, 32], strides = [1, 1]} : vector<2x128xf32> to vector<2x32xf32>
    %1034 = arith.mulf %1027, %912 : vector<2x32xf32>
    %1035 = arith.mulf %1026, %1032 : vector<2x32xf32>
    %1036 = arith.addf %1034, %1035 : vector<2x32xf32>
    %1037 = math.tanh %1036 : vector<2x32xf32>
    %1038 = arith.mulf %1033, %1037 : vector<2x32xf32>
    %1039 = arith.truncf %945 : vector<2x32xf32> to vector<2x32xbf16>
    %c1_468 = arith.constant 1 : index
    %c0_469 = arith.constant 0 : index
    %c0_470 = arith.constant 0 : index
    %1040 = vector.load %arg4[%c1_468, %c0_469, %c0_470] : memref<4x32x128xbf16, #tpu.memory_space<vmem>>, vector<1x32x128xbf16>
    %1041 = vector.shape_cast %1040 : vector<1x32x128xbf16> to vector<32x128xbf16>
    %c1_471 = arith.constant 1 : index
    %c0_472 = arith.constant 0 : index
    %c0_473 = arith.constant 0 : index
    %1042 = vector.load %arg5[%c1_471, %c0_472, %c0_473] : memref<4x32x128xbf16, #tpu.memory_space<vmem>>, vector<1x32x128xbf16>
    %1043 = vector.shape_cast %1042 : vector<1x32x128xbf16> to vector<32x128xbf16>
    %c1_474 = arith.constant 1 : index
    %c0_475 = arith.constant 0 : index
    %c0_476 = arith.constant 0 : index
    %1044 = vector.load %arg6[%c1_474, %c0_475, %c0_476] : memref<4x1x128xf32, #tpu.memory_space<vmem>>, vector<1x1x128xf32>
    %1045 = vector.shape_cast %1044 : vector<1x1x128xf32> to vector<1x128xf32>
    %1046 = arith.truncf %976 : vector<2x32xf32> to vector<2x32xbf16>
    %cst_477 = arith.constant dense<0.000000e+00> : vector<2x128xf32>
    %1047 = tpu.matmul %1046, %1043, %cst_477 {dimension_numbers = #tpu.dot_dimension_numbers<[1], [0], [0], [1], [0, 0, 1, 1], [], []>} : vector<2x32xbf16>, vector<32x128xbf16>, vector<2x128xf32> -> vector<2x128xf32>
    %cst_478 = arith.constant dense<0.000000e+00> : vector<2x128xf32>
    %1048 = tpu.matmul %1039, %1041, %cst_478 {dimension_numbers = #tpu.dot_dimension_numbers<[1], [0], [0], [1], [0, 0, 1, 1], [], []>} : vector<2x32xbf16>, vector<32x128xbf16>, vector<2x128xf32> -> vector<2x128xf32>
    %1049 = arith.addf %1047, %1048 : vector<2x128xf32>
    %1050 = vector.broadcast %1045 : vector<1x128xf32> to vector<2x128xf32>
    %1051 = arith.addf %1049, %1050 : vector<2x128xf32>
    %1052 = arith.negf %1051 : vector<2x128xf32>
    %1053 = math.exp %1052 : vector<2x128xf32>
    %cst_479 = arith.constant 1.000000e+00 : f32
    %1054 = vector.broadcast %cst_479 : f32 to vector<2x128xf32>
    %1055 = arith.addf %1054, %1053 : vector<2x128xf32>
    %1056 = arith.divf %1054, %1055 : vector<2x128xf32>
    %1057 = vector.extract_strided_slice %1056 {offsets = [0, 0], sizes = [2, 32], strides = [1, 1]} : vector<2x128xf32> to vector<2x32xf32>
    %1058 = vector.extract_strided_slice %1056 {offsets = [0, 32], sizes = [2, 32], strides = [1, 1]} : vector<2x128xf32> to vector<2x32xf32>
    %1059 = vector.extract_strided_slice %1056 {offsets = [0, 64], sizes = [2, 32], strides = [1, 1]} : vector<2x128xf32> to vector<2x32xf32>
    %cst_480 = arith.constant 2.000000e+00 : f32
    %1060 = vector.broadcast %cst_480 : f32 to vector<2x32xf32>
    %1061 = arith.mulf %1060, %1059 : vector<2x32xf32>
    %cst_481 = arith.constant 1.000000e+00 : f32
    %1062 = vector.broadcast %cst_481 : f32 to vector<2x32xf32>
    %1063 = arith.subf %1061, %1062 : vector<2x32xf32>
    %1064 = vector.extract_strided_slice %1056 {offsets = [0, 96], sizes = [2, 32], strides = [1, 1]} : vector<2x128xf32> to vector<2x32xf32>
    %1065 = arith.mulf %1058, %974 : vector<2x32xf32>
    %1066 = arith.mulf %1057, %1063 : vector<2x32xf32>
    %1067 = arith.addf %1065, %1066 : vector<2x32xf32>
    %1068 = math.tanh %1067 : vector<2x32xf32>
    %1069 = arith.mulf %1064, %1068 : vector<2x32xf32>
    %1070 = arith.truncf %976 : vector<2x32xf32> to vector<2x32xbf16>
    %c2_482 = arith.constant 2 : index
    %c0_483 = arith.constant 0 : index
    %c0_484 = arith.constant 0 : index
    %1071 = vector.load %arg4[%c2_482, %c0_483, %c0_484] : memref<4x32x128xbf16, #tpu.memory_space<vmem>>, vector<1x32x128xbf16>
    %1072 = vector.shape_cast %1071 : vector<1x32x128xbf16> to vector<32x128xbf16>
    %c2_485 = arith.constant 2 : index
    %c0_486 = arith.constant 0 : index
    %c0_487 = arith.constant 0 : index
    %1073 = vector.load %arg5[%c2_485, %c0_486, %c0_487] : memref<4x32x128xbf16, #tpu.memory_space<vmem>>, vector<1x32x128xbf16>
    %1074 = vector.shape_cast %1073 : vector<1x32x128xbf16> to vector<32x128xbf16>
    %c2_488 = arith.constant 2 : index
    %c0_489 = arith.constant 0 : index
    %c0_490 = arith.constant 0 : index
    %1075 = vector.load %arg6[%c2_488, %c0_489, %c0_490] : memref<4x1x128xf32, #tpu.memory_space<vmem>>, vector<1x1x128xf32>
    %1076 = vector.shape_cast %1075 : vector<1x1x128xf32> to vector<1x128xf32>
    %1077 = arith.truncf %1007 : vector<2x32xf32> to vector<2x32xbf16>
    %cst_491 = arith.constant dense<0.000000e+00> : vector<2x128xf32>
    %1078 = tpu.matmul %1077, %1074, %cst_491 {dimension_numbers = #tpu.dot_dimension_numbers<[1], [0], [0], [1], [0, 0, 1, 1], [], []>} : vector<2x32xbf16>, vector<32x128xbf16>, vector<2x128xf32> -> vector<2x128xf32>
    %cst_492 = arith.constant dense<0.000000e+00> : vector<2x128xf32>
    %1079 = tpu.matmul %1070, %1072, %cst_492 {dimension_numbers = #tpu.dot_dimension_numbers<[1], [0], [0], [1], [0, 0, 1, 1], [], []>} : vector<2x32xbf16>, vector<32x128xbf16>, vector<2x128xf32> -> vector<2x128xf32>
    %1080 = arith.addf %1078, %1079 : vector<2x128xf32>
    %1081 = vector.broadcast %1076 : vector<1x128xf32> to vector<2x128xf32>
    %1082 = arith.addf %1080, %1081 : vector<2x128xf32>
    %1083 = arith.negf %1082 : vector<2x128xf32>
    %1084 = math.exp %1083 : vector<2x128xf32>
    %cst_493 = arith.constant 1.000000e+00 : f32
    %1085 = vector.broadcast %cst_493 : f32 to vector<2x128xf32>
    %1086 = arith.addf %1085, %1084 : vector<2x128xf32>
    %1087 = arith.divf %1085, %1086 : vector<2x128xf32>
    %1088 = vector.extract_strided_slice %1087 {offsets = [0, 0], sizes = [2, 32], strides = [1, 1]} : vector<2x128xf32> to vector<2x32xf32>
    %1089 = vector.extract_strided_slice %1087 {offsets = [0, 32], sizes = [2, 32], strides = [1, 1]} : vector<2x128xf32> to vector<2x32xf32>
    %1090 = vector.extract_strided_slice %1087 {offsets = [0, 64], sizes = [2, 32], strides = [1, 1]} : vector<2x128xf32> to vector<2x32xf32>
    %cst_494 = arith.constant 2.000000e+00 : f32
    %1091 = vector.broadcast %cst_494 : f32 to vector<2x32xf32>
    %1092 = arith.mulf %1091, %1090 : vector<2x32xf32>
    %cst_495 = arith.constant 1.000000e+00 : f32
    %1093 = vector.broadcast %cst_495 : f32 to vector<2x32xf32>
    %1094 = arith.subf %1092, %1093 : vector<2x32xf32>
    %1095 = vector.extract_strided_slice %1087 {offsets = [0, 96], sizes = [2, 32], strides = [1, 1]} : vector<2x128xf32> to vector<2x32xf32>
    %1096 = arith.mulf %1089, %1005 : vector<2x32xf32>
    %1097 = arith.mulf %1088, %1094 : vector<2x32xf32>
    %1098 = arith.addf %1096, %1097 : vector<2x32xf32>
    %1099 = math.tanh %1098 : vector<2x32xf32>
    %1100 = arith.mulf %1095, %1099 : vector<2x32xf32>
    %1101 = arith.truncf %1007 : vector<2x32xf32> to vector<2x32xbf16>
    %c3_496 = arith.constant 3 : index
    %c0_497 = arith.constant 0 : index
    %c0_498 = arith.constant 0 : index
    %1102 = vector.load %arg4[%c3_496, %c0_497, %c0_498] : memref<4x32x128xbf16, #tpu.memory_space<vmem>>, vector<1x32x128xbf16>
    %1103 = vector.shape_cast %1102 : vector<1x32x128xbf16> to vector<32x128xbf16>
    %c3_499 = arith.constant 3 : index
    %c0_500 = arith.constant 0 : index
    %c0_501 = arith.constant 0 : index
    %1104 = vector.load %arg5[%c3_499, %c0_500, %c0_501] : memref<4x32x128xbf16, #tpu.memory_space<vmem>>, vector<1x32x128xbf16>
    %1105 = vector.shape_cast %1104 : vector<1x32x128xbf16> to vector<32x128xbf16>
    %c3_502 = arith.constant 3 : index
    %c0_503 = arith.constant 0 : index
    %c0_504 = arith.constant 0 : index
    %1106 = vector.load %arg6[%c3_502, %c0_503, %c0_504] : memref<4x1x128xf32, #tpu.memory_space<vmem>>, vector<1x1x128xf32>
    %1107 = vector.shape_cast %1106 : vector<1x1x128xf32> to vector<1x128xf32>
    %1108 = arith.truncf %1038 : vector<2x32xf32> to vector<2x32xbf16>
    %cst_505 = arith.constant dense<0.000000e+00> : vector<2x128xf32>
    %1109 = tpu.matmul %1108, %1105, %cst_505 {dimension_numbers = #tpu.dot_dimension_numbers<[1], [0], [0], [1], [0, 0, 1, 1], [], []>} : vector<2x32xbf16>, vector<32x128xbf16>, vector<2x128xf32> -> vector<2x128xf32>
    %cst_506 = arith.constant dense<0.000000e+00> : vector<2x128xf32>
    %1110 = tpu.matmul %1101, %1103, %cst_506 {dimension_numbers = #tpu.dot_dimension_numbers<[1], [0], [0], [1], [0, 0, 1, 1], [], []>} : vector<2x32xbf16>, vector<32x128xbf16>, vector<2x128xf32> -> vector<2x128xf32>
    %1111 = arith.addf %1109, %1110 : vector<2x128xf32>
    %1112 = vector.broadcast %1107 : vector<1x128xf32> to vector<2x128xf32>
    %1113 = arith.addf %1111, %1112 : vector<2x128xf32>
    %1114 = arith.negf %1113 : vector<2x128xf32>
    %1115 = math.exp %1114 : vector<2x128xf32>
    %cst_507 = arith.constant 1.000000e+00 : f32
    %1116 = vector.broadcast %cst_507 : f32 to vector<2x128xf32>
    %1117 = arith.addf %1116, %1115 : vector<2x128xf32>
    %1118 = arith.divf %1116, %1117 : vector<2x128xf32>
    %1119 = vector.extract_strided_slice %1118 {offsets = [0, 0], sizes = [2, 32], strides = [1, 1]} : vector<2x128xf32> to vector<2x32xf32>
    %1120 = vector.extract_strided_slice %1118 {offsets = [0, 32], sizes = [2, 32], strides = [1, 1]} : vector<2x128xf32> to vector<2x32xf32>
    %1121 = vector.extract_strided_slice %1118 {offsets = [0, 64], sizes = [2, 32], strides = [1, 1]} : vector<2x128xf32> to vector<2x32xf32>
    %cst_508 = arith.constant 2.000000e+00 : f32
    %1122 = vector.broadcast %cst_508 : f32 to vector<2x32xf32>
    %1123 = arith.mulf %1122, %1121 : vector<2x32xf32>
    %cst_509 = arith.constant 1.000000e+00 : f32
    %1124 = vector.broadcast %cst_509 : f32 to vector<2x32xf32>
    %1125 = arith.subf %1123, %1124 : vector<2x32xf32>
    %1126 = vector.extract_strided_slice %1118 {offsets = [0, 96], sizes = [2, 32], strides = [1, 1]} : vector<2x128xf32> to vector<2x32xf32>
    %1127 = arith.mulf %1120, %1036 : vector<2x32xf32>
    %1128 = arith.mulf %1119, %1125 : vector<2x32xf32>
    %1129 = arith.addf %1127, %1128 : vector<2x32xf32>
    %1130 = math.tanh %1129 : vector<2x32xf32>
    %1131 = arith.mulf %1126, %1130 : vector<2x32xf32>
    %1132 = arith.truncf %1069 : vector<2x32xf32> to vector<2x32xbf16>
    %c2_510 = arith.constant 2 : index
    %c0_511 = arith.constant 0 : index
    %c0_512 = arith.constant 0 : index
    %1133 = vector.load %arg4[%c2_510, %c0_511, %c0_512] : memref<4x32x128xbf16, #tpu.memory_space<vmem>>, vector<1x32x128xbf16>
    %1134 = vector.shape_cast %1133 : vector<1x32x128xbf16> to vector<32x128xbf16>
    %c2_513 = arith.constant 2 : index
    %c0_514 = arith.constant 0 : index
    %c0_515 = arith.constant 0 : index
    %1135 = vector.load %arg5[%c2_513, %c0_514, %c0_515] : memref<4x32x128xbf16, #tpu.memory_space<vmem>>, vector<1x32x128xbf16>
    %1136 = vector.shape_cast %1135 : vector<1x32x128xbf16> to vector<32x128xbf16>
    %c2_516 = arith.constant 2 : index
    %c0_517 = arith.constant 0 : index
    %c0_518 = arith.constant 0 : index
    %1137 = vector.load %arg6[%c2_516, %c0_517, %c0_518] : memref<4x1x128xf32, #tpu.memory_space<vmem>>, vector<1x1x128xf32>
    %1138 = vector.shape_cast %1137 : vector<1x1x128xf32> to vector<1x128xf32>
    %1139 = arith.truncf %1100 : vector<2x32xf32> to vector<2x32xbf16>
    %cst_519 = arith.constant dense<0.000000e+00> : vector<2x128xf32>
    %1140 = tpu.matmul %1139, %1136, %cst_519 {dimension_numbers = #tpu.dot_dimension_numbers<[1], [0], [0], [1], [0, 0, 1, 1], [], []>} : vector<2x32xbf16>, vector<32x128xbf16>, vector<2x128xf32> -> vector<2x128xf32>
    %cst_520 = arith.constant dense<0.000000e+00> : vector<2x128xf32>
    %1141 = tpu.matmul %1132, %1134, %cst_520 {dimension_numbers = #tpu.dot_dimension_numbers<[1], [0], [0], [1], [0, 0, 1, 1], [], []>} : vector<2x32xbf16>, vector<32x128xbf16>, vector<2x128xf32> -> vector<2x128xf32>
    %1142 = arith.addf %1140, %1141 : vector<2x128xf32>
    %1143 = vector.broadcast %1138 : vector<1x128xf32> to vector<2x128xf32>
    %1144 = arith.addf %1142, %1143 : vector<2x128xf32>
    %1145 = arith.negf %1144 : vector<2x128xf32>
    %1146 = math.exp %1145 : vector<2x128xf32>
    %cst_521 = arith.constant 1.000000e+00 : f32
    %1147 = vector.broadcast %cst_521 : f32 to vector<2x128xf32>
    %1148 = arith.addf %1147, %1146 : vector<2x128xf32>
    %1149 = arith.divf %1147, %1148 : vector<2x128xf32>
    %1150 = vector.extract_strided_slice %1149 {offsets = [0, 0], sizes = [2, 32], strides = [1, 1]} : vector<2x128xf32> to vector<2x32xf32>
    %1151 = vector.extract_strided_slice %1149 {offsets = [0, 32], sizes = [2, 32], strides = [1, 1]} : vector<2x128xf32> to vector<2x32xf32>
    %1152 = vector.extract_strided_slice %1149 {offsets = [0, 64], sizes = [2, 32], strides = [1, 1]} : vector<2x128xf32> to vector<2x32xf32>
    %cst_522 = arith.constant 2.000000e+00 : f32
    %1153 = vector.broadcast %cst_522 : f32 to vector<2x32xf32>
    %1154 = arith.mulf %1153, %1152 : vector<2x32xf32>
    %cst_523 = arith.constant 1.000000e+00 : f32
    %1155 = vector.broadcast %cst_523 : f32 to vector<2x32xf32>
    %1156 = arith.subf %1154, %1155 : vector<2x32xf32>
    %1157 = vector.extract_strided_slice %1149 {offsets = [0, 96], sizes = [2, 32], strides = [1, 1]} : vector<2x128xf32> to vector<2x32xf32>
    %1158 = arith.mulf %1151, %1098 : vector<2x32xf32>
    %1159 = arith.mulf %1150, %1156 : vector<2x32xf32>
    %1160 = arith.addf %1158, %1159 : vector<2x32xf32>
    %1161 = math.tanh %1160 : vector<2x32xf32>
    %1162 = arith.mulf %1157, %1161 : vector<2x32xf32>
    %1163 = arith.truncf %1100 : vector<2x32xf32> to vector<2x32xbf16>
    %c3_524 = arith.constant 3 : index
    %c0_525 = arith.constant 0 : index
    %c0_526 = arith.constant 0 : index
    %1164 = vector.load %arg4[%c3_524, %c0_525, %c0_526] : memref<4x32x128xbf16, #tpu.memory_space<vmem>>, vector<1x32x128xbf16>
    %1165 = vector.shape_cast %1164 : vector<1x32x128xbf16> to vector<32x128xbf16>
    %c3_527 = arith.constant 3 : index
    %c0_528 = arith.constant 0 : index
    %c0_529 = arith.constant 0 : index
    %1166 = vector.load %arg5[%c3_527, %c0_528, %c0_529] : memref<4x32x128xbf16, #tpu.memory_space<vmem>>, vector<1x32x128xbf16>
    %1167 = vector.shape_cast %1166 : vector<1x32x128xbf16> to vector<32x128xbf16>
    %c3_530 = arith.constant 3 : index
    %c0_531 = arith.constant 0 : index
    %c0_532 = arith.constant 0 : index
    %1168 = vector.load %arg6[%c3_530, %c0_531, %c0_532] : memref<4x1x128xf32, #tpu.memory_space<vmem>>, vector<1x1x128xf32>
    %1169 = vector.shape_cast %1168 : vector<1x1x128xf32> to vector<1x128xf32>
    %1170 = arith.truncf %1131 : vector<2x32xf32> to vector<2x32xbf16>
    %cst_533 = arith.constant dense<0.000000e+00> : vector<2x128xf32>
    %1171 = tpu.matmul %1170, %1167, %cst_533 {dimension_numbers = #tpu.dot_dimension_numbers<[1], [0], [0], [1], [0, 0, 1, 1], [], []>} : vector<2x32xbf16>, vector<32x128xbf16>, vector<2x128xf32> -> vector<2x128xf32>
    %cst_534 = arith.constant dense<0.000000e+00> : vector<2x128xf32>
    %1172 = tpu.matmul %1163, %1165, %cst_534 {dimension_numbers = #tpu.dot_dimension_numbers<[1], [0], [0], [1], [0, 0, 1, 1], [], []>} : vector<2x32xbf16>, vector<32x128xbf16>, vector<2x128xf32> -> vector<2x128xf32>
    %1173 = arith.addf %1171, %1172 : vector<2x128xf32>
    %1174 = vector.broadcast %1169 : vector<1x128xf32> to vector<2x128xf32>
    %1175 = arith.addf %1173, %1174 : vector<2x128xf32>
    %1176 = arith.negf %1175 : vector<2x128xf32>
    %1177 = math.exp %1176 : vector<2x128xf32>
    %cst_535 = arith.constant 1.000000e+00 : f32
    %1178 = vector.broadcast %cst_535 : f32 to vector<2x128xf32>
    %1179 = arith.addf %1178, %1177 : vector<2x128xf32>
    %1180 = arith.divf %1178, %1179 : vector<2x128xf32>
    %1181 = vector.extract_strided_slice %1180 {offsets = [0, 0], sizes = [2, 32], strides = [1, 1]} : vector<2x128xf32> to vector<2x32xf32>
    %1182 = vector.extract_strided_slice %1180 {offsets = [0, 32], sizes = [2, 32], strides = [1, 1]} : vector<2x128xf32> to vector<2x32xf32>
    %1183 = vector.extract_strided_slice %1180 {offsets = [0, 64], sizes = [2, 32], strides = [1, 1]} : vector<2x128xf32> to vector<2x32xf32>
    %cst_536 = arith.constant 2.000000e+00 : f32
    %1184 = vector.broadcast %cst_536 : f32 to vector<2x32xf32>
    %1185 = arith.mulf %1184, %1183 : vector<2x32xf32>
    %cst_537 = arith.constant 1.000000e+00 : f32
    %1186 = vector.broadcast %cst_537 : f32 to vector<2x32xf32>
    %1187 = arith.subf %1185, %1186 : vector<2x32xf32>
    %1188 = vector.extract_strided_slice %1180 {offsets = [0, 96], sizes = [2, 32], strides = [1, 1]} : vector<2x128xf32> to vector<2x32xf32>
    %1189 = arith.mulf %1182, %1129 : vector<2x32xf32>
    %1190 = arith.mulf %1181, %1187 : vector<2x32xf32>
    %1191 = arith.addf %1189, %1190 : vector<2x32xf32>
    %1192 = math.tanh %1191 : vector<2x32xf32>
    %1193 = arith.mulf %1188, %1192 : vector<2x32xf32>
    %1194 = arith.truncf %1162 : vector<2x32xf32> to vector<2x32xbf16>
    %c3_538 = arith.constant 3 : index
    %c0_539 = arith.constant 0 : index
    %c0_540 = arith.constant 0 : index
    %1195 = vector.load %arg4[%c3_538, %c0_539, %c0_540] : memref<4x32x128xbf16, #tpu.memory_space<vmem>>, vector<1x32x128xbf16>
    %1196 = vector.shape_cast %1195 : vector<1x32x128xbf16> to vector<32x128xbf16>
    %c3_541 = arith.constant 3 : index
    %c0_542 = arith.constant 0 : index
    %c0_543 = arith.constant 0 : index
    %1197 = vector.load %arg5[%c3_541, %c0_542, %c0_543] : memref<4x32x128xbf16, #tpu.memory_space<vmem>>, vector<1x32x128xbf16>
    %1198 = vector.shape_cast %1197 : vector<1x32x128xbf16> to vector<32x128xbf16>
    %c3_544 = arith.constant 3 : index
    %c0_545 = arith.constant 0 : index
    %c0_546 = arith.constant 0 : index
    %1199 = vector.load %arg6[%c3_544, %c0_545, %c0_546] : memref<4x1x128xf32, #tpu.memory_space<vmem>>, vector<1x1x128xf32>
    %1200 = vector.shape_cast %1199 : vector<1x1x128xf32> to vector<1x128xf32>
    %1201 = arith.truncf %1193 : vector<2x32xf32> to vector<2x32xbf16>
    %cst_547 = arith.constant dense<0.000000e+00> : vector<2x128xf32>
    %1202 = tpu.matmul %1201, %1198, %cst_547 {dimension_numbers = #tpu.dot_dimension_numbers<[1], [0], [0], [1], [0, 0, 1, 1], [], []>} : vector<2x32xbf16>, vector<32x128xbf16>, vector<2x128xf32> -> vector<2x128xf32>
    %cst_548 = arith.constant dense<0.000000e+00> : vector<2x128xf32>
    %1203 = tpu.matmul %1194, %1196, %cst_548 {dimension_numbers = #tpu.dot_dimension_numbers<[1], [0], [0], [1], [0, 0, 1, 1], [], []>} : vector<2x32xbf16>, vector<32x128xbf16>, vector<2x128xf32> -> vector<2x128xf32>
    %1204 = arith.addf %1202, %1203 : vector<2x128xf32>
    %1205 = vector.broadcast %1200 : vector<1x128xf32> to vector<2x128xf32>
    %1206 = arith.addf %1204, %1205 : vector<2x128xf32>
    %1207 = arith.negf %1206 : vector<2x128xf32>
    %1208 = math.exp %1207 : vector<2x128xf32>
    %cst_549 = arith.constant 1.000000e+00 : f32
    %1209 = vector.broadcast %cst_549 : f32 to vector<2x128xf32>
    %1210 = arith.addf %1209, %1208 : vector<2x128xf32>
    %1211 = arith.divf %1209, %1210 : vector<2x128xf32>
    %1212 = vector.extract_strided_slice %1211 {offsets = [0, 0], sizes = [2, 32], strides = [1, 1]} : vector<2x128xf32> to vector<2x32xf32>
    %1213 = vector.extract_strided_slice %1211 {offsets = [0, 32], sizes = [2, 32], strides = [1, 1]} : vector<2x128xf32> to vector<2x32xf32>
    %1214 = vector.extract_strided_slice %1211 {offsets = [0, 64], sizes = [2, 32], strides = [1, 1]} : vector<2x128xf32> to vector<2x32xf32>
    %cst_550 = arith.constant 2.000000e+00 : f32
    %1215 = vector.broadcast %cst_550 : f32 to vector<2x32xf32>
    %1216 = arith.mulf %1215, %1214 : vector<2x32xf32>
    %cst_551 = arith.constant 1.000000e+00 : f32
    %1217 = vector.broadcast %cst_551 : f32 to vector<2x32xf32>
    %1218 = arith.subf %1216, %1217 : vector<2x32xf32>
    %1219 = vector.extract_strided_slice %1211 {offsets = [0, 96], sizes = [2, 32], strides = [1, 1]} : vector<2x128xf32> to vector<2x32xf32>
    %1220 = arith.mulf %1213, %1191 : vector<2x32xf32>
    %1221 = arith.mulf %1212, %1218 : vector<2x32xf32>
    %1222 = arith.addf %1220, %1221 : vector<2x32xf32>
    %1223 = math.tanh %1222 : vector<2x32xf32>
    %1224 = arith.mulf %1219, %1223 : vector<2x32xf32>
    %c0_552 = arith.constant 0 : index
    %c0_553 = arith.constant 0 : index
    %1225 = vector.load %arg7[%c0_552, %c0_553] : memref<32x128xf32, #tpu.memory_space<vmem>>, vector<32x128xf32>
    %cst_554 = arith.constant dense<0.000000e+00> : vector<2x128xf32>
    %1226 = tpu.matmul %1224, %1225, %cst_554 {dimension_numbers = #tpu.dot_dimension_numbers<[1], [0], [0], [1], [0, 0, 1, 1], [], []>} : vector<2x32xf32>, vector<32x128xf32>, vector<2x128xf32> -> vector<2x128xf32>
    %c0_555 = arith.constant 0 : index
    %c0_556 = arith.constant 0 : index
    %1227 = vector.load %arg8[%c0_555, %c0_556] : memref<1x128xf32, #tpu.memory_space<vmem>>, vector<1x128xf32>
    %1228 = vector.broadcast %1227 : vector<1x128xf32> to vector<2x128xf32>
    %1229 = arith.addf %1226, %1228 : vector<2x128xf32>
    %c0_557 = arith.constant 0 : index
    %c0_558 = arith.constant 0 : index
    %1230 = vector.load %arg9[%c0_557, %c0_558] : memref<2x128xf32, #tpu.memory_space<vmem>>, vector<2x128xf32>
    tpu.vector_store %arg9[%c0_557, %c0_558], %1229 {strides = array<i32>} : memref<2x128xf32, #tpu.memory_space<vmem>>, vector<2x128xf32>,
    return
  }
}

</mosaic_0001>

<bundles_post_ra>
// kernel: mul.29
= control target key start
LH: loop header
LB: loop body
LE: loop exit
PB: predicated region body
PF: predicated region fallthrough
CT: control target
= control target key end

     0   :  { %3 = vsyncpa [#allocation1], 0  ;;  %s50_s11 = smov [#allocation0]   ;;  %s75_s0 = inlined_call_operand.hbm [shape: f32[1,128], index: 0, kind: input, shape index: {}]   ;;  %s76_s1 = inlined_call_operand.vmem [shape: f32[1,128], index: 1, kind: input, shape index: {}]   ;;  %s77_s2 = inlined_call_operand.vmem [shape: f32[1,128], index: 2, kind: output, shape index: {}]  }
   0x1   :  { %s7_s0 = sshll.u32 %s75_s0, 4  ;;  %s9_s12 = sshll.u32 %s50_s11, 4  ;;  %s8_s0 = int_to_ptr.hbm [resolvable:$true] %s7_s0  ;;  %s10_s12 = int_to_ptr.vmem [resolvable:$true] %s9_s12 }
   0x2   :  { %12 = dma.hbm_to_vmem [thread:$0]  %s8_s0, 16, %s10_s12, [#allocation1]  }
   0x3   :  { %48 = dma.done.wait [#allocation1], 16  }
   0x4   :  { %49 = vsyncadd [#allocation1], 4294967280  ;;  %v15_v0 = vld [vmem:[#allocation0] sm:$0x1] }
   0x5   :  { %v16_v1 = vld [vmem:[%s76_s1] sm:$0x1] }
   0x6   :  { %v19_v2 = vmul.f32 %v16_v1, %v15_v0 }
   0x8   :  { %21 = vst [vmem:[%s77_s2] sm:$0x1] %v19_v2 }
   0x9   :  { %22 = vsyncpa [#allocation1], 1 }

// kernel: lstm_model_forward.1
= control target key start
LH: loop header
LB: loop body
LE: loop exit
PB: predicated region body
PF: predicated region fallthrough
CT: control target
= control target key end

     0   :  { %vm48_vm0 = vcmask 130048   ;;  %s4893_s0 = inlined_call_operand.vmem [shape: bf16[8,2,16], index: 0, kind: input, shape index: {}]   ;;  %s4894_s1 = inlined_call_operand.vmem [shape: bf16[16,128], index: 1, kind: input, shape index: {}]   ;;  %s4895_s2 = inlined_call_operand.vmem [shape: bf16[32,128], index: 2, kind: input, shape index: {}]   ;;  %s4896_s3 = inlined_call_operand.vmem [shape: f32[1,128], index: 3, kind: input, shape index: {}]   ;;  %s4897_s4 = inlined_call_operand.vmem [shape: bf16[4,32,128], index: 4, kind: input, shape index: {}]   ;;  %s4898_s5 = inlined_call_operand.vmem [shape: bf16[4,32,128], index: 5, kind: input, shape index: {}]   ;;  %s4899_s6 = inlined_call_operand.vmem [shape: f32[4,1,128], index: 6, kind: input, shape index: {}]   ;;  %s4900_s7 = inlined_call_operand.vmem [shape: f32[32,128], index: 7, kind: input, shape index: {}]   ;;  %s4901_s8 = inlined_call_operand.vmem [shape: f32[1,128], index: 8, kind: input, shape index: {}]   ;;  %s4902_s9 = inlined_call_operand.hbm [shape: f32[2,128], index: 9, kind: output, shape index: {}]  }
   0x1   :  { %v3833_v0 = vld [vmem:[%s4894_s1] sm:$0xff]  ;;  %v3838_v1 = vld [vmem:[%s4895_s2 + $0x8] sm:$0xff] }
   0x2   :  { %v34_v2 = vld [vmem:[%s4893_s0] sm:$0x1]  ;;  %59 = vmatpush.bf16.msra.mxu0 %v3833_v0  ;;  %87 = vmatpush.bf16.msra.mxu1 %v3838_v1 }
   0x3   :  { %v3846_v3 = vld [vmem:[%s4895_s2] sm:$0xff]  ;;  %149 = vmatpush.bf16.msra.mxu2 %v3833_v0  ;;  %167 = vmatpush.bf16.msra.mxu3 %v3838_v1 }
   0x4   :  { %14 = vsyncpa [#allocation3], 0  ;;  %v3776_v4 = vmov 0   ;;  %v3862_v6 = vld [vmem:[%s4896_s3] ss:$0 sm:$0xff]  ;;  %s3777_s19 = smov 64  }
   0x5   :  { %3186 = vmatmul.msk.bf16.vlgmr.msra.gmra.mxu0 %vm48_vm0, %v34_v2  ;;  %s3778_s20 = smov 32   ;;  %v3197_v33 = vld [vmem:[%s4893_s0 + $0x1] sm:$0x1]  ;;  %v3877_v34 = vld [vmem:[%s4898_s5 + $0x8] sm:$0xff]  ;;  %vm77_vm5 = vcmask 261120   ;;  %s3779_s21 = smov [#allocation2]  }
   0x6   :  { %88 = vmatpush.bf16.msra.mxu1 %v3846_v3  ;;  %3198 = vmatmul.msk.bf16.vlgmr.msra.gmra.mxu2 %vm48_vm0, %v3197_v33  ;;  %v3883_v35 = vld [vmem:[%s4897_s4 + $0x8] sm:$0xff]  ;;  %v3889_v36 = vld [vmem:[%s4898_s5] sm:$0xff]  ;;  %s3171_s22 = sshll.u32 %s3779_s21, 4  ;;  %s3173_s25 = sshll.u32 %s4902_s9, 4  ;;  %s3172_s22 = int_to_ptr.vmem [resolvable:$true] %s3171_s22  ;;  %s3174_s25 = int_to_ptr.hbm [resolvable:$true] %s3173_s25 }
   0x7   :  { %168 = vmatpush.bf16.msra.mxu3 %v3846_v3  ;;  %265 = vmatpush.bf16.msrb.mxu2 %v3877_v34  ;;  %v3895_v37 = vld [vmem:[%s4897_s4] sm:$0xff] }
   0x8   :  { %240 = vmatpush.bf16.msrb.mxu0 %v3883_v35  ;;  %v3913_v46 = vld [vmem:[%s4899_s6] ss:$0 sm:$0xff] }
   0x9   :  { %89 = vmatmul.bf16.vlgmr.msra.gmra.mxu1 %v3776_v4 }
   0xa   :  { %327 = vmatpush.bf16.msrb.mxu1 %v3833_v0 }
   0xb   :  { %345 = vmatpush.bf16.msrb.mxu3 %v3838_v1  ;;  %266 = vmatpush.bf16.msrb.mxu2 %v3889_v36 }
   0xc   :  { %241 = vmatpush.bf16.msrb.mxu0 %v3895_v37 }
   0xf   :  { %346 = vmatpush.bf16.msrb.mxu3 %v3846_v3  ;;  %417 = vmatpush.bf16.msra.mxu2 %v3877_v34 }
  0x10   :  { %398 = vmatpush.bf16.msra.mxu0 %v3883_v35 }
  0x13   :  { %418 = vmatpush.bf16.msra.mxu2 %v3889_v36 }
  0x14   :  { %399 = vmatpush.bf16.msra.mxu0 %v3895_v37 }
  0x16   :  { %267 = vmatmul.bf16.vlgmr.msrb.gmra.mxu2 %v3776_v4 }
  0x17   :  { %598 = vmatpush.bf16.msrb.mxu2 %v3838_v1 }
  0x1b   :  { %599 = vmatpush.bf16.msrb.mxu2 %v3846_v3 }
  0x82   :  { %v61_v5 = vpop.f32.mrf.mxu0 }
  0x86   :  { %v90_v7 = vpop.f32.mrf.mxu1 }
  0x87   :  { %v91_v8 = vadd.f32 %v90_v7, %v61_v5 }
  0x89   :  { %v97_v9 = vadd.f32 %v3862_v6, %v91_v8  ;;  %v151_v41 = vpop.f32.mrf.mxu2 }
  0x8a   :  { %v63_v10 = vpop.f32.mrf.mxu0 }
  0x8b   :  { %v3195_v11 = vmul.f32 -1.442695, %v97_v9 }
  0x8d   :  { %3477 = vpow2.f32 %v3195_v11 }
  0x8e   :  { %v92_v12 = vpop.f32.mrf.mxu1 }
  0x91   :  { %v153_v42 = vpop.f32.mrf.mxu2 }
  0x93   :  { %v3478_v13 = vpop.eup %3477 }
  0x94   :  { %v101_v14 = vadd.f32 1.0, %v3478_v13 }
  0x96   :  { %3479 = vrcp.f32 %v101_v14  ;;  %v113_v18 = vand.u32 2147483648, %v101_v14  ;;  %v111_v20 = vand.u32 2147483647, %v101_v14  ;;  %vm107_vm2 = vweird.f32 %v101_v14 }
  0x98   :  { %v114_v22 = vor.u32 1.1754944e-38, %v113_v18  ;;  %vm112_vm4 = vcmp.eq.f32.partialorder %v111_v20, 8.507059e+37 }
  0x99   :  { %v268_v44 = vpop.f32.mrf.mxu2 }
  0x9c   :  { %v3480_v15 = vpop.eup %3479 }
  0x9d   :  { %v103_v16 = vmul.f32 %v3480_v15, %v101_v14  ;;  %vm108_vm1 = vweird.f32 %v3480_v15 }
  0x9e   :  { %vm109_vm3 = vmor %vm107_vm2, %vm108_vm1 }
  0x9f   :  { %v104_v17 = vsub.f32 1.0, %v103_v16 }
  0xa1   :  { %v105_v19 = vmul.f32 %v3480_v15, %v104_v17  ;;  %v270_v45 = vpop.f32.mrf.mxu2 }
  0xa2   :  { %v3221_v45 = vld [vmem:[%s4893_s0 + $0x2] sm:$0x1] }
  0xa3   :  { %v106_v21 = vadd.f32 %v3480_v15, %v105_v19  ;;  %3222 = vmatmul.msk.bf16.vlgmr.msrb.gmra.mxu1 %vm48_vm0, %v3221_v45 }
  0xa5   :  { %v110_v23 = vsel %vm109_vm3, %v3480_v15, %v106_v21 }
  0xa6   :  { %v115_v24 = vsel %vm112_vm4, %v114_v22, %v110_v23 }
  0xa7   :  { %v117_v25 = vmul.f32 2.0, %v115_v24  ;;  %v119_v29 = vmul.f32 0.0, %v115_v24 }
  0xa9   :  { %v3196_v26 = vadd.f32 -1.0, %v117_v25 }
  0xab   :  { %121 = vrot.lane.b32.xlu0 %v3196_v26, %s3777_s19 }
 0x11d   :  { %v122_v27 = vpop.permute.xlu0 %121 }
 0x11e   :  { %v124_v28 = vmul.f32 %v122_v27, %v115_v24 }
 0x120   :  { %126 = vrot.lane.b32.xlu0 %v124_v28, %s3778_s20 }
 0x192   :  { %v127_v30 = vpop.permute.xlu0 %126 }
 0x193   :  { %v3867_v31 = vadd.f32 %v127_v30, %v119_v29 }
 0x195   :  { %3481 = vtanh.f32 %v3867_v31 }
 0x19b   :  { %v3482_v32 = vpop.eup %3481 }
 0x19c   :  { %132 = vrot.lane.b32.xlu1 %v3482_v32, %s3777_s19 }
 0x20e   :  { %v133_v38 = vpop.permute.xlu1 %132 }
 0x20f   :  { %v135_v39 = vmul.f32 %v133_v38, %v115_v24 }
 0x211   :  { %v138_v40 = vpack.c.bf16 %v135_v39, %v135_v39 }
 0x213   :  { %156 = vrot.lane.b32.xlu1 %v138_v40, %s3778_s20 }
 0x285   :  { %v157_v43 = vpop.permute.xlu1 %156 }
 0x286   :  { %3199 = vmatmul.msk.bf16.vlgmr.msra.gmra.mxu3 %vm77_vm5, %v157_v43  ;;  %3210 = vmatmul.msk.bf16.vlgmr.msrb.gmra.mxu0 %vm77_vm5, %v157_v43 }
 0x287   :  { %580 = vmatpush.bf16.msrb.mxu0 %v3833_v0 }
 0x303   :  { %v243_v47 = vpop.f32.mrf.mxu0 }
 0x304   :  { %v269_v48 = vadd.f32 %v268_v44, %v243_v47 }
 0x306   :  { %v275_v49 = vadd.f32 %v3913_v46, %v269_v48 }
 0x308   :  { %v3219_v50 = vmul.f32 -1.442695, %v275_v49 }
 0x309   :  { %v170_v51 = vpop.f32.mrf.mxu3 }
 0x30a   :  { %3483 = vpow2.f32 %v3219_v50  ;;  %v171_v52 = vadd.f32 %v170_v51, %v151_v41  ;;  %v3939_v50 = vld [vmem:[%s4897_s4 + $0x18] sm:$0xff]  ;;  %v3945_v51 = vld [vmem:[%s4897_s4 + $0x10] sm:$0xff] }
 0x30b   :  { %v245_v53 = vpop.f32.mrf.mxu0  ;;  %493 = vmatpush.bf16.msra.mxu1 %v3939_v50 }
 0x30c   :  { %v174_v54 = vadd.f32 %v3862_v6, %v171_v52  ;;  %v3952_v52 = vld [vmem:[%s4898_s5 + $0x18] sm:$0xff]  ;;  %v3958_v53 = vld [vmem:[%s4898_s5 + $0x10] sm:$0xff] }
 0x30d   :  { %518 = vmatpush.bf16.msra.mxu3 %v3952_v52 }
 0x30e   :  { %v3200_v55 = vmul.f32 -1.442695, %v174_v54 }
 0x30f   :  { %494 = vmatpush.bf16.msra.mxu1 %v3945_v51 }
 0x310   :  { %v3484_v56 = vpop.eup %3483  ;;  %3485 = vpow2.f32 %v3200_v55 }
 0x311   :  { %v279_v57 = vadd.f32 1.0, %v3484_v56  ;;  %v172_v58 = vpop.f32.mrf.mxu3  ;;  %519 = vmatpush.bf16.msra.mxu3 %v3958_v53  ;;  %v329_v56 = vpop.f32.mrf.mxu1 }
 0x313   :  { %3487 = vrcp.f32 %v279_v57  ;;  %v291_v15 = vand.u32 2147483648, %v279_v57  ;;  %vm285_vm11 = vweird.f32 %v279_v57  ;;  %v289_v17 = vand.u32 2147483647, %v279_v57  ;;  %651 = vmatpush.bf16.msrb.mxu1 %v3883_v35 }
 0x315   :  { %v292_v21 = vor.u32 1.1754944e-38, %v291_v15  ;;  %vm290_vm13 = vcmp.eq.f32.partialorder %v289_v17, 8.507059e+37 }
 0x316   :  { %v3486_v59 = vpop.eup %3485 }
 0x317   :  { %v178_v60 = vadd.f32 1.0, %v3486_v59  ;;  %652 = vmatpush.bf16.msrb.mxu1 %v3895_v37 }
 0x319   :  { %v3488_v61 = vpop.eup %3487  ;;  %3489 = vrcp.f32 %v178_v60  ;;  %v190_v9 = vand.u32 2147483648, %v178_v60  ;;  %v188_v11 = vand.u32 2147483647, %v178_v60  ;;  %vm184_vm7 = vweird.f32 %v178_v60 }
 0x31a   :  { %v281_v62 = vmul.f32 %v3488_v61, %v279_v57  ;;  %vm286_vm8 = vweird.f32 %v3488_v61  ;;  %v331_v57 = vpop.f32.mrf.mxu1 }
 0x31b   :  { %v191_v14 = vor.u32 1.1754944e-38, %v190_v9  ;;  %vm189_vm10 = vcmp.eq.f32.partialorder %v188_v11, 8.507059e+37  ;;  %vm287_vm12 = vmor %vm285_vm11, %vm286_vm8 }
 0x31c   :  { %v282_v63 = vsub.f32 1.0, %v281_v62 }
 0x31e   :  { %v283_v8 = vmul.f32 %v3488_v61, %v282_v63 }
 0x31f   :  { %v3490_v2 = vpop.eup %3489 }
 0x320   :  { %v180_v5 = vmul.f32 %v3490_v2, %v178_v60  ;;  %vm185_vm6 = vweird.f32 %v3490_v2  ;;  %v284_v13 = vadd.f32 %v3488_v61, %v283_v8 }
 0x321   :  { %vm186_vm9 = vmor %vm184_vm7, %vm185_vm6 }
 0x322   :  { %v181_v7 = vsub.f32 1.0, %v180_v5  ;;  %v288_v20 = vsel %vm287_vm12, %v3488_v61, %v284_v13 }
 0x323   :  { %v293_v23 = vsel %vm290_vm13, %v292_v21, %v288_v20 }
 0x324   :  { %v182_v10 = vmul.f32 %v3490_v2, %v181_v7  ;;  %v295_v24 = vmul.f32 2.0, %v293_v23  ;;  %v297_v38 = vmul.f32 0.0, %v293_v23 }
 0x326   :  { %v183_v12 = vadd.f32 %v3490_v2, %v182_v10  ;;  %v3220_v25 = vadd.f32 -1.0, %v295_v24 }
 0x328   :  { %v187_v16 = vsel %vm186_vm9, %v3490_v2, %v183_v12 }
 0x329   :  { %v192_v18 = vsel %vm189_vm10, %v191_v14, %v187_v16  ;;  %v3978_v14 = vld [vmem:[%s4899_s6 + $0x1] ss:$0 sm:$0xff] }
 0x32a   :  { %v194_v19 = vmul.f32 2.0, %v192_v18  ;;  %v196_v30 = vmul.f32 %v192_v18, %v3867_v31 }
 0x32c   :  { %v3201_v22 = vadd.f32 -1.0, %v194_v19 }
 0x32e   :  { %198 = vrot.lane.b32.xlu2 %v3201_v22, %s3777_s19 }
 0x336   :  { %299 = vrot.lane.b32.xlu2 %v3220_v25, %s3777_s19 }
 0x388   :  { %v199_v26 = vpop.permute.xlu2 %198 }
 0x389   :  { %v201_v27 = vmul.f32 %v199_v26, %v192_v18 }
 0x38b   :  { %203 = vrot.lane.b32.xlu0 %v201_v27, %s3778_s20 }
 0x390   :  { %v300_v28 = vpop.permute.xlu2 %299 }
 0x391   :  { %v302_v29 = vmul.f32 %v300_v28, %v293_v23 }
 0x393   :  { %304 = vrot.lane.b32.xlu1 %v302_v29, %s3778_s20 }
 0x3fd   :  { %v204_v32 = vpop.permute.xlu0 %203 }
 0x3fe   :  { %v3922_v33 = vadd.f32 %v204_v32, %v196_v30 }
 0x400   :  { %3491 = vtanh.f32 %v3922_v33 }
 0x405   :  { %v305_v39 = vpop.permute.xlu1 %304 }
 0x406   :  { %v3492_v40 = vpop.eup %3491  ;;  %v3925_v41 = vadd.f32 %v305_v39, %v297_v38 }
 0x407   :  { %209 = vrot.lane.b32.xlu2 %v3492_v40, %s3777_s19 }
 0x408   :  { %3493 = vtanh.f32 %v3925_v41 }
 0x40e   :  { %v3494_v42 = vpop.eup %3493 }
 0x40f   :  { %310 = vrot.lane.b32.xlu0 %v3494_v42, %s3777_s19 }
 0x461   :  { %v210_v43 = vpop.permute.xlu2 %209 }
 0x462   :  { %v212_v44 = vmul.f32 %v210_v43, %v192_v18 }
 0x464   :  { %v316_v31 = vpack.c.bf16 %v212_v44, %v212_v44 }
 0x466   :  { %334 = vrot.lane.b32.xlu1 %v316_v31, %s3778_s20 }
 0x481   :  { %v311_v47 = vpop.permute.xlu0 %310 }
 0x482   :  { %v313_v48 = vmul.f32 %v311_v47, %v293_v23 }
 0x484   :  { %v391_v49 = vpack.c.bf16 %v313_v48, %v313_v48 }
 0x486   :  { %406 = vrot.lane.b32.xlu2 %v391_v49, %s3778_s20 }
 0x4d8   :  { %v335_v54 = vpop.permute.xlu1 %334 }
 0x4d9   :  { %3223 = vmatmul.msk.bf16.vlgmr.msrb.gmra.mxu3 %vm77_vm5, %v335_v54  ;;  %3226 = vmatmul.msk.bf16.vlgmr.msra.gmra.mxu0 %vm77_vm5, %v335_v54 }
 0x4da   :  { %670 = vmatpush.bf16.msrb.mxu3 %v3877_v34  ;;  %723 = vmatpush.bf16.msra.mxu0 %v3939_v50 }
 0x4de   :  { %671 = vmatpush.bf16.msrb.mxu3 %v3889_v36  ;;  %724 = vmatpush.bf16.msra.mxu0 %v3945_v51 }
 0x4e0   :  { %v407_v55 = vpop.permute.xlu2 %406 }
 0x4e1   :  { %3227 = vmatmul.msk.bf16.vlgmr.msra.gmra.mxu2 %vm77_vm5, %v407_v55  ;;  %3247 = vmatmul.msk.bf16.vlgmr.msra.gmra.mxu1 %vm77_vm5, %v407_v55 }
 0x4e2   :  { %742 = vmatpush.bf16.msra.mxu2 %v3952_v52 }
 0x4e6   :  { %743 = vmatpush.bf16.msra.mxu2 %v3958_v53 }
 0x4e9   :  { %520 = vmatmul.bf16.vlgmr.msra.gmra.mxu3 %v3776_v4 }
 0x556   :  { %v401_v58 = vpop.f32.mrf.mxu0 }
 0x55c   :  { %v348_v59 = vpop.f32.mrf.mxu3 }
 0x55d   :  { %v349_v60 = vadd.f32 %v348_v59, %v329_v56 }
 0x55e   :  { %v403_v61 = vpop.f32.mrf.mxu0  ;;  %v496_v62 = vpop.f32.mrf.mxu1 }
 0x55f   :  { %v352_v63 = vadd.f32 %v3862_v6, %v349_v60 }
 0x561   :  { %v3224_v2 = vmul.f32 -1.442695, %v352_v63 }
 0x563   :  { %3495 = vpow2.f32 %v3224_v2 }
 0x564   :  { %v350_v5 = vpop.f32.mrf.mxu3  ;;  %v420_v7 = vpop.f32.mrf.mxu2 }
 0x565   :  { %v421_v8 = vadd.f32 %v420_v7, %v401_v58 }
 0x566   :  { %v498_v9 = vpop.f32.mrf.mxu1 }
 0x567   :  { %v424_v10 = vadd.f32 %v3913_v46, %v421_v8 }
 0x569   :  { %v3496_v11 = vpop.eup %3495  ;;  %v3228_v12 = vmul.f32 -1.442695, %v424_v10 }
 0x56a   :  { %v356_v13 = vadd.f32 1.0, %v3496_v11 }
 0x56b   :  { %3497 = vpow2.f32 %v3228_v12 }
 0x56c   :  { %3499 = vrcp.f32 %v356_v13  ;;  %v422_v15 = vpop.f32.mrf.mxu2  ;;  %v521_v16 = vpop.f32.mrf.mxu3  ;;  %v368_v26 = vand.u32 2147483648, %v356_v13  ;;  %v366_v28 = vand.u32 2147483647, %v356_v13  ;;  %vm362_vm15 = vweird.f32 %v356_v13 }
 0x56d   :  { %v522_v17 = vadd.f32 %v521_v16, %v496_v62 }
 0x56e   :  { %v369_v39 = vor.u32 1.1754944e-38, %v368_v26  ;;  %vm367_vm2 = vcmp.eq.f32.partialorder %v366_v28, 8.507059e+37 }
 0x56f   :  { %v528_v18 = vadd.f32 %v3978_v14, %v522_v17 }
 0x571   :  { %v3498_v19 = vpop.eup %3497  ;;  %v3256_v20 = vmul.f32 -1.442695, %v528_v18 }
 0x572   :  { %v3500_v21 = vpop.eup %3499  ;;  %v428_v22 = vadd.f32 1.0, %v3498_v19 }
 0x573   :  { %v358_v23 = vmul.f32 %v3500_v21, %v356_v13  ;;  %3501 = vpow2.f32 %v3256_v20  ;;  %vm363_vm14 = vweird.f32 %v3500_v21 }
 0x574   :  { %3503 = vrcp.f32 %v428_v22  ;;  %v523_v24 = vpop.f32.mrf.mxu3  ;;  %vm364_vm1 = vmor %vm362_vm15, %vm363_vm14  ;;  %v440_v45 = vand.u32 2147483648, %v428_v22  ;;  %v438_v49 = vand.u32 2147483647, %v428_v22  ;;  %vm434_vm4 = vweird.f32 %v428_v22 }
 0x575   :  { %v359_v25 = vsub.f32 1.0, %v358_v23 }
 0x576   :  { %v441_v56 = vor.u32 1.1754944e-38, %v440_v45  ;;  %vm439_vm7 = vcmp.eq.f32.partialorder %v438_v49, 8.507059e+37  ;;  %v4033_v49 = vld [vmem:[%s4898_s5 + $0x20] sm:$0xff] }
 0x577   :  { %v360_v27 = vmul.f32 %v3500_v21, %v359_v25 }
 0x579   :  { %v3502_v29 = vpop.eup %3501  ;;  %v361_v30 = vadd.f32 %v3500_v21, %v360_v27 }
 0x57a   :  { %v3504_v32 = vpop.eup %3503  ;;  %v532_v38 = vadd.f32 1.0, %v3502_v29 }
 0x57b   :  { %v430_v40 = vmul.f32 %v3504_v32, %v428_v22  ;;  %v365_v42 = vsel %vm364_vm1, %v3500_v21, %v361_v30  ;;  %vm435_vm3 = vweird.f32 %v3504_v32 }
 0x57c   :  { %3505 = vrcp.f32 %v532_v38  ;;  %v3981_v43 = vsel %vm367_vm2, %v369_v39, %v365_v42  ;;  %vm436_vm6 = vmor %vm434_vm4, %vm435_vm3  ;;  %v544_v62 = vand.u32 2147483648, %v532_v38  ;;  %v542_v5 = vand.u32 2147483647, %v532_v38  ;;  %v3258_v39 = vld [vmem:[%s4893_s0 + $0x3] sm:$0x1] }
 0x57d   :  { %v431_v44 = vsub.f32 1.0, %v430_v40  ;;  %v372_v31 = vmul.f32 2.0, %v3981_v43  ;;  %vm538_vm9 = vweird.f32 %v532_v38  ;;  %v374_v24 = vmul.f32 %v3981_v43, %v3922_v33  ;;  %3259 = vmatmul.msk.bf16.vlgmr.msrb.gmra.mxu0 %vm48_vm0, %v3258_v39 }
 0x57e   :  { %v545_v8 = vor.u32 1.1754944e-38, %v544_v62  ;;  %vm543_vm11 = vcmp.eq.f32.partialorder %v542_v5, 8.507059e+37  ;;  %905 = vmatpush.bf16.msrb.mxu0 %v3833_v0  ;;  %v4022_v0 = vld [vmem:[%s4898_s5 + $0x28] sm:$0xff] }
 0x57f   :  { %v3225_v47 = vadd.f32 -1.0, %v372_v31  ;;  %v432_v48 = vmul.f32 %v3504_v32, %v431_v44  ;;  %843 = vmatpush.bf16.msra.mxu3 %v4022_v0 }
 0x581   :  { %376 = vrot.lane.b32.xlu0 %v3225_v47, %s3777_s19  ;;  %v433_v54 = vadd.f32 %v3504_v32, %v432_v48 }
 0x582   :  { %v3506_v55 = vpop.eup %3505 }
 0x583   :  { %v534_v57 = vmul.f32 %v3506_v55, %v532_v38  ;;  %v437_v58 = vsel %vm436_vm6, %v3504_v32, %v433_v54  ;;  %vm539_vm8 = vweird.f32 %v3506_v55  ;;  %v4039_v54 = vld [vmem:[%s4897_s4 + $0x20] sm:$0xff]  ;;  %844 = vmatpush.bf16.msra.mxu3 %v4033_v49 }
 0x584   :  { %v442_v59 = vsel %vm439_vm7, %v441_v56, %v437_v58  ;;  %vm540_vm10 = vmor %vm538_vm9, %vm539_vm8 }
 0x585   :  { %v535_v60 = vsub.f32 1.0, %v534_v57  ;;  %v444_v61 = vmul.f32 2.0, %v442_v59  ;;  %v446_v20 = vmul.f32 %v442_v59, %v3925_v41 }
 0x587   :  { %v3229_v63 = vadd.f32 -1.0, %v444_v61  ;;  %v536_v2 = vmul.f32 %v3506_v55, %v535_v60 }
 0x589   :  { %448 = vrot.lane.b32.xlu2 %v3229_v63, %s3777_s19  ;;  %v537_v7 = vadd.f32 %v3506_v55, %v536_v2 }
 0x58b   :  { %v541_v9 = vsel %vm540_vm10, %v3506_v55, %v537_v7 }
 0x58c   :  { %v546_v10 = vsel %vm543_vm11, %v545_v8, %v541_v9 }
 0x58d   :  { %v548_v11 = vmul.f32 2.0, %v546_v10  ;;  %v550_v41 = vmul.f32 0.0, %v546_v10 }
 0x58f   :  { %v3257_v12 = vadd.f32 -1.0, %v548_v11 }
 0x591   :  { %552 = vrot.lane.b32.xlu1 %v3257_v12, %s3777_s19 }
 0x5e3   :  { %v449_v13 = vpop.permute.xlu2 %448 }
 0x5e4   :  { %v451_v15 = vmul.f32 %v449_v13, %v442_v59 }
 0x5e6   :  { %453 = vrot.lane.b32.xlu2 %v451_v15, %s3778_s20 }
 0x5f3   :  { %v377_v16 = vpop.permute.xlu0 %376 }
 0x5f4   :  { %v379_v17 = vmul.f32 %v377_v16, %v3981_v43 }
 0x5f6   :  { %381 = vrot.lane.b32.xlu0 %v379_v17, %s3778_s20  ;;  %v4065_v17 = vld [vmem:[%s4899_s6 + $0x2] ss:$0 sm:$0xff] }
 0x5fa   :  { %v582_v55 = vpop.f32.mrf.mxu0 }
 0x602   :  { %v584_v56 = vpop.f32.mrf.mxu0 }
 0x603   :  { %v553_v18 = vpop.permute.xlu1 %552 }
 0x604   :  { %v555_v19 = vmul.f32 %v553_v18, %v546_v10 }
 0x606   :  { %557 = vrot.lane.b32.xlu1 %v555_v19, %s3778_s20 }
 0x640   :  { %v454_v21 = vpop.permute.xlu2 %453 }
 0x641   :  { %v3992_v22 = vadd.f32 %v454_v21, %v446_v20 }
 0x643   :  { %3507 = vtanh.f32 %v3992_v22 }
 0x649   :  { %v3508_v23 = vpop.eup %3507 }
 0x64a   :  { %459 = vrot.lane.b32.xlu2 %v3508_v23, %s3777_s19 }
 0x668   :  { %v382_v25 = vpop.permute.xlu0 %381 }
 0x669   :  { %v3998_v26 = vadd.f32 %v382_v25, %v374_v24 }
 0x66b   :  { %3509 = vtanh.f32 %v3998_v26 }
 0x671   :  { %v3510_v27 = vpop.eup %3509 }
 0x672   :  { %387 = vrot.lane.b32.xlu0 %v3510_v27, %s3777_s19 }
 0x678   :  { %v558_v28 = vpop.permute.xlu1 %557 }
 0x679   :  { %v4002_v29 = vadd.f32 %v558_v28, %v550_v41 }
 0x67b   :  { %3511 = vtanh.f32 %v4002_v29 }
 0x681   :  { %v3512_v30 = vpop.eup %3511 }
 0x682   :  { %563 = vrot.lane.b32.xlu1 %v3512_v30, %s3777_s19 }
 0x6a4   :  { %v460_v32 = vpop.permute.xlu2 %459 }
 0x6a5   :  { %v462_v38 = vmul.f32 %v460_v32, %v442_v59 }
 0x6a7   :  { %v644_v33 = vpack.c.bf16 %v462_v38, %v462_v38 }
 0x6a9   :  { %659 = vrot.lane.b32.xlu2 %v644_v33, %s3778_s20 }
 0x6e4   :  { %v388_v40 = vpop.permute.xlu0 %387 }
 0x6e5   :  { %v390_v42 = vmul.f32 %v388_v40, %v3981_v43  ;;  %v4027_v43 = vld [vmem:[%s4897_s4 + $0x28] sm:$0xff] }
 0x6e6   :  { %818 = vmatpush.bf16.msra.mxu1 %v4027_v43 }
 0x6e7   :  { %v569_v44 = vpack.c.bf16 %v390_v42, %v390_v42 }
 0x6e9   :  { %587 = vrot.lane.b32.xlu0 %v569_v44, %s3778_s20 }
 0x6ea   :  { %819 = vmatpush.bf16.msra.mxu1 %v4039_v54 }
 0x6f4   :  { %v564_v31 = vpop.permute.xlu1 %563 }
 0x6f5   :  { %v566_v45 = vmul.f32 %v564_v31, %v546_v10 }
 0x6f7   :  { %v716_v47 = vpack.c.bf16 %v566_v45, %v566_v45 }
 0x6f9   :  { %731 = vrot.lane.b32.xlu1 %v716_v47, %s3778_s20 }
 0x703   :  { %v660_v48 = vpop.permute.xlu2 %659 }
 0x704   :  { %3264 = vmatmul.msk.bf16.vlgmr.msrb.gmra.mxu3 %vm77_vm5, %v660_v48  ;;  %3267 = vmatmul.msk.bf16.vlgmr.msra.gmra.mxu0 %vm77_vm5, %v660_v48 }
 0x705   :  { %1048 = vmatpush.bf16.msra.mxu0 %v3939_v50  ;;  %995 = vmatpush.bf16.msrb.mxu3 %v3877_v34 }
 0x709   :  { %1049 = vmatpush.bf16.msra.mxu0 %v3945_v51  ;;  %996 = vmatpush.bf16.msrb.mxu3 %v3889_v36 }
 0x714   :  { %845 = vmatmul.bf16.vlgmr.msra.gmra.mxu3 %v3776_v4 }
 0x715   :  { %1139 = vmatpush.bf16.msra.mxu3 %v4022_v0 }
 0x719   :  { %1140 = vmatpush.bf16.msra.mxu3 %v4033_v49 }
 0x75b   :  { %v588_v57 = vpop.permute.xlu0 %587 }
 0x75c   :  { %3260 = vmatmul.msk.bf16.vlgmr.msrb.gmra.mxu2 %vm77_vm5, %v588_v57  ;;  %3263 = vmatmul.msk.bf16.vlgmr.msrb.gmra.mxu1 %vm77_vm5, %v588_v57 }
 0x75d   :  { %923 = vmatpush.bf16.msrb.mxu2 %v3838_v1  ;;  %976 = vmatpush.bf16.msrb.mxu1 %v3883_v35 }
 0x761   :  { %924 = vmatpush.bf16.msrb.mxu2 %v3846_v3  ;;  %977 = vmatpush.bf16.msrb.mxu1 %v3895_v37 }
 0x76b   :  { %v732_v58 = vpop.permute.xlu1 %731 }
 0x76c   :  { %3268 = vmatmul.msk.bf16.vlgmr.msra.gmra.mxu2 %vm77_vm5, %v732_v58  ;;  %3288 = vmatmul.msk.bf16.vlgmr.msra.gmra.mxu1 %vm77_vm5, %v732_v58 }
 0x76d   :  { %1067 = vmatpush.bf16.msra.mxu2 %v3952_v52  ;;  %1120 = vmatpush.bf16.msra.mxu1 %v4027_v43 }
 0x771   :  { %1068 = vmatpush.bf16.msra.mxu2 %v3958_v53  ;;  %1121 = vmatpush.bf16.msra.mxu1 %v4039_v54 }
 0x781   :  { %v726_v1 = vpop.f32.mrf.mxu0 }
 0x787   :  { %v673_v59 = vpop.f32.mrf.mxu3 }
 0x789   :  { %v728_v60 = vpop.f32.mrf.mxu0 }
 0x78f   :  { %v675_v61 = vpop.f32.mrf.mxu3 }
 0x797   :  { %v846_v3 = vpop.f32.mrf.mxu3 }
 0x79f   :  { %v848_v62 = vpop.f32.mrf.mxu3 }
 0x7d9   :  { %v654_v63 = vpop.f32.mrf.mxu1 }
 0x7da   :  { %v674_v2 = vadd.f32 %v673_v59, %v654_v63 }
 0x7dc   :  { %v677_v5 = vadd.f32 %v3913_v46, %v674_v2 }
 0x7de   :  { %v3265_v7 = vmul.f32 -1.442695, %v677_v5 }
 0x7df   :  { %v601_v8 = vpop.f32.mrf.mxu2 }
 0x7e0   :  { %3513 = vpow2.f32 %v3265_v7  ;;  %v602_v9 = vadd.f32 %v601_v8, %v582_v55 }
 0x7e1   :  { %v656_v10 = vpop.f32.mrf.mxu1 }
 0x7e2   :  { %v605_v11 = vadd.f32 %v3862_v6, %v602_v9 }
 0x7e4   :  { %v3261_v12 = vmul.f32 -1.442695, %v605_v11 }
 0x7e6   :  { %v3514_v13 = vpop.eup %3513  ;;  %3515 = vpow2.f32 %v3261_v12 }
 0x7e7   :  { %v681_v15 = vadd.f32 1.0, %v3514_v13  ;;  %v603_v16 = vpop.f32.mrf.mxu2 }
 0x7e9   :  { %3517 = vrcp.f32 %v681_v15  ;;  %v821_v18 = vpop.f32.mrf.mxu1  ;;  %v693_v38 = vand.u32 2147483648, %v681_v15  ;;  %v691_v40 = vand.u32 2147483647, %v681_v15  ;;  %vm687_vm13 = vweird.f32 %v681_v15 }
 0x7ea   :  { %v847_v19 = vadd.f32 %v846_v3, %v821_v18 }
 0x7eb   :  { %v694_v55 = vor.u32 1.1754944e-38, %v693_v38  ;;  %vm692_vm15 = vcmp.eq.f32.partialorder %v691_v40, 8.507059e+37 }
 0x7ec   :  { %v3516_v20 = vpop.eup %3515  ;;  %v853_v21 = vadd.f32 %v4065_v17, %v847_v19 }
 0x7ed   :  { %v609_v23 = vadd.f32 1.0, %v3516_v20 }
 0x7ee   :  { %v3297_v24 = vmul.f32 -1.442695, %v853_v21 }
 0x7ef   :  { %v3518_v25 = vpop.eup %3517  ;;  %3519 = vrcp.f32 %v609_v23  ;;  %v745_v6 = vpop.f32.mrf.mxu2  ;;  %v619_v61 = vand.u32 2147483647, %v609_v23  ;;  %vm615_vm2 = vweird.f32 %v609_v23 }
 0x7f0   :  { %v683_v27 = vmul.f32 %v3518_v25, %v681_v15  ;;  %3521 = vpow2.f32 %v3297_v24  ;;  %v746_v41 = vadd.f32 %v745_v6, %v726_v1  ;;  %vm688_vm12 = vweird.f32 %v3518_v25 }
 0x7f1   :  { %v823_v28 = vpop.f32.mrf.mxu1  ;;  %vm689_vm14 = vmor %vm687_vm13, %vm688_vm12  ;;  %v621_v1 = vand.u32 2147483648, %v609_v23  ;;  %vm620_vm4 = vcmp.eq.f32.partialorder %v619_v61, 8.507059e+37 }
 0x7f2   :  { %v684_v30 = vsub.f32 1.0, %v683_v27  ;;  %v749_v32 = vadd.f32 %v3978_v14, %v746_v41 }
 0x7f3   :  { %v622_v5 = vor.u32 1.1754944e-38, %v621_v1 }
 0x7f4   :  { %v3269_v33 = vmul.f32 -1.442695, %v749_v32  ;;  %v685_v39 = vmul.f32 %v3518_v25, %v684_v30 }
 0x7f5   :  { %v3520_v42 = vpop.eup %3519 }
 0x7f6   :  { %v3522_v44 = vpop.eup %3521  ;;  %v611_v31 = vmul.f32 %v3520_v42, %v609_v23  ;;  %3523 = vpow2.f32 %v3269_v33  ;;  %v686_v45 = vadd.f32 %v3518_v25, %v685_v39  ;;  %vm616_vm1 = vweird.f32 %v3520_v42 }
 0x7f7   :  { %v857_v47 = vadd.f32 1.0, %v3522_v44  ;;  %v747_v48 = vpop.f32.mrf.mxu2  ;;  %vm617_vm3 = vmor %vm615_vm2, %vm616_vm1 }
 0x7f8   :  { %v612_v56 = vsub.f32 1.0, %v611_v31  ;;  %v690_v57 = vsel %vm689_vm14, %v3518_v25, %v686_v45 }
 0x7f9   :  { %3525 = vrcp.f32 %v857_v47  ;;  %v4069_v58 = vsel %vm692_vm15, %v694_v55, %v690_v57  ;;  %v869_v15 = vand.u32 2147483648, %v857_v47  ;;  %v867_v18 = vand.u32 2147483647, %v857_v47 }
 0x7fa   :  { %v697_v59 = vmul.f32 2.0, %v4069_v58  ;;  %v613_v60 = vmul.f32 %v3520_v42, %v612_v56  ;;  %vm863_vm7 = vweird.f32 %v857_v47 }
 0x7fb   :  { %v870_v23 = vor.u32 1.1754944e-38, %v869_v15  ;;  %vm868_vm9 = vcmp.eq.f32.partialorder %v867_v18, 8.507059e+37 }
 0x7fc   :  { %v3524_v3 = vpop.eup %3523  ;;  %v3266_v62 = vadd.f32 -1.0, %v697_v59  ;;  %v614_v63 = vadd.f32 %v3520_v42, %v613_v60  ;;  %v699_v59 = vmul.f32 %v4069_v58, %v3992_v22 }
 0x7fd   :  { %v753_v2 = vadd.f32 1.0, %v3524_v3 }
 0x7fe   :  { %701 = vrot.lane.b32.xlu2 %v3266_v62, %s3777_s19  ;;  %v618_v7 = vsel %vm617_vm3, %v3520_v42, %v614_v63 }
 0x7ff   :  { %v3526_v8 = vpop.eup %3525  ;;  %3527 = vrcp.f32 %v753_v2  ;;  %v4073_v9 = vsel %vm620_vm4, %v622_v5, %v618_v7  ;;  %v765_v27 = vand.u32 2147483648, %v753_v2  ;;  %v763_v30 = vand.u32 2147483647, %v753_v2 }
 0x800   :  { %v859_v10 = vmul.f32 %v3526_v8, %v857_v47  ;;  %v625_v11 = vmul.f32 2.0, %v4073_v9  ;;  %vm864_vm6 = vweird.f32 %v3526_v8  ;;  %vm759_vm11 = vweird.f32 %v753_v2 }
 0x801   :  { %vm865_vm8 = vmor %vm863_vm7, %vm864_vm6  ;;  %v766_v33 = vor.u32 1.1754944e-38, %v765_v27  ;;  %vm764_vm13 = vcmp.eq.f32.partialorder %v763_v30, 8.507059e+37  ;;  %v627_v5 = vmul.f32 %v4073_v9, %v3998_v26  ;;  %v3299_v26 = vld [vmem:[%s4893_s0 + $0x4] sm:$0x1]  ;;  %v4138_v30 = vld [vmem:[%s4895_s2 + $0x8] sm:$0xff] }
 0x802   :  { %v860_v12 = vsub.f32 1.0, %v859_v10  ;;  %v3262_v13 = vadd.f32 -1.0, %v625_v11  ;;  %3300 = vmatmul.msk.bf16.vlgmr.msrb.gmra.mxu0 %vm48_vm0, %v3299_v26 }
 0x804   :  { %629 = vrot.lane.b32.xlu0 %v3262_v13, %s3777_s19  ;;  %v861_v16 = vmul.f32 %v3526_v8, %v860_v12 }
 0x805   :  { %v3528_v19 = vpop.eup %3527 }
 0x806   :  { %v755_v20 = vmul.f32 %v3528_v19, %v753_v2  ;;  %v862_v21 = vadd.f32 %v3526_v8, %v861_v16  ;;  %vm760_vm10 = vweird.f32 %v3528_v19 }
 0x807   :  { %vm761_vm12 = vmor %vm759_vm11, %vm760_vm10 }
 0x808   :  { %v756_v24 = vsub.f32 1.0, %v755_v20  ;;  %v866_v25 = vsel %vm865_vm8, %v3526_v8, %v862_v21 }
 0x809   :  { %v4077_v6 = vsel %vm868_vm9, %v870_v23, %v866_v25 }
 0x80a   :  { %v873_v41 = vmul.f32 2.0, %v4077_v6  ;;  %v757_v28 = vmul.f32 %v3528_v19, %v756_v24  ;;  %v875_v11 = vmul.f32 0.0, %v4077_v6 }
 0x80c   :  { %v3298_v32 = vadd.f32 -1.0, %v873_v41  ;;  %v758_v38 = vadd.f32 %v3528_v19, %v757_v28 }
 0x80e   :  { %877 = vrot.lane.b32.xlu0 %v3298_v32, %s3777_s19  ;;  %v762_v39 = vsel %vm761_vm12, %v3528_v19, %v758_v38  ;;  %v4145_v32 = vld [vmem:[%s4895_s2] sm:$0xff]  ;;  %v4153_v38 = vld [vmem:[%s4898_s5 + $0x38] sm:$0xff] }
 0x80f   :  { %v767_v40 = vsel %vm764_vm13, %v766_v33, %v762_v39 }
 0x810   :  { %v769_v42 = vmul.f32 2.0, %v767_v40  ;;  %v771_v62 = vmul.f32 %v767_v40, %v4002_v29 }
 0x812   :  { %v3270_v44 = vadd.f32 -1.0, %v769_v42 }
 0x814   :  { %773 = vrot.lane.b32.xlu1 %v3270_v44, %s3777_s19 }
 0x858   :  { %v702_v31 = vpop.permute.xlu2 %701 }
 0x859   :  { %v704_v45 = vmul.f32 %v702_v31, %v4069_v58 }
 0x85b   :  { %706 = vrot.lane.b32.xlu0 %v704_v45, %s3778_s20 }
 0x876   :  { %v630_v47 = vpop.permute.xlu0 %629 }
 0x877   :  { %v632_v48 = vmul.f32 %v630_v47, %v4073_v9 }
 0x879   :  { %634 = vrot.lane.b32.xlu1 %v632_v48, %s3778_s20 }
 0x87f   :  { %v907_v39 = vpop.f32.mrf.mxu0 }
 0x880   :  { %v878_v55 = vpop.permute.xlu0 %877 }
 0x881   :  { %v880_v56 = vmul.f32 %v878_v55, %v4077_v6 }
 0x883   :  { %882 = vrot.lane.b32.xlu1 %v880_v56, %s3778_s20 }
 0x886   :  { %v774_v57 = vpop.permute.xlu1 %773 }
 0x887   :  { %v776_v1 = vmul.f32 %v774_v57, %v767_v40 }
 0x889   :  { %778 = vrot.lane.b32.xlu2 %v776_v1, %s3778_s20 }
 0x8cd   :  { %v707_v60 = vpop.permute.xlu0 %706 }
 0x8ce   :  { %v4091_v61 = vadd.f32 %v707_v60, %v699_v59 }
 0x8d0   :  { %3529 = vtanh.f32 %v4091_v61 }
 0x8d6   :  { %v3530_v3 = vpop.eup %3529 }
 0x8d7   :  { %712 = vrot.lane.b32.xlu1 %v3530_v3, %s3777_s19 }
 0x8e3   :  { %v779_v63 = vpop.permute.xlu2 %778 }
 0x8e4   :  { %v4096_v2 = vadd.f32 %v779_v63, %v771_v62 }
 0x8e6   :  { %3531 = vtanh.f32 %v4096_v2 }
 0x8eb   :  { %v635_v7 = vpop.permute.xlu1 %634 }
 0x8ec   :  { %v3532_v22 = vpop.eup %3531  ;;  %v4101_v8 = vadd.f32 %v635_v7, %v627_v5 }
 0x8ed   :  { %784 = vrot.lane.b32.xlu0 %v3532_v22, %s3777_s19 }
 0x8ee   :  { %3533 = vtanh.f32 %v4101_v8 }
 0x8f4   :  { %v3534_v10 = vpop.eup %3533 }
 0x8f5   :  { %640 = vrot.lane.b32.xlu2 %v3534_v10, %s3777_s19  ;;  %v883_v29 = vpop.permute.xlu1 %882 }
 0x8f6   :  { %v4107_v12 = vadd.f32 %v883_v29, %v875_v11 }
 0x8f8   :  { %3535 = vtanh.f32 %v4107_v12 }
 0x8fe   :  { %v3536_v13 = vpop.eup %3535 }
 0x8ff   :  { %888 = vrot.lane.b32.xlu2 %v3536_v13, %s3777_s19 }
 0x949   :  { %v713_v15 = vpop.permute.xlu1 %712 }
 0x94a   :  { %v715_v16 = vmul.f32 %v713_v15, %v4069_v58  ;;  %v4125_v58 = vld [vmem:[%s4897_s4 + $0x38] sm:$0xff] }
 0x94b   :  { %1215 = vmatpush.bf16.msrb.mxu0 %v4125_v58 }
 0x94c   :  { %v969_v18 = vpack.c.bf16 %v715_v16, %v715_v16 }
 0x94e   :  { %984 = vrot.lane.b32.xlu2 %v969_v18, %s3778_s20 }
 0x94f   :  { %v641_v19 = vpop.permute.xlu2 %640 }
 0x950   :  { %v643_v20 = vmul.f32 %v641_v19, %v4073_v9 }
 0x952   :  { %v894_v21 = vpack.c.bf16 %v643_v20, %v643_v20 }
 0x954   :  { %912 = vrot.lane.b32.xlu0 %v894_v21, %s3778_s20 }
 0x959   :  { %v889_v23 = vpop.permute.xlu2 %888 }
 0x95a   :  { %v891_v24 = vmul.f32 %v889_v23, %v4077_v6  ;;  %v4133_v6 = vld [vmem:[%s4897_s4 + $0x30] sm:$0xff] }
 0x95b   :  { %1216 = vmatpush.bf16.msrb.mxu0 %v4133_v6 }
 0x95c   :  { %v1113_v25 = vpack.c.bf16 %v891_v24, %v891_v24 }
 0x95e   :  { %1128 = vrot.lane.b32.xlu0 %v1113_v25, %s3778_s20 }
 0x95f   :  { %v785_v27 = vpop.permute.xlu0 %784 }
 0x960   :  { %v787_v41 = vmul.f32 %v785_v27, %v767_v40  ;;  %v4161_v40 = vld [vmem:[%s4898_s5 + $0x30] sm:$0xff] }
 0x962   :  { %v1041_v28 = vpack.c.bf16 %v787_v41, %v787_v41 }
 0x964   :  { %1056 = vrot.lane.b32.xlu1 %v1041_v28, %s3778_s20 }
 0x9a8   :  { %v985_v9 = vpop.permute.xlu2 %984 }
 0x9a9   :  { %3305 = vmatmul.msk.bf16.vlgmr.msrb.gmra.mxu3 %vm77_vm5, %v985_v9  ;;  %3308 = vmatmul.msk.bf16.vlgmr.msra.gmra.mxu0 %vm77_vm5, %v985_v9 }
 0x9aa   :  { %1320 = vmatpush.bf16.msrb.mxu3 %v4138_v30  ;;  %1373 = vmatpush.bf16.msra.mxu0 %v3883_v35  ;;  %v4166_v35 = vld [vmem:[%s4894_s1] sm:$0xff] }
 0x9ae   :  { %1321 = vmatpush.bf16.msrb.mxu3 %v4145_v32  ;;  %1374 = vmatpush.bf16.msra.mxu0 %v3895_v37  ;;  %v909_v37 = vpop.f32.mrf.mxu0 }
 0x9c6   :  { %v913_v33 = vpop.permute.xlu0 %912 }
 0x9c7   :  { %3301 = vmatmul.msk.bf16.vlgmr.msrb.gmra.mxu2 %vm77_vm5, %v913_v33  ;;  %3304 = vmatmul.msk.bf16.vlgmr.msrb.gmra.mxu1 %vm77_vm5, %v913_v33 }
 0x9c8   :  { %1240 = vmatpush.bf16.msrb.mxu2 %v4153_v38  ;;  %1302 = vmatpush.bf16.msrb.mxu1 %v4166_v35 }
 0x9cc   :  { %1241 = vmatpush.bf16.msrb.mxu2 %v4161_v40 }
 0x9d0   :  { %v1129_v42 = vpop.permute.xlu0 %1128 }
 0x9d1   :  { %3313 = vmatmul.msk.bf16.vlgmr.msra.gmra.mxu3 %vm77_vm5, %v1129_v42  ;;  %3333 = vmatmul.msk.bf16.vlgmr.msrb.gmra.mxu0 %vm77_vm5, %v1129_v42 }
 0x9d2   :  { %1464 = vmatpush.bf16.msra.mxu3 %v3952_v52  ;;  %1517 = vmatpush.bf16.msrb.mxu0 %v4027_v43 }
 0x9d6   :  { %v1057_v44 = vpop.permute.xlu1 %1056  ;;  %1465 = vmatpush.bf16.msra.mxu3 %v3958_v53  ;;  %1518 = vmatpush.bf16.msrb.mxu0 %v4039_v54 }
 0x9d7   :  { %3309 = vmatmul.msk.bf16.vlgmr.msra.gmra.mxu2 %vm77_vm5, %v1057_v44  ;;  %3312 = vmatmul.msk.bf16.vlgmr.msra.gmra.mxu1 %vm77_vm5, %v1057_v44 }
 0x9d8   :  { %1392 = vmatpush.bf16.msra.mxu2 %v3877_v34  ;;  %1445 = vmatpush.bf16.msra.mxu1 %v3939_v50 }
 0x9dc   :  { %1393 = vmatpush.bf16.msra.mxu2 %v3889_v36  ;;  %1446 = vmatpush.bf16.msra.mxu1 %v3945_v51 }
 0x9e7   :  { %1242 = vmatmul.bf16.vlgmr.msrb.gmra.mxu2 %v3776_v4  ;;  %v4189_v4 = vld [vmem:[%s4896_s3] ss:$0 sm:$0xff] }
 0x9e8   :  { %1536 = vmatpush.bf16.msrb.mxu2 %v4022_v0 }
 0x9ec   :  { %1537 = vmatpush.bf16.msrb.mxu2 %v4033_v49 }
 0xa26   :  { %v1051_v52 = vpop.f32.mrf.mxu0 }
 0xa2c   :  { %v998_v53 = vpop.f32.mrf.mxu3 }
 0xa2e   :  { %v1053_v31 = vpop.f32.mrf.mxu0 }
 0xa34   :  { %v1000_v45 = vpop.f32.mrf.mxu3 }
 0xa44   :  { %v979_v47 = vpop.f32.mrf.mxu1 }
 0xa45   :  { %v999_v48 = vadd.f32 %v998_v53, %v979_v47 }
 0xa47   :  { %v1002_v34 = vadd.f32 %v3913_v46, %v999_v48 }
 0xa49   :  { %v3306_v55 = vmul.f32 -1.442695, %v1002_v34 }
 0xa4a   :  { %v926_v50 = vpop.f32.mrf.mxu2 }
 0xa4b   :  { %3537 = vpow2.f32 %v3306_v55  ;;  %v927_v36 = vadd.f32 %v926_v50, %v907_v39 }
 0xa4c   :  { %v981_v56 = vpop.f32.mrf.mxu1 }
 0xa4d   :  { %v930_v51 = vadd.f32 %v4189_v4, %v927_v36  ;;  %v4206_v36 = vld [vmem:[%s4899_s6 + $0x3] ss:$0 sm:$0xff] }
 0xa4e   :  { %v4192_v57 = vpop.f32.mrf.mxu0 }
 0xa4f   :  { %v3302_v1 = vmul.f32 -1.442695, %v930_v51 }
 0xa51   :  { %v3538_v59 = vpop.eup %3537  ;;  %3539 = vpow2.f32 %v3302_v1 }
 0xa52   :  { %v1006_v60 = vadd.f32 1.0, %v3538_v59  ;;  %v928_v3 = vpop.f32.mrf.mxu2 }
 0xa54   :  { %3541 = vrcp.f32 %v1006_v60  ;;  %v1123_v46 = vpop.f32.mrf.mxu1  ;;  %v1142_v62 = vpop.f32.mrf.mxu3  ;;  %v1018_v21 = vand.u32 2147483648, %v1006_v60  ;;  %v1016_v25 = vand.u32 2147483647, %v1006_v60  ;;  %vm1012_vm15 = vweird.f32 %v1006_v60 }
 0xa55   :  { %v1143_v63 = vadd.f32 %v1142_v62, %v1123_v46 }
 0xa56   :  { %v1220_v5 = vpop.f32.mrf.mxu0  ;;  %v1019_v37 = vor.u32 1.1754944e-38, %v1018_v21  ;;  %vm1017_vm2 = vcmp.eq.f32.partialorder %v1016_v25, 8.507059e+37 }
 0xa57   :  { %v3540_v7 = vpop.eup %3539  ;;  %v1146_v22 = vadd.f32 %v4065_v17, %v1143_v63 }
 0xa58   :  { %v934_v10 = vadd.f32 1.0, %v3540_v7 }
 0xa59   :  { %v3314_v11 = vmul.f32 -1.442695, %v1146_v22 }
 0xa5a   :  { %v3542_v29 = vpop.eup %3541  ;;  %3543 = vrcp.f32 %v934_v10  ;;  %v1070_v13 = vpop.f32.mrf.mxu2  ;;  %v944_v45 = vand.u32 2147483647, %v934_v10  ;;  %vm940_vm4 = vweird.f32 %v934_v10 }
 0xa5b   :  { %v1008_v26 = vmul.f32 %v3542_v29, %v1006_v60  ;;  %3545 = vpow2.f32 %v3314_v11  ;;  %v1071_v15 = vadd.f32 %v1070_v13, %v1051_v52  ;;  %vm1013_vm14 = vweird.f32 %v3542_v29 }
 0xa5c   :  { %v1125_v16 = vpop.f32.mrf.mxu1  ;;  %v1144_v18 = vpop.f32.mrf.mxu3  ;;  %vm1014_vm1 = vmor %vm1012_vm15, %vm1013_vm14  ;;  %v946_v52 = vand.u32 2147483648, %v934_v10  ;;  %vm945_vm7 = vcmp.eq.f32.partialorder %v944_v45, 8.507059e+37 }
 0xa5d   :  { %v1009_v19 = vsub.f32 1.0, %v1008_v26  ;;  %v1074_v20 = vadd.f32 %v3978_v14, %v1071_v15 }
 0xa5e   :  { %v947_v50 = vor.u32 1.1754944e-38, %v946_v52 }
 0xa5f   :  { %v3310_v23 = vmul.f32 -1.442695, %v1074_v20  ;;  %v1010_v24 = vmul.f32 %v3542_v29, %v1009_v19 }
 0xa60   :  { %v3544_v27 = vpop.eup %3543 }
 0xa61   :  { %v3546_v41 = vpop.eup %3545  ;;  %v936_v28 = vmul.f32 %v3544_v27, %v934_v10  ;;  %3547 = vpow2.f32 %v3310_v23  ;;  %v1011_v9 = vadd.f32 %v3542_v29, %v1010_v24  ;;  %vm941_vm3 = vweird.f32 %v3544_v27 }
 0xa62   :  { %v4196_v33 = vadd.f32 1.0, %v3546_v41  ;;  %v1072_v39 = vpop.f32.mrf.mxu2  ;;  %vm942_vm6 = vmor %vm940_vm4, %vm941_vm3 }
 0xa63   :  { %v937_v42 = vsub.f32 1.0, %v936_v28  ;;  %v1015_v44 = vsel %vm1014_vm1, %v3542_v29, %v1011_v9 }
 0xa64   :  { %3549 = vrcp.f32 %v4196_v33  ;;  %v4199_v14 = vsel %vm1017_vm2, %v1019_v37, %v1015_v44  ;;  %v1162_v23 = vand.u32 2147483648, %v4196_v33  ;;  %vm1156_vm13 = vweird.f32 %v4196_v33 }
 0xa65   :  { %v1022_v53 = vmul.f32 2.0, %v4199_v14  ;;  %v938_v31 = vmul.f32 %v3544_v27, %v937_v42  ;;  %v1160_v25 = vand.u32 2147483647, %v4196_v33 }
 0xa66   :  { %v1163_v9 = vor.u32 1.1754944e-38, %v1162_v23 }
 0xa67   :  { %v3548_v47 = vpop.eup %3547  ;;  %v3307_v48 = vadd.f32 -1.0, %v1022_v53  ;;  %v939_v34 = vadd.f32 %v3544_v27, %v938_v31  ;;  %vm1161_vm15 = vcmp.eq.f32.partialorder %v1160_v25, 8.507059e+37 }
 0xa68   :  { %v1078_v55 = vadd.f32 1.0, %v3548_v47 }
 0xa69   :  { %1026 = vrot.lane.b32.xlu0 %v3307_v48, %s3777_s19  ;;  %v943_v56 = vsel %vm942_vm6, %v3544_v27, %v939_v34 }
 0xa6a   :  { %v3550_v51 = vpop.eup %3549  ;;  %3551 = vrcp.f32 %v1078_v55  ;;  %v1243_v1 = vpop.f32.mrf.mxu2  ;;  %v4208_v59 = vsel %vm945_vm7, %v947_v50, %v943_v56  ;;  %v1090_v26 = vand.u32 2147483648, %v1078_v55  ;;  %v1088_v16 = vand.u32 2147483647, %v1078_v55 }
 0xa6b   :  { %v1152_v60 = vmul.f32 %v3550_v51, %v4196_v33  ;;  %v1244_v3 = vadd.f32 %v1243_v1, %v4192_v57  ;;  %v950_v46 = vmul.f32 2.0, %v4208_v59  ;;  %vm1084_vm9 = vweird.f32 %v1078_v55 }
 0xa6c   :  { %vm1157_vm10 = vweird.f32 %v3550_v51  ;;  %v1091_v21 = vor.u32 1.1754944e-38, %v1090_v26  ;;  %vm1089_vm12 = vcmp.eq.f32.partialorder %v1088_v16, 8.507059e+37 }
 0xa6d   :  { %v1250_v62 = vadd.f32 %v4206_v36, %v1244_v3  ;;  %v3303_v63 = vadd.f32 -1.0, %v950_v46  ;;  %v1153_v5 = vsub.f32 1.0, %v1152_v60  ;;  %vm1158_vm14 = vmor %vm1156_vm13, %vm1157_vm10 }
 0xa6f   :  { %v3342_v7 = vmul.f32 -1.442695, %v1250_v62  ;;  %954 = vrot.lane.b32.xlu1 %v3303_v63, %s3777_s19  ;;  %v1154_v13 = vmul.f32 %v3550_v51, %v1153_v5 }
 0xa70   :  { %v3552_v22 = vpop.eup %3551 }
 0xa71   :  { %v1080_v10 = vmul.f32 %v3552_v22, %v1078_v55  ;;  %3553 = vpow2.f32 %v3342_v7  ;;  %vm1085_vm8 = vweird.f32 %v3552_v22  ;;  %v1155_v19 = vadd.f32 %v3550_v51, %v1154_v13 }
 0xa72   :  { %v1245_v11 = vpop.f32.mrf.mxu2  ;;  %vm1086_vm11 = vmor %vm1084_vm9, %vm1085_vm8 }
 0xa73   :  { %v1081_v29 = vsub.f32 1.0, %v1080_v10  ;;  %v1159_v28 = vsel %vm1158_vm14, %v3550_v51, %v1155_v19  ;;  %v1024_v11 = vmul.f32 %v4199_v14, %v4091_v61 }
 0xa74   :  { %v4221_v37 = vsel %vm1161_vm15, %v1163_v9, %v1159_v28 }
 0xa75   :  { %v1082_v15 = vmul.f32 %v3552_v22, %v1081_v29  ;;  %v1166_v52 = vmul.f32 2.0, %v4221_v37  ;;  %v1168_v61 = vmul.f32 %v4221_v37, %v4107_v12 }
 0xa77   :  { %v3554_v57 = vpop.eup %3553  ;;  %v1083_v18 = vadd.f32 %v3552_v22, %v1082_v15  ;;  %v3315_v31 = vadd.f32 -1.0, %v1166_v52 }
 0xa78   :  { %v1254_v20 = vadd.f32 1.0, %v3554_v57 }
 0xa79   :  { %v1087_v24 = vsel %vm1086_vm11, %v3552_v22, %v1083_v18  ;;  %v952_v18 = vmul.f32 %v4208_v59, %v4101_v8 }
 0xa7a   :  { %3555 = vrcp.f32 %v1254_v20  ;;  %v4218_v27 = vsel %vm1089_vm12, %v1091_v21, %v1087_v24  ;;  %v1266_v33 = vand.u32 2147483648, %v1254_v20  ;;  %v1264_v47 = vand.u32 2147483647, %v1254_v20 }
 0xa7b   :  { %v1094_v41 = vmul.f32 2.0, %v4218_v27  ;;  %vm1260_vm2 = vweird.f32 %v1254_v20  ;;  %v1096_v15 = vmul.f32 %v4218_v27, %v4096_v2 }
 0xa7c   :  { %v1267_v34 = vor.u32 1.1754944e-38, %v1266_v33  ;;  %vm1265_vm4 = vcmp.eq.f32.partialorder %v1264_v47, 8.507059e+37  ;;  %v3344_v33 = vld [vmem:[%s4893_s0 + $0x5] sm:$0x1] }
 0xa7d   :  { %v3311_v39 = vadd.f32 -1.0, %v1094_v41  ;;  %3345 = vmatmul.msk.bf16.vlgmr.msrb.gmra.mxu1 %vm48_vm0, %v3344_v33 }
 0xa7e   :  { %1589 = vmatpush.bf16.msrb.mxu1 %v4125_v58 }
 0xa7f   :  { %1098 = vrot.lane.b32.xlu2 %v3311_v39, %s3777_s19 }
 0xa80   :  { %v3556_v42 = vpop.eup %3555 }
 0xa81   :  { %v1256_v44 = vmul.f32 %v3556_v42, %v1254_v20  ;;  %vm1261_vm1 = vweird.f32 %v3556_v42 }
 0xa82   :  { %vm1262_vm3 = vmor %vm1260_vm2, %vm1261_vm1  ;;  %1590 = vmatpush.bf16.msrb.mxu1 %v4133_v6 }
 0xa83   :  { %v1257_v53 = vsub.f32 1.0, %v1256_v44 }
 0xa85   :  { %v1258_v45 = vmul.f32 %v3556_v42, %v1257_v53 }
 0xa87   :  { %1170 = vrot.lane.b32.xlu2 %v3315_v31, %s3777_s19  ;;  %v1259_v48 = vadd.f32 %v3556_v42, %v1258_v45 }
 0xa89   :  { %v1263_v55 = vsel %vm1262_vm3, %v3556_v42, %v1259_v48 }
 0xa8a   :  { %v4226_v50 = vsel %vm1265_vm4, %v1267_v34, %v1263_v55 }
 0xa8b   :  { %v1270_v56 = vmul.f32 2.0, %v4226_v50  ;;  %v1272_v8 = vmul.f32 0.0, %v4226_v50 }
 0xa8d   :  { %v3343_v51 = vadd.f32 -1.0, %v1270_v56 }
 0xa8f   :  { %1274 = vrot.lane.b32.xlu1 %v3343_v51, %s3777_s19 }
 0xad9   :  { %v1099_v1 = vpop.permute.xlu2 %1098 }
 0xada   :  { %v1101_v60 = vmul.f32 %v1099_v1, %v4218_v27 }
 0xadb   :  { %v1027_v3 = vpop.permute.xlu0 %1026 }
 0xadc   :  { %v1029_v46 = vmul.f32 %v1027_v3, %v4199_v14  ;;  %1103 = vrot.lane.b32.xlu1 %v1101_v60, %s3778_s20 }
 0xade   :  { %1031 = vrot.lane.b32.xlu2 %v1029_v46, %s3778_s20  ;;  %v4311_v46 = vld [vmem:[%s4898_s5 + $0x18] sm:$0xff] }
 0xae1   :  { %v955_v62 = vpop.permute.xlu1 %954  ;;  %v1171_v63 = vpop.permute.xlu2 %1170 }
 0xae2   :  { %v957_v5 = vmul.f32 %v955_v62, %v4208_v59  ;;  %v1173_v7 = vmul.f32 %v1171_v63, %v4221_v37  ;;  %v4318_v62 = vld [vmem:[%s4898_s5 + $0x10] sm:$0xff]  ;;  %v4327_v63 = vld [vmem:[%s4898_s5 + $0x8] sm:$0xff] }
 0xae4   :  { %959 = vrot.lane.b32.xlu0 %v957_v5, %s3778_s20  ;;  %1175 = vrot.lane.b32.xlu1 %v1173_v7, %s3778_s20  ;;  %v4345_v7 = vld [vmem:[%s4897_s4 + $0x10] sm:$0xff] }
 0xafa   :  { %v1304_v3 = vpop.f32.mrf.mxu1 }
 0xb01   :  { %v1275_v22 = vpop.permute.xlu1 %1274 }
 0xb02   :  { %v1277_v10 = vmul.f32 %v1275_v22, %v4226_v50  ;;  %v1306_v5 = vpop.f32.mrf.mxu1 }
 0xb04   :  { %1279 = vrot.lane.b32.xlu0 %v1277_v10, %s3778_s20 }
 0xb38   :  { %v1032_v29 = vpop.permute.xlu2 %1031 }
 0xb39   :  { %v4242_v13 = vadd.f32 %v1032_v29, %v1024_v11 }
 0xb3b   :  { %3557 = vtanh.f32 %v4242_v13 }
 0xb41   :  { %v3558_v26 = vpop.eup %3557 }
 0xb42   :  { %1037 = vrot.lane.b32.xlu1 %v3558_v26, %s3777_s19 }
 0xb4e   :  { %v1104_v16 = vpop.permute.xlu1 %1103 }
 0xb4f   :  { %v4248_v57 = vadd.f32 %v1104_v16, %v1096_v15  ;;  %v4354_v16 = vld [vmem:[%s4899_s6] ss:$0 sm:$0xff] }
 0xb51   :  { %3559 = vtanh.f32 %v4248_v57 }
 0xb56   :  { %v960_v19 = vpop.permute.xlu0 %959  ;;  %v1176_v20 = vpop.permute.xlu1 %1175 }
 0xb57   :  { %v3560_v21 = vpop.eup %3559  ;;  %v4255_v23 = vadd.f32 %v960_v19, %v952_v18  ;;  %v4257_v24 = vadd.f32 %v1176_v20, %v1168_v61 }
 0xb58   :  { %1109 = vrot.lane.b32.xlu0 %v3560_v21, %s3777_s19 }
 0xb59   :  { %3561 = vtanh.f32 %v4255_v23 }
 0xb5a   :  { %3563 = vtanh.f32 %v4257_v24 }
 0xb5f   :  { %v3562_v2 = vpop.eup %3561 }
 0xb60   :  { %v3564_v25 = vpop.eup %3563  ;;  %965 = vrot.lane.b32.xlu2 %v3562_v2, %s3777_s19 }
 0xb61   :  { %1181 = vrot.lane.b32.xlu0 %v3564_v25, %s3777_s19 }
 0xb76   :  { %v1280_v12 = vpop.permute.xlu0 %1279 }
 0xb77   :  { %v4265_v41 = vadd.f32 %v1280_v12, %v1272_v8 }
 0xb79   :  { %3565 = vtanh.f32 %v4265_v41 }
 0xb7f   :  { %v3566_v28 = vpop.eup %3565 }
 0xb80   :  { %1285 = vrot.lane.b32.xlu2 %v3566_v28, %s3777_s19 }
 0xbb4   :  { %v1038_v9 = vpop.permute.xlu1 %1037 }
 0xbb5   :  { %v1040_v39 = vmul.f32 %v1038_v9, %v4199_v14 }
 0xbb7   :  { %v1366_v42 = vpack.c.bf16 %v1040_v39, %v1040_v39 }
 0xbb9   :  { %1381 = vrot.lane.b32.xlu0 %v1366_v42, %s3778_s20 }
 0xbba   :  { %v966_v44 = vpop.permute.xlu2 %965 }
 0xbbb   :  { %v968_v52 = vmul.f32 %v966_v44, %v4208_v59 }
 0xbbd   :  { %v1291_v53 = vpack.c.bf16 %v968_v52, %v968_v52 }
 0xbbf   :  { %1309 = vrot.lane.b32.xlu1 %v1291_v53, %s3778_s20 }
 0xbca   :  { %v1110_v14 = vpop.permute.xlu0 %1109 }
 0xbcb   :  { %v1112_v31 = vmul.f32 %v1110_v14, %v4218_v27  ;;  %v4291_v27 = vld [vmem:[%s4897_s4 + $0x8] sm:$0xff] }
 0xbcd   :  { %v1438_v45 = vpack.c.bf16 %v1112_v31, %v1112_v31 }
 0xbcf   :  { %1453 = vrot.lane.b32.xlu2 %v1438_v45, %s3778_s20 }
 0xbd3   :  { %v1182_v59 = vpop.permute.xlu0 %1181 }
 0xbd4   :  { %v1184_v47 = vmul.f32 %v1182_v59, %v4221_v37 }
 0xbd6   :  { %v1510_v48 = vpack.c.bf16 %v1184_v47, %v1184_v47 }
 0xbd8   :  { %1525 = vrot.lane.b32.xlu2 %v1510_v48, %s3778_s20 }
 0xbda   :  { %v1286_v34 = vpop.permute.xlu2 %1285 }
 0xbdb   :  { %v1288_v55 = vmul.f32 %v1286_v34, %v4226_v50  ;;  %v4298_v50 = vld [vmem:[%s4897_s4] sm:$0xff] }
 0xbdd   :  { %v1582_v56 = vpack.c.bf16 %v1288_v55, %v1288_v55 }
 0xbdf   :  { %1597 = vrot.lane.b32.xlu1 %v1582_v56, %s3778_s20  ;;  %v4364_v56 = vld [vmem:[%s4899_s6 + $0x1] ss:$0 sm:$0xff] }
 0xc29   :  { %v1454_v37 = vpop.permute.xlu2 %1453 }
 0xc2b   :  { %v1382_v51 = vpop.permute.xlu0 %1381 }
 0xc2c   :  { %3350 = vmatmul.msk.bf16.vlgmr.msra.gmra.mxu2 %vm77_vm5, %v1382_v51  ;;  %3353 = vmatmul.msk.bf16.vlgmr.msra.gmra.mxu1 %vm77_vm5, %v1382_v51 }
 0xc2d   :  { %1685 = vmatpush.bf16.msra.mxu2 %v4138_v30  ;;  %1738 = vmatpush.bf16.msra.mxu1 %v4291_v27 }
 0xc31   :  { %v1310_v1 = vpop.permute.xlu1 %1309  ;;  %1686 = vmatpush.bf16.msra.mxu2 %v4145_v32  ;;  %1739 = vmatpush.bf16.msra.mxu1 %v4298_v50 }
 0xc32   :  { %3346 = vmatmul.msk.bf16.vlgmr.msrb.gmra.mxu3 %vm77_vm5, %v1310_v1  ;;  %3349 = vmatmul.msk.bf16.vlgmr.msra.gmra.mxu0 %vm77_vm5, %v1310_v1  ;;  %v1526_v60 = vpop.permute.xlu2 %1525 }
 0xc33   :  { %1608 = vmatpush.bf16.msrb.mxu3 %v4153_v38  ;;  %1667 = vmatpush.bf16.msra.mxu0 %v4166_v35 }
 0xc37   :  { %1609 = vmatpush.bf16.msrb.mxu3 %v4161_v40 }
 0xc3c   :  { %3358 = vmatmul.msk.bf16.vlgmr.msrb.gmra.mxu2 %vm77_vm5, %v1526_v60  ;;  %3361 = vmatmul.msk.bf16.vlgmr.msrb.gmra.mxu1 %vm77_vm5, %v1526_v60 }
 0xc3d   :  { %1829 = vmatpush.bf16.msrb.mxu2 %v4311_v46  ;;  %1882 = vmatpush.bf16.msrb.mxu1 %v4027_v43  ;;  %v4333_v43 = vld [vmem:[%s4897_s4 + $0x18] sm:$0xff] }
 0xc41   :  { %1830 = vmatpush.bf16.msrb.mxu2 %v4318_v62  ;;  %1883 = vmatpush.bf16.msrb.mxu1 %v4039_v54  ;;  %v4339_v54 = vld [vmem:[%s4898_s5] sm:$0xff] }
 0xc42   :  { %3354 = vmatmul.msk.bf16.vlgmr.msra.gmra.mxu3 %vm77_vm5, %v1454_v37  ;;  %3357 = vmatmul.msk.bf16.vlgmr.msrb.gmra.mxu0 %vm77_vm5, %v1454_v37 }
 0xc43   :  { %1757 = vmatpush.bf16.msra.mxu3 %v4327_v63  ;;  %1810 = vmatpush.bf16.msrb.mxu0 %v4333_v43 }
 0xc47   :  { %1758 = vmatpush.bf16.msra.mxu3 %v4339_v54  ;;  %1811 = vmatpush.bf16.msrb.mxu0 %v4345_v7 }
 0xc51   :  { %v1598_v22 = vpop.permute.xlu1 %1597 }
 0xc52   :  { %3362 = vmatmul.msk.bf16.vlgmr.msrb.gmra.mxu3 %vm77_vm5, %v1598_v22 }
 0xc53   :  { %1901 = vmatpush.bf16.msrb.mxu3 %v4022_v0 }
 0xc57   :  { %1902 = vmatpush.bf16.msrb.mxu3 %v4033_v49 }
 0xca9   :  { %v1448_v10 = vpop.f32.mrf.mxu1 }
 0xcaf   :  { %v1376_v11 = vpop.f32.mrf.mxu0  ;;  %v1395_v29 = vpop.f32.mrf.mxu2 }
 0xcb0   :  { %v1396_v26 = vadd.f32 %v1395_v29, %v1376_v11 }
 0xcb1   :  { %v1450_v15 = vpop.f32.mrf.mxu1 }
 0xcb2   :  { %v1399_v18 = vadd.f32 %v4354_v16, %v1396_v26 }
 0xcb4   :  { %v3351_v61 = vmul.f32 -1.442695, %v1399_v18 }
 0xcb5   :  { %v1323_v19 = vpop.f32.mrf.mxu3 }
 0xcb6   :  { %3567 = vpow2.f32 %v3351_v61  ;;  %v1324_v20 = vadd.f32 %v1323_v19, %v1304_v3 }
 0xcb7   :  { %v1378_v21 = vpop.f32.mrf.mxu0  ;;  %v1397_v0 = vpop.f32.mrf.mxu2 }
 0xcb8   :  { %v1327_v49 = vadd.f32 %v4189_v4, %v1324_v20 }
 0xcb9   :  { %v4358_v2 = vpop.f32.mrf.mxu1 }
 0xcba   :  { %v3347_v25 = vmul.f32 -1.442695, %v1327_v49 }
 0xcbc   :  { %v3568_v8 = vpop.eup %3567  ;;  %3569 = vpow2.f32 %v3347_v25 }
 0xcbd   :  { %v1403_v12 = vadd.f32 1.0, %v3568_v8  ;;  %v1325_v28 = vpop.f32.mrf.mxu3 }
 0xcbf   :  { %3571 = vrcp.f32 %v1403_v12  ;;  %v1520_v9 = vpop.f32.mrf.mxu0  ;;  %v1539_v39 = vpop.f32.mrf.mxu2  ;;  %v1415_v37 = vand.u32 2147483648, %v1403_v12  ;;  %v1413_v60 = vand.u32 2147483647, %v1403_v12  ;;  %vm1409_vm7 = vweird.f32 %v1403_v12 }
 0xcc0   :  { %v1540_v42 = vadd.f32 %v1539_v39, %v1520_v9 }
 0xcc1   :  { %v1594_v44 = vpop.f32.mrf.mxu1  ;;  %v1416_v26 = vor.u32 1.1754944e-38, %v1415_v37  ;;  %vm1414_vm9 = vcmp.eq.f32.partialorder %v1413_v60, 8.507059e+37 }
 0xcc2   :  { %v3570_v52 = vpop.eup %3569  ;;  %v1543_v53 = vadd.f32 %v4065_v17, %v1540_v42 }
 0xcc3   :  { %v1331_v33 = vadd.f32 1.0, %v3570_v52 }
 0xcc4   :  { %v3359_v14 = vmul.f32 -1.442695, %v1543_v53 }
 0xcc5   :  { %v3572_v31 = vpop.eup %3571  ;;  %3573 = vrcp.f32 %v1331_v33  ;;  %v1467_v45 = vpop.f32.mrf.mxu3  ;;  %v1343_v19 = vand.u32 2147483648, %v1331_v33  ;;  %v1341_v0 = vand.u32 2147483647, %v1331_v33  ;;  %vm1337_vm11 = vweird.f32 %v1331_v33 }
 0xcc6   :  { %v1405_v59 = vmul.f32 %v3572_v31, %v1403_v12  ;;  %3575 = vpow2.f32 %v3359_v14  ;;  %v1468_v47 = vadd.f32 %v1467_v45, %v1448_v10  ;;  %vm1410_vm6 = vweird.f32 %v3572_v31 }
 0xcc7   :  { %v1522_v48 = vpop.f32.mrf.mxu0  ;;  %v1541_v34 = vpop.f32.mrf.mxu2  ;;  %vm1411_vm8 = vmor %vm1409_vm7, %vm1410_vm6  ;;  %v1344_v28 = vor.u32 1.1754944e-38, %v1343_v19  ;;  %vm1342_vm13 = vcmp.eq.f32.partialorder %v1341_v0, 8.507059e+37 }
 0xcc8   :  { %v1406_v55 = vsub.f32 1.0, %v1405_v59  ;;  %v1471_v51 = vadd.f32 %v4364_v56, %v1468_v47 }
 0xcca   :  { %v3355_v17 = vmul.f32 -1.442695, %v1471_v51  ;;  %v1407_v1 = vmul.f32 %v3572_v31, %v1406_v55 }
 0xccb   :  { %v3574_v3 = vpop.eup %3573 }
 0xccc   :  { %v3576_v5 = vpop.eup %3575  ;;  %v1333_v22 = vmul.f32 %v3574_v3, %v1331_v33  ;;  %3577 = vpow2.f32 %v3355_v17  ;;  %v1408_v10 = vadd.f32 %v3572_v31, %v1407_v1  ;;  %vm1338_vm10 = vweird.f32 %v3574_v3 }
 0xccd   :  { %v4367_v11 = vadd.f32 1.0, %v3576_v5  ;;  %v1469_v29 = vpop.f32.mrf.mxu3  ;;  %vm1339_vm12 = vmor %vm1337_vm11, %vm1338_vm10 }
 0xcce   :  { %v1334_v15 = vsub.f32 1.0, %v1333_v22  ;;  %v1412_v18 = vsel %vm1411_vm8, %v3572_v31, %v1408_v10 }
 0xccf   :  { %3579 = vrcp.f32 %v4367_v11  ;;  %v4370_v61 = vsel %vm1414_vm9, %v1416_v26, %v1412_v18  ;;  %v1559_v10 = vand.u32 2147483648, %v4367_v11  ;;  %vm1553_vm4 = vweird.f32 %v4367_v11 }
 0xcd0   :  { %v1419_v20 = vmul.f32 2.0, %v4370_v61  ;;  %v1335_v21 = vmul.f32 %v3574_v3, %v1334_v15  ;;  %v1557_v26 = vand.u32 2147483647, %v4367_v11 }
 0xcd2   :  { %v3578_v49 = vpop.eup %3577  ;;  %v3352_v25 = vadd.f32 -1.0, %v1419_v20  ;;  %v1336_v8 = vadd.f32 %v3574_v3, %v1335_v21  ;;  %v1560_v20 = vor.u32 1.1754944e-38, %v1559_v10  ;;  %vm1558_vm7 = vcmp.eq.f32.partialorder %v1557_v26, 8.507059e+37 }
 0xcd3   :  { %v1475_v12 = vadd.f32 1.0, %v3578_v49 }
 0xcd4   :  { %1423 = vrot.lane.b32.xlu2 %v3352_v25, %s3777_s19  ;;  %v1340_v9 = vsel %vm1339_vm12, %v3574_v3, %v1336_v8 }
 0xcd5   :  { %v3580_v39 = vpop.eup %3579  ;;  %3581 = vrcp.f32 %v1475_v12  ;;  %v1611_v42 = vpop.f32.mrf.mxu3  ;;  %v4374_v44 = vsel %vm1342_vm13, %v1344_v28, %v1340_v9  ;;  %v1487_v37 = vand.u32 2147483648, %v1475_v12  ;;  %v1485_v1 = vand.u32 2147483647, %v1475_v12 }
 0xcd6   :  { %v1549_v52 = vmul.f32 %v3580_v39, %v4367_v11  ;;  %v1612_v53 = vadd.f32 %v1611_v42, %v4358_v2  ;;  %v1347_v14 = vmul.f32 2.0, %v4374_v44  ;;  %vm1481_vm15 = vweird.f32 %v1475_v12 }
 0xcd7   :  { %vm1554_vm1 = vweird.f32 %v3580_v39  ;;  %v1488_v22 = vor.u32 1.1754944e-38, %v1487_v37  ;;  %vm1486_vm3 = vcmp.eq.f32.partialorder %v1485_v1, 8.507059e+37 }
 0xcd8   :  { %v1615_v33 = vadd.f32 %v4206_v36, %v1612_v53  ;;  %v3348_v31 = vadd.f32 -1.0, %v1347_v14  ;;  %v1550_v45 = vsub.f32 1.0, %v1549_v52  ;;  %vm1555_vm6 = vmor %vm1553_vm4, %vm1554_vm1 }
 0xcda   :  { %v3363_v59 = vmul.f32 -1.442695, %v1615_v33  ;;  %1351 = vrot.lane.b32.xlu0 %v3348_v31, %s3777_s19  ;;  %v1551_v51 = vmul.f32 %v3580_v39, %v1550_v45 }
 0xcdb   :  { %v3582_v47 = vpop.eup %3581 }
 0xcdc   :  { %v1477_v48 = vmul.f32 %v3582_v47, %v1475_v12  ;;  %3583 = vpow2.f32 %v3363_v59  ;;  %vm1482_vm14 = vweird.f32 %v3582_v47  ;;  %v1552_v3 = vadd.f32 %v3580_v39, %v1551_v51 }
 0xcdd   :  { %v1613_v34 = vpop.f32.mrf.mxu3  ;;  %vm1483_vm2 = vmor %vm1481_vm15, %vm1482_vm14 }
 0xcde   :  { %v1478_v55 = vsub.f32 1.0, %v1477_v48  ;;  %v1556_v19 = vsel %vm1555_vm6, %v3580_v39, %v1552_v3 }
 0xcdf   :  { %v4387_v0 = vsel %vm1558_vm7, %v1560_v20, %v1556_v19 }
 0xce0   :  { %v1479_v17 = vmul.f32 %v3582_v47, %v1478_v55  ;;  %v1563_v8 = vmul.f32 2.0, %v4387_v0 }
 0xce2   :  { %v3584_v2 = vpop.eup %3583  ;;  %v1480_v60 = vadd.f32 %v3582_v47, %v1479_v17  ;;  %v3360_v28 = vadd.f32 -1.0, %v1563_v8 }
 0xce3   :  { %v1619_v5 = vadd.f32 1.0, %v3584_v2  ;;  %v1421_v2 = vmul.f32 %v4370_v61, %v4242_v13 }
 0xce4   :  { %v1484_v29 = vsel %vm1483_vm2, %v3582_v47, %v1480_v60 }
 0xce5   :  { %3585 = vrcp.f32 %v1619_v5  ;;  %v4384_v15 = vsel %vm1486_vm3, %v1488_v22, %v1484_v29  ;;  %v1631_v11 = vand.u32 2147483648, %v1619_v5  ;;  %v1629_v42 = vand.u32 2147483647, %v1619_v5 }
 0xce6   :  { %v1491_v18 = vmul.f32 2.0, %v4384_v15  ;;  %vm1625_vm9 = vweird.f32 %v1619_v5 }
 0xce7   :  { %v1632_v52 = vor.u32 1.1754944e-38, %v1631_v11  ;;  %vm1630_vm11 = vcmp.eq.f32.partialorder %v1629_v42, 8.507059e+37 }
 0xce8   :  { %v3356_v21 = vadd.f32 -1.0, %v1491_v18 }
 0xcea   :  { %1495 = vrot.lane.b32.xlu1 %v3356_v21, %s3777_s19 }
 0xceb   :  { %v3586_v49 = vpop.eup %3585 }
 0xcec   :  { %v1621_v25 = vmul.f32 %v3586_v49, %v1619_v5  ;;  %vm1626_vm8 = vweird.f32 %v3586_v49  ;;  %v1349_v5 = vmul.f32 %v4374_v44, %v4255_v23  ;;  %v1493_v23 = vmul.f32 %v4384_v15, %v4248_v57 }
 0xced   :  { %vm1627_vm10 = vmor %vm1625_vm9, %vm1626_vm8 }
 0xcee   :  { %v1622_v12 = vsub.f32 1.0, %v1621_v25  ;;  %v1565_v25 = vmul.f32 %v4387_v0, %v4257_v24 }
 0xcf0   :  { %v1623_v9 = vmul.f32 %v3586_v49, %v1622_v12 }
 0xcf2   :  { %1567 = vrot.lane.b32.xlu1 %v3360_v28, %s3777_s19  ;;  %v1624_v39 = vadd.f32 %v3586_v49, %v1623_v9 }
 0xcf4   :  { %v1628_v53 = vsel %vm1627_vm10, %v3586_v49, %v1624_v39 }
 0xcf5   :  { %v4392_v14 = vsel %vm1630_vm11, %v1632_v52, %v1628_v53  ;;  %v3365_v52 = vld [vmem:[%s4893_s0 + $0x6] sm:$0x1] }
 0xcf6   :  { %v1635_v33 = vmul.f32 2.0, %v4392_v14  ;;  %v1637_v13 = vmul.f32 %v4392_v14, %v4265_v41  ;;  %3366 = vmatmul.msk.bf16.vlgmr.msra.gmra.mxu0 %vm48_vm0, %v3365_v52 }
 0xcf7   :  { %1954 = vmatpush.bf16.msra.mxu0 %v4125_v58 }
 0xcf8   :  { %v3364_v31 = vadd.f32 -1.0, %v1635_v33 }
 0xcfa   :  { %1639 = vrot.lane.b32.xlu0 %v3364_v31, %s3777_s19 }
 0xcfb   :  { %1955 = vmatpush.bf16.msra.mxu0 %v4133_v6 }
 0xd2e   :  { %v1424_v45 = vpop.permute.xlu2 %1423 }
 0xd2f   :  { %v1426_v59 = vmul.f32 %v1424_v45, %v4370_v61 }
 0xd31   :  { %1428 = vrot.lane.b32.xlu1 %v1426_v59, %s3778_s20 }
 0xd4c   :  { %v1352_v47 = vpop.permute.xlu0 %1351 }
 0xd4d   :  { %v1354_v48 = vmul.f32 %v1352_v47, %v4374_v44 }
 0xd4f   :  { %1356 = vrot.lane.b32.xlu2 %v1354_v48, %s3778_s20 }
 0xd5c   :  { %v1496_v34 = vpop.permute.xlu1 %1495 }
 0xd5d   :  { %v1498_v55 = vmul.f32 %v1496_v34, %v4384_v15  ;;  %v4495_v34 = vld [vmem:[%s4898_s5 + $0x20] sm:$0xff] }
 0xd5f   :  { %1500 = vrot.lane.b32.xlu0 %v1498_v55, %s3778_s20 }
 0xd64   :  { %v1568_v51 = vpop.permute.xlu1 %1567 }
 0xd65   :  { %v1570_v37 = vmul.f32 %v1568_v51, %v4387_v0 }
 0xd67   :  { %1572 = vrot.lane.b32.xlu0 %v1570_v37, %s3778_s20 }
 0xd6c   :  { %v1640_v17 = vpop.permute.xlu0 %1639 }
 0xd6d   :  { %v1642_v1 = vmul.f32 %v1640_v17, %v4392_v14 }
 0xd6f   :  { %1644 = vrot.lane.b32.xlu2 %v1642_v1, %s3778_s20 }
 0xda3   :  { %v1429_v60 = vpop.permute.xlu1 %1428 }
 0xda4   :  { %v4408_v3 = vadd.f32 %v1429_v60, %v1421_v2 }
 0xda6   :  { %3587 = vtanh.f32 %v4408_v3 }
 0xda9   :  { %v1357_v22 = vpop.permute.xlu2 %1356 }
 0xdaa   :  { %v4413_v10 = vadd.f32 %v1357_v22, %v1349_v5 }
 0xdac   :  { %v3588_v29 = vpop.eup %3587  ;;  %3589 = vtanh.f32 %v4413_v10 }
 0xdad   :  { %1434 = vrot.lane.b32.xlu0 %v3588_v29, %s3777_s19 }
 0xdb2   :  { %v3590_v26 = vpop.eup %3589 }
 0xdb3   :  { %1362 = vrot.lane.b32.xlu1 %v3590_v26, %s3777_s19 }
 0xdc9   :  { %v1645_v18 = vpop.permute.xlu2 %1644 }
 0xdca   :  { %v4420_v19 = vadd.f32 %v1645_v18, %v1637_v13 }
 0xdcc   :  { %3591 = vtanh.f32 %v4420_v19 }
 0xdd1   :  { %v1501_v20 = vpop.permute.xlu0 %1500 }
 0xdd2   :  { %v3592_v21 = vpop.eup %3591  ;;  %v4425_v49 = vadd.f32 %v1501_v20, %v1493_v23 }
 0xdd3   :  { %1650 = vrot.lane.b32.xlu1 %v3592_v21, %s3777_s19 }
 0xdd4   :  { %3593 = vtanh.f32 %v4425_v49 }
 0xdd9   :  { %v1573_v41 = vpop.permute.xlu0 %1572 }
 0xdda   :  { %v3594_v8 = vpop.eup %3593  ;;  %v4431_v12 = vadd.f32 %v1573_v41, %v1565_v25 }
 0xddb   :  { %1506 = vrot.lane.b32.xlu2 %v3594_v8, %s3777_s19 }
 0xddc   :  { %3595 = vtanh.f32 %v4431_v12 }
 0xde2   :  { %v3596_v57 = vpop.eup %3595 }
 0xde3   :  { %1578 = vrot.lane.b32.xlu2 %v3596_v57, %s3777_s19 }
 0xe1f   :  { %v1435_v11 = vpop.permute.xlu0 %1434 }
 0xe20   :  { %v1437_v28 = vmul.f32 %v1435_v11, %v4370_v61 }
 0xe22   :  { %v1731_v9 = vpack.c.bf16 %v1437_v28, %v1437_v28 }
 0xe24   :  { %1746 = vrot.lane.b32.xlu2 %v1731_v9, %s3778_s20 }
 0xe25   :  { %v1363_v42 = vpop.permute.xlu1 %1362 }
 0xe26   :  { %v1365_v24 = vmul.f32 %v1363_v42, %v4374_v44 }
 0xe28   :  { %v1656_v39 = vpack.c.bf16 %v1365_v24, %v1365_v24 }
 0xe2a   :  { %1674 = vrot.lane.b32.xlu0 %v1656_v39, %s3778_s20 }
 0xe35   :  { %v1507_v61 = vpop.permute.xlu2 %1506 }
 0xe36   :  { %v1509_v53 = vmul.f32 %v1507_v61, %v4384_v15  ;;  %v1669_v15 = vpop.f32.mrf.mxu0 }
 0xe38   :  { %v1803_v33 = vpack.c.bf16 %v1509_v53, %v1509_v53 }
 0xe3a   :  { %1818 = vrot.lane.b32.xlu1 %v1803_v33, %s3778_s20 }
 0xe3d   :  { %v1579_v44 = vpop.permute.xlu2 %1578 }
 0xe3e   :  { %v1581_v31 = vmul.f32 %v1579_v44, %v4387_v0 }
 0xe40   :  { %v1875_v45 = vpack.c.bf16 %v1581_v31, %v1581_v31 }
 0xe42   :  { %1890 = vrot.lane.b32.xlu1 %v1875_v45, %s3778_s20 }
 0xe45   :  { %v1651_v59 = vpop.permute.xlu1 %1650 }
 0xe46   :  { %v1653_v47 = vmul.f32 %v1651_v59, %v4392_v14  ;;  %v4489_v14 = vld [vmem:[%s4898_s5 + $0x28] sm:$0xff] }
 0xe48   :  { %v1947_v48 = vpack.c.bf16 %v1653_v47, %v1653_v47 }
 0xe4a   :  { %1962 = vrot.lane.b32.xlu0 %v1947_v48, %s3778_s20 }
 0xe7e   :  { %v1747_v58 = vpop.permute.xlu2 %1746 }
 0xe7f   :  { %3371 = vmatmul.msk.bf16.vlgmr.msra.gmra.mxu3 %vm77_vm5, %v1747_v58  ;;  %3374 = vmatmul.msk.bf16.vlgmr.msrb.gmra.mxu0 %vm77_vm5, %v1747_v58 }
 0xe80   :  { %2050 = vmatpush.bf16.msra.mxu3 %v4138_v30  ;;  %2103 = vmatpush.bf16.msrb.mxu0 %v4291_v27  ;;  %v1671_v30 = vpop.f32.mrf.mxu0 }
 0xe84   :  { %2051 = vmatpush.bf16.msra.mxu3 %v4145_v32  ;;  %2104 = vmatpush.bf16.msrb.mxu0 %v4298_v50 }
 0xe9c   :  { %v1675_v6 = vpop.permute.xlu0 %1674 }
 0xe9d   :  { %3367 = vmatmul.msk.bf16.vlgmr.msra.gmra.mxu2 %vm77_vm5, %v1675_v6  ;;  %3370 = vmatmul.msk.bf16.vlgmr.msra.gmra.mxu1 %vm77_vm5, %v1675_v6 }
 0xe9e   :  { %1973 = vmatpush.bf16.msra.mxu2 %v4153_v38  ;;  %2032 = vmatpush.bf16.msra.mxu1 %v4166_v35  ;;  %v4475_v38 = vld [vmem:[%s4897_s4 + $0x28] sm:$0xff] }
 0xea2   :  { %1974 = vmatpush.bf16.msra.mxu2 %v4161_v40  ;;  %v4482_v40 = vld [vmem:[%s4897_s4 + $0x20] sm:$0xff] }
 0xeac   :  { %v1819_v0 = vpop.permute.xlu1 %1818 }
 0xead   :  { %3375 = vmatmul.msk.bf16.vlgmr.msrb.gmra.mxu2 %vm77_vm5, %v1819_v0  ;;  %3378 = vmatmul.msk.bf16.vlgmr.msrb.gmra.mxu1 %vm77_vm5, %v1819_v0 }
 0xeae   :  { %2122 = vmatpush.bf16.msrb.mxu2 %v4327_v63  ;;  %2175 = vmatpush.bf16.msrb.mxu1 %v4333_v43 }
 0xeb2   :  { %2123 = vmatpush.bf16.msrb.mxu2 %v4339_v54  ;;  %2176 = vmatpush.bf16.msrb.mxu1 %v4345_v7 }
 0xeb4   :  { %v1891_v32 = vpop.permute.xlu1 %1890 }
 0xeb5   :  { %3379 = vmatmul.msk.bf16.vlgmr.msrb.gmra.mxu3 %vm77_vm5, %v1891_v32  ;;  %3382 = vmatmul.msk.bf16.vlgmr.msra.gmra.mxu0 %vm77_vm5, %v1891_v32 }
 0xeb6   :  { %2194 = vmatpush.bf16.msrb.mxu3 %v4311_v46  ;;  %2247 = vmatpush.bf16.msra.mxu0 %v4475_v38 }
 0xeba   :  { %2195 = vmatpush.bf16.msrb.mxu3 %v4318_v62  ;;  %2248 = vmatpush.bf16.msra.mxu0 %v4482_v40 }
 0xebc   :  { %v1963_v35 = vpop.permute.xlu0 %1962 }
 0xebd   :  { %3383 = vmatmul.msk.bf16.vlgmr.msra.gmra.mxu2 %vm77_vm5, %v1963_v35 }
 0xebe   :  { %2266 = vmatpush.bf16.msra.mxu2 %v4489_v14 }
 0xec2   :  { %2267 = vmatpush.bf16.msra.mxu2 %v4495_v34 }
 0xefc   :  { %v1813_v55 = vpop.f32.mrf.mxu0 }
 0xf02   :  { %v1760_v51 = vpop.f32.mrf.mxu3 }
 0xf04   :  { %v1815_v37 = vpop.f32.mrf.mxu0 }
 0xf0a   :  { %v1762_v17 = vpop.f32.mrf.mxu3 }
 0xf1a   :  { %v1741_v1 = vpop.f32.mrf.mxu1 }
 0xf1b   :  { %v1761_v2 = vadd.f32 %v1760_v51, %v1741_v1 }
 0xf1d   :  { %v1764_v60 = vadd.f32 %v4354_v16, %v1761_v2 }
 0xf1f   :  { %v3372_v5 = vmul.f32 -1.442695, %v1764_v60 }
 0xf20   :  { %v1688_v22 = vpop.f32.mrf.mxu2 }
 0xf21   :  { %3597 = vpow2.f32 %v3372_v5  ;;  %v1689_v29 = vadd.f32 %v1688_v22, %v1669_v15 }
 0xf22   :  { %v1743_v26 = vpop.f32.mrf.mxu1 }
 0xf23   :  { %v1692_v13 = vadd.f32 %v4189_v4, %v1689_v29 }
 0xf25   :  { %v3368_v18 = vmul.f32 -1.442695, %v1692_v13 }
 0xf27   :  { %v3598_v23 = vpop.eup %3597  ;;  %3599 = vpow2.f32 %v3368_v18 }
 0xf28   :  { %v1768_v20 = vadd.f32 1.0, %v3598_v23  ;;  %v1690_v21 = vpop.f32.mrf.mxu2 }
 0xf2a   :  { %3601 = vrcp.f32 %v1768_v20  ;;  %v1885_v25 = vpop.f32.mrf.mxu1  ;;  %v1780_v4 = vand.u32 2147483648, %v1768_v20  ;;  %v1778_v33 = vand.u32 2147483647, %v1768_v20  ;;  %vm1774_vm13 = vweird.f32 %v1768_v20 }
 0xf2c   :  { %v1781_v48 = vor.u32 1.1754944e-38, %v1780_v4  ;;  %vm1779_vm15 = vcmp.eq.f32.partialorder %v1778_v33, 8.507059e+37 }
 0xf2d   :  { %v3600_v41 = vpop.eup %3599 }
 0xf2e   :  { %v1696_v8 = vadd.f32 1.0, %v3600_v41 }
 0xf30   :  { %v3602_v57 = vpop.eup %3601  ;;  %3603 = vrcp.f32 %v1696_v8  ;;  %v1832_v11 = vpop.f32.mrf.mxu2  ;;  %v1706_v32 = vand.u32 2147483647, %v1696_v8  ;;  %v1708_v35 = vand.u32 2147483648, %v1696_v8  ;;  %vm1702_vm2 = vweird.f32 %v1696_v8 }
 0xf31   :  { %v1770_v28 = vmul.f32 %v3602_v57, %v1768_v20  ;;  %v1833_v9 = vadd.f32 %v1832_v11, %v1813_v55  ;;  %vm1775_vm12 = vweird.f32 %v3602_v57  ;;  %v4506_v55 = vld [vmem:[%s4899_s6 + $0x2] ss:$0 sm:$0xff] }
 0xf32   :  { %v1887_v42 = vpop.f32.mrf.mxu1  ;;  %v1957_v24 = vpop.f32.mrf.mxu0  ;;  %vm1776_vm14 = vmor %vm1774_vm13, %vm1775_vm12  ;;  %v1709_v29 = vor.u32 1.1754944e-38, %v1708_v35  ;;  %vm1707_vm4 = vcmp.eq.f32.partialorder %v1706_v32, 8.507059e+37 }
 0xf33   :  { %v1771_v39 = vsub.f32 1.0, %v1770_v28  ;;  %v1836_v52 = vadd.f32 %v4364_v56, %v1833_v9 }
 0xf35   :  { %v3376_v61 = vmul.f32 -1.442695, %v1836_v52  ;;  %v1772_v53 = vmul.f32 %v3602_v57, %v1771_v39 }
 0xf36   :  { %v3604_v44 = vpop.eup %3603 }
 0xf37   :  { %v1698_v31 = vmul.f32 %v3604_v44, %v1696_v8  ;;  %3605 = vpow2.f32 %v3376_v61  ;;  %v1773_v45 = vadd.f32 %v3602_v57, %v1772_v53  ;;  %vm1703_vm1 = vweird.f32 %v3604_v44 }
 0xf38   :  { %v1834_v59 = vpop.f32.mrf.mxu2  ;;  %v1904_v47 = vpop.f32.mrf.mxu3  ;;  %vm1704_vm3 = vmor %vm1702_vm2, %vm1703_vm1 }
 0xf39   :  { %v1699_v58 = vsub.f32 1.0, %v1698_v31  ;;  %v1905_v6 = vadd.f32 %v1904_v47, %v1885_v25  ;;  %v1777_v15 = vsel %vm1776_vm14, %v3602_v57, %v1773_v45 }
 0xf3a   :  { %v1959_v0 = vpop.f32.mrf.mxu0  ;;  %v4501_v30 = vsel %vm1779_vm15, %v1781_v48, %v1777_v15 }
 0xf3b   :  { %v1908_v51 = vadd.f32 %v4506_v55, %v1905_v6  ;;  %v1784_v37 = vmul.f32 2.0, %v4501_v30  ;;  %v1700_v17 = vmul.f32 %v3604_v44, %v1699_v58 }
 0xf3d   :  { %v3606_v1 = vpop.eup %3605  ;;  %v3380_v2 = vmul.f32 -1.442695, %v1908_v51  ;;  %v3373_v60 = vadd.f32 -1.0, %v1784_v37  ;;  %v1701_v5 = vadd.f32 %v3604_v44, %v1700_v17 }
 0xf3e   :  { %v1840_v22 = vadd.f32 1.0, %v3606_v1 }
 0xf3f   :  { %3607 = vpow2.f32 %v3380_v2  ;;  %1788 = vrot.lane.b32.xlu1 %v3373_v60, %s3777_s19  ;;  %v1705_v26 = vsel %vm1704_vm3, %v3604_v44, %v1701_v5 }
 0xf40   :  { %3609 = vrcp.f32 %v1840_v22  ;;  %v1906_v13 = vpop.f32.mrf.mxu3  ;;  %v1976_v18 = vpop.f32.mrf.mxu2  ;;  %v4511_v23 = vsel %vm1707_vm4, %v1709_v29, %v1705_v26  ;;  %v1852_v52 = vand.u32 2147483648, %v1840_v22  ;;  %vm1846_vm7 = vweird.f32 %v1840_v22 }
 0xf41   :  { %v1977_v20 = vadd.f32 %v1976_v18, %v1957_v24  ;;  %v1712_v21 = vmul.f32 2.0, %v4511_v23  ;;  %v1850_v24 = vand.u32 2147483647, %v1840_v22 }
 0xf42   :  { %v1853_v44 = vor.u32 1.1754944e-38, %v1852_v52 }
 0xf43   :  { %v1980_v25 = vadd.f32 %v4206_v36, %v1977_v20  ;;  %v3369_v41 = vadd.f32 -1.0, %v1712_v21  ;;  %vm1851_vm9 = vcmp.eq.f32.partialorder %v1850_v24, 8.507059e+37 }
 0xf45   :  { %v3608_v8 = vpop.eup %3607  ;;  %v3384_v57 = vmul.f32 -1.442695, %v1980_v25  ;;  %1716 = vrot.lane.b32.xlu2 %v3369_v41, %s3777_s19 }
 0xf46   :  { %v3610_v11 = vpop.eup %3609  ;;  %v1912_v28 = vadd.f32 1.0, %v3608_v8 }
 0xf47   :  { %v1842_v9 = vmul.f32 %v3610_v11, %v1840_v22  ;;  %3611 = vpow2.f32 %v3384_v57  ;;  %vm1847_vm6 = vweird.f32 %v3610_v11 }
 0xf48   :  { %3613 = vrcp.f32 %v1912_v28  ;;  %v1978_v42 = vpop.f32.mrf.mxu2  ;;  %vm1848_vm8 = vmor %vm1846_vm7, %vm1847_vm6  ;;  %v1924_v58 = vand.u32 2147483648, %v1912_v28  ;;  %v1922_v0 = vand.u32 2147483647, %v1912_v28  ;;  %vm1918_vm11 = vweird.f32 %v1912_v28 }
 0xf49   :  { %v1843_v39 = vsub.f32 1.0, %v1842_v9 }
 0xf4a   :  { %v1925_v51 = vor.u32 1.1754944e-38, %v1924_v58  ;;  %vm1923_vm13 = vcmp.eq.f32.partialorder %v1922_v0, 8.507059e+37 }
 0xf4b   :  { %v1844_v4 = vmul.f32 %v3610_v11, %v1843_v39 }
 0xf4d   :  { %v3612_v61 = vpop.eup %3611  ;;  %v1845_v53 = vadd.f32 %v3610_v11, %v1844_v4 }
 0xf4e   :  { %v3614_v36 = vpop.eup %3613  ;;  %v1984_v33 = vadd.f32 1.0, %v3612_v61  ;;  %v1714_v61 = vmul.f32 %v4511_v23, %v4413_v10 }
 0xf4f   :  { %v1914_v31 = vmul.f32 %v3614_v36, %v1912_v28  ;;  %v1849_v45 = vsel %vm1848_vm8, %v3610_v11, %v1845_v53  ;;  %vm1919_vm10 = vweird.f32 %v3614_v36 }
 0xf50   :  { %3615 = vrcp.f32 %v1984_v33  ;;  %v4516_v59 = vsel %vm1851_vm9, %v1853_v44, %v1849_v45  ;;  %vm1920_vm12 = vmor %vm1918_vm11, %vm1919_vm10  ;;  %v1996_v5 = vand.u32 2147483648, %v1984_v33  ;;  %v1994_v26 = vand.u32 2147483647, %v1984_v33 }
 0xf51   :  { %v1915_v47 = vsub.f32 1.0, %v1914_v31  ;;  %v1856_v48 = vmul.f32 2.0, %v4516_v59  ;;  %vm1990_vm15 = vweird.f32 %v1984_v33  ;;  %v1858_v44 = vmul.f32 %v4516_v59, %v4425_v49 }
 0xf52   :  { %v1997_v18 = vor.u32 1.1754944e-38, %v1996_v5  ;;  %vm1995_vm2 = vcmp.eq.f32.partialorder %v1994_v26, 8.507059e+37 }
 0xf53   :  { %v3377_v6 = vadd.f32 -1.0, %v1856_v48  ;;  %v1916_v15 = vmul.f32 %v3614_v36, %v1915_v47  ;;  %v1786_v47 = vmul.f32 %v4501_v30, %v4408_v3 }
 0xf55   :  { %1860 = vrot.lane.b32.xlu0 %v3377_v6, %s3777_s19  ;;  %v1917_v32 = vadd.f32 %v3614_v36, %v1916_v15 }
 0xf56   :  { %v3616_v35 = vpop.eup %3615 }
 0xf57   :  { %v1986_v37 = vmul.f32 %v3616_v35, %v1984_v33  ;;  %v1921_v17 = vsel %vm1920_vm12, %v3614_v36, %v1917_v32  ;;  %vm1991_vm14 = vweird.f32 %v3616_v35 }
 0xf58   :  { %v4520_v1 = vsel %vm1923_vm13, %v1925_v51, %v1921_v17  ;;  %vm1992_vm1 = vmor %vm1990_vm15, %vm1991_vm14 }
 0xf59   :  { %v1987_v2 = vsub.f32 1.0, %v1986_v37  ;;  %v1928_v60 = vmul.f32 2.0, %v4520_v1  ;;  %v1930_v58 = vmul.f32 %v4520_v1, %v4431_v12 }
 0xf5b   :  { %v3381_v22 = vadd.f32 -1.0, %v1928_v60  ;;  %v1988_v29 = vmul.f32 %v3616_v35, %v1987_v2 }
 0xf5d   :  { %1932 = vrot.lane.b32.xlu0 %v3381_v22, %s3777_s19  ;;  %v1989_v13 = vadd.f32 %v3616_v35, %v1988_v29 }
 0xf5f   :  { %v1993_v20 = vsel %vm1992_vm1, %v3616_v35, %v1989_v13 }
 0xf60   :  { %v4524_v21 = vsel %vm1995_vm2, %v1997_v18, %v1993_v20 }
 0xf61   :  { %v2000_v25 = vmul.f32 2.0, %v4524_v21  ;;  %v2002_v3 = vmul.f32 %v4524_v21, %v4420_v19 }
 0xf63   :  { %v3385_v41 = vadd.f32 -1.0, %v2000_v25 }
 0xf65   :  { %2004 = vrot.lane.b32.xlu2 %v3385_v41, %s3777_s19 }
 0xf9f   :  { %v1717_v8 = vpop.permute.xlu2 %1716 }
 0xfa0   :  { %v1719_v57 = vmul.f32 %v1717_v8, %v4511_v23  ;;  %v4599_v8 = vld [vmem:[%s4898_s5 + $0x38] sm:$0xff] }
 0xfa2   :  { %1721 = vrot.lane.b32.xlu1 %v1719_v57, %s3778_s20  ;;  %v4606_v57 = vld [vmem:[%s4898_s5 + $0x30] sm:$0xff] }
 0xfb1   :  { %v1789_v11 = vpop.permute.xlu1 %1788 }
 0xfb2   :  { %v1791_v28 = vmul.f32 %v1789_v11, %v4501_v30 }
 0xfb4   :  { %1793 = vrot.lane.b32.xlu0 %v1791_v28, %s3778_s20 }
 0xfbf   :  { %v2005_v9 = vpop.permute.xlu2 %2004 }
 0xfc0   :  { %v2007_v42 = vmul.f32 %v2005_v9, %v4524_v21  ;;  %v3740_v9 = vld [vmem:[%s4896_s3] ss:$0 sm:$0xff] }
 0xfc2   :  { %2009 = vrot.lane.b32.xlu1 %v2007_v42, %s3778_s20 }
 0xfc7   :  { %v1861_v39 = vpop.permute.xlu0 %1860 }
 0xfc8   :  { %v1863_v52 = vmul.f32 %v1861_v39, %v4516_v59 }
 0xfca   :  { %1865 = vrot.lane.b32.xlu2 %v1863_v52, %s3778_s20 }
 0xfcf   :  { %v1933_v4 = vpop.permute.xlu0 %1932 }
 0xfd0   :  { %v1935_v24 = vmul.f32 %v1933_v4, %v4520_v1 }
 0xfd2   :  { %1937 = vrot.lane.b32.xlu2 %v1935_v24, %s3778_s20 }
0x1014   :  { %v1722_v53 = vpop.permute.xlu1 %1721 }
0x1015   :  { %v4540_v36 = vadd.f32 %v1722_v53, %v1714_v61 }
0x1017   :  { %3617 = vtanh.f32 %v4540_v36 }
0x101d   :  { %v3618_v33 = vpop.eup %3617 }
0x101e   :  { %1727 = vrot.lane.b32.xlu0 %v3618_v33, %s3777_s19 }
0x1024   :  { %v1866_v31 = vpop.permute.xlu2 %1865 }
0x1025   :  { %v4546_v45 = vadd.f32 %v1866_v31, %v1858_v44 }
0x1026   :  { %v1794_v48 = vpop.permute.xlu0 %1793 }
0x1027   :  { %3619 = vtanh.f32 %v4546_v45  ;;  %v4551_v10 = vadd.f32 %v1794_v48, %v1786_v47 }
0x1029   :  { %3621 = vtanh.f32 %v4551_v10 }
0x102c   :  { %v1938_v6 = vpop.permute.xlu2 %1937 }
0x102d   :  { %v3620_v15 = vpop.eup %3619  ;;  %v4556_v0 = vadd.f32 %v1938_v6, %v1930_v58 }
0x102e   :  { %1871 = vrot.lane.b32.xlu1 %v3620_v15, %s3777_s19 }
0x102f   :  { %v3622_v49 = vpop.eup %3621  ;;  %3623 = vtanh.f32 %v4556_v0 }
0x1030   :  { %1799 = vrot.lane.b32.xlu2 %v3622_v49, %s3777_s19 }
0x1034   :  { %v2010_v32 = vpop.permute.xlu1 %2009 }
0x1035   :  { %v3624_v35 = vpop.eup %3623  ;;  %v4563_v51 = vadd.f32 %v2010_v32, %v2002_v3 }
0x1036   :  { %1943 = vrot.lane.b32.xlu1 %v3624_v35, %s3777_s19 }
0x1037   :  { %3625 = vtanh.f32 %v4563_v51 }
0x103d   :  { %v3626_v12 = vpop.eup %3625 }
0x103e   :  { %2015 = vrot.lane.b32.xlu0 %v3626_v12, %s3777_s19 }
0x108a   :  { %v1800_v37 = vpop.permute.xlu2 %1799 }
0x108b   :  { %v1802_v17 = vmul.f32 %v1800_v37, %v4501_v30 }
0x108d   :  { %v2096_v2 = vpack.c.bf16 %v1802_v17, %v1802_v17 }
0x108f   :  { %2111 = vrot.lane.b32.xlu1 %v2096_v2, %s3778_s20 }
0x1090   :  { %v1728_v60 = vpop.permute.xlu0 %1727 }
0x1091   :  { %v1730_v19 = vmul.f32 %v1728_v60, %v4511_v23  ;;  %v3386_v23 = vld [vmem:[%s4893_s0 + $0x7] sm:$0x1] }
0x1092   :  { %3387 = vmatmul.msk.bf16.vlgmr.msra.gmra.mxu1 %vm48_vm0, %v3386_v23 }
0x1093   :  { %v2021_v5 = vpack.c.bf16 %v1730_v19, %v1730_v19 }
0x1095   :  { %2039 = vrot.lane.b32.xlu2 %v2021_v5, %s3778_s20 }
0x10a0   :  { %v1872_v22 = vpop.permute.xlu1 %1871 }
0x10a1   :  { %v1874_v29 = vmul.f32 %v1872_v22, %v4516_v59  ;;  %v4585_v59 = vld [vmem:[%s4897_s4 + $0x38] sm:$0xff] }
0x10a2   :  { %2319 = vmatpush.bf16.msra.mxu1 %v4585_v59 }
0x10a3   :  { %v2168_v26 = vpack.c.bf16 %v1874_v29, %v1874_v29 }
0x10a5   :  { %2183 = vrot.lane.b32.xlu0 %v2168_v26, %s3778_s20 }
0x10a8   :  { %v1944_v13 = vpop.permute.xlu1 %1943 }
0x10a9   :  { %v1946_v18 = vmul.f32 %v1944_v13, %v4520_v1  ;;  %v4591_v1 = vld [vmem:[%s4897_s4 + $0x30] sm:$0xff] }
0x10aa   :  { %2320 = vmatpush.bf16.msra.mxu1 %v4591_v1 }
0x10ab   :  { %v2240_v20 = vpack.c.bf16 %v1946_v18, %v1946_v18 }
0x10ad   :  { %2255 = vrot.lane.b32.xlu0 %v2240_v20, %s3778_s20 }
0x10b0   :  { %v2016_v30 = vpop.permute.xlu0 %2015 }
0x10b1   :  { %v2018_v25 = vmul.f32 %v2016_v30, %v4524_v21 }
0x10b3   :  { %v2312_v41 = vpack.c.bf16 %v2018_v25, %v2018_v25 }
0x10b5   :  { %2327 = vrot.lane.b32.xlu2 %v2312_v41, %s3778_s20 }
0x10ef   :  { %v2040_v21 = vpop.permute.xlu2 %2039 }
0x10f0   :  { %3388 = vmatmul.msk.bf16.vlgmr.msra.gmra.mxu3 %vm77_vm5, %v2040_v21  ;;  %3391 = vmatmul.msk.bf16.vlgmr.msrb.gmra.mxu0 %vm77_vm5, %v2040_v21 }
0x10f1   :  { %2338 = vmatpush.bf16.msra.mxu3 %v4599_v8  ;;  %2398 = vmatpush.bf16.msrb.mxu0 %v4291_v27 }
0x10f5   :  { %2339 = vmatpush.bf16.msra.mxu3 %v4606_v57  ;;  %2399 = vmatpush.bf16.msrb.mxu0 %v4298_v50 }
0x1101   :  { %v2112_v11 = vpop.permute.xlu1 %2111 }
0x1102   :  { %3392 = vmatmul.msk.bf16.vlgmr.msrb.gmra.mxu2 %vm77_vm5, %v2112_v11  ;;  %3395 = vmatmul.msk.bf16.vlgmr.msrb.gmra.mxu1 %vm77_vm5, %v2112_v11 }
0x1103   :  { %2417 = vmatpush.bf16.msrb.mxu2 %v4327_v63  ;;  %2470 = vmatpush.bf16.msrb.mxu1 %v4333_v43 }
0x1107   :  { %2418 = vmatpush.bf16.msrb.mxu2 %v4339_v54  ;;  %2471 = vmatpush.bf16.msrb.mxu1 %v4345_v7 }
0x1117   :  { %v2184_v27 = vpop.permute.xlu0 %2183 }
0x1118   :  { %3396 = vmatmul.msk.bf16.vlgmr.msrb.gmra.mxu3 %vm77_vm5, %v2184_v27  ;;  %3399 = vmatmul.msk.bf16.vlgmr.msra.gmra.mxu0 %vm77_vm5, %v2184_v27 }
0x1119   :  { %2489 = vmatpush.bf16.msrb.mxu3 %v4311_v46  ;;  %2542 = vmatpush.bf16.msra.mxu0 %v4475_v38  ;;  %v2328_v46 = vpop.permute.xlu2 %2327 }
0x111d   :  { %2490 = vmatpush.bf16.msrb.mxu3 %v4318_v62  ;;  %2543 = vmatpush.bf16.msra.mxu0 %v4482_v40  ;;  %v2034_v62 = vpop.f32.mrf.mxu1 }
0x111f   :  { %v2256_v50 = vpop.permute.xlu0 %2255 }
0x1120   :  { %3400 = vmatmul.msk.bf16.vlgmr.msra.gmra.mxu2 %vm77_vm5, %v2256_v50  ;;  %3403 = vmatmul.msk.bf16.vlgmr.msra.gmra.mxu1 %vm77_vm5, %v2256_v50 }
0x1121   :  { %2561 = vmatpush.bf16.msra.mxu2 %v4489_v14  ;;  %2614 = vmatpush.bf16.msra.mxu1 %v4585_v59 }
0x1125   :  { %2562 = vmatpush.bf16.msra.mxu2 %v4495_v34  ;;  %2615 = vmatpush.bf16.msra.mxu1 %v4591_v1  ;;  %v2036_v63 = vpop.f32.mrf.mxu1 }
0x1128   :  { %3404 = vmatmul.msk.bf16.vlgmr.msra.gmra.mxu3 %vm77_vm5, %v2328_v46 }
0x1129   :  { %2633 = vmatpush.bf16.msra.mxu3 %v4599_v8 }
0x112d   :  { %2634 = vmatpush.bf16.msra.mxu3 %v4606_v57 }
0x116d   :  { %v2106_v43 = vpop.f32.mrf.mxu0 }
0x1173   :  { %v2053_v54 = vpop.f32.mrf.mxu3 }
0x1174   :  { %v2054_v7 = vadd.f32 %v2053_v54, %v2034_v62 }
0x1175   :  { %v2108_v28 = vpop.f32.mrf.mxu0 }
0x1176   :  { %v2057_v42 = vadd.f32 %v3740_v9, %v2054_v7 }
0x1178   :  { %v3389_v39 = vmul.f32 -1.442695, %v2057_v42 }
0x117a   :  { %3627 = vpow2.f32 %v3389_v39 }
0x117b   :  { %v2055_v52 = vpop.f32.mrf.mxu3 }
0x117f   :  { %v2178_v4 = vpop.f32.mrf.mxu1 }
0x1180   :  { %v3628_v24 = vpop.eup %3627 }
0x1181   :  { %v2061_v61 = vadd.f32 1.0, %v3628_v24 }
0x1183   :  { %3629 = vrcp.f32 %v2061_v61  ;;  %v2073_v49 = vand.u32 2147483648, %v2061_v61  ;;  %v2071_v32 = vand.u32 2147483647, %v2061_v61  ;;  %vm2067_vm3 = vweird.f32 %v2061_v61 }
0x1185   :  { %v2125_v53 = vpop.f32.mrf.mxu2  ;;  %v2074_v12 = vor.u32 1.1754944e-38, %v2073_v49  ;;  %vm2072_vm6 = vcmp.eq.f32.partialorder %v2071_v32, 8.507059e+37 }
0x1186   :  { %v2126_v33 = vadd.f32 %v2125_v53, %v2106_v43  ;;  %v4648_v53 = vld [vmem:[%s4899_s6 + $0x3] ss:$0 sm:$0xff] }
0x1187   :  { %v2180_v44 = vpop.f32.mrf.mxu1 }
0x1188   :  { %v2129_v31 = vadd.f32 %v4354_v16, %v2126_v33 }
0x1189   :  { %v3630_v47 = vpop.eup %3629 }
0x118a   :  { %v2063_v48 = vmul.f32 %v3630_v47, %v2061_v61  ;;  %v3393_v58 = vmul.f32 -1.442695, %v2129_v31  ;;  %vm2068_vm0 = vweird.f32 %v3630_v47 }
0x118b   :  { %vm2069_vm4 = vmor %vm2067_vm3, %vm2068_vm0 }
0x118c   :  { %v2064_v6 = vsub.f32 1.0, %v2063_v48  ;;  %3631 = vpow2.f32 %v3393_v58 }
0x118d   :  { %v2127_v15 = vpop.f32.mrf.mxu2 }
0x118e   :  { %v2065_v3 = vmul.f32 %v3630_v47, %v2064_v6 }
0x1190   :  { %v2066_v35 = vadd.f32 %v3630_v47, %v2065_v3 }
0x1192   :  { %v3632_v37 = vpop.eup %3631  ;;  %v2070_v17 = vsel %vm2069_vm4, %v3630_v47, %v2066_v35 }
0x1193   :  { %v2133_v2 = vadd.f32 1.0, %v3632_v37  ;;  %v4635_v60 = vsel %vm2072_vm6, %v2074_v12, %v2070_v17 }
0x1194   :  { %v2077_v16 = vmul.f32 2.0, %v4635_v60 }
0x1195   :  { %3633 = vrcp.f32 %v2133_v2  ;;  %v2250_v19 = vpop.f32.mrf.mxu0  ;;  %v2145_v41 = vand.u32 2147483648, %v2133_v2  ;;  %v2143_v11 = vand.u32 2147483647, %v2133_v2  ;;  %vm2139_vm8 = vweird.f32 %v2133_v2 }
0x1196   :  { %v3390_v5 = vadd.f32 -1.0, %v2077_v16 }
0x1197   :  { %v2146_v62 = vor.u32 1.1754944e-38, %v2145_v41  ;;  %vm2144_vm10 = vcmp.eq.f32.partialorder %v2143_v11, 8.507059e+37 }
0x1198   :  { %2081 = vrot.lane.b32.xlu0 %v3390_v5, %s3777_s19 }
0x119b   :  { %v3634_v22 = vpop.eup %3633  ;;  %v2197_v29 = vpop.f32.mrf.mxu3 }
0x119c   :  { %v2135_v26 = vmul.f32 %v3634_v22, %v2133_v2  ;;  %v2198_v13 = vadd.f32 %v2197_v29, %v2178_v4  ;;  %vm2140_vm7 = vweird.f32 %v3634_v22 }
0x119d   :  { %v2252_v18 = vpop.f32.mrf.mxu0  ;;  %v2322_v20 = vpop.f32.mrf.mxu1  ;;  %vm2141_vm9 = vmor %vm2139_vm8, %vm2140_vm7 }
0x119e   :  { %v2136_v30 = vsub.f32 1.0, %v2135_v26  ;;  %v2201_v25 = vadd.f32 %v4364_v56, %v2198_v13 }
0x11a0   :  { %v3397_v23 = vmul.f32 -1.442695, %v2201_v25  ;;  %v2137_v21 = vmul.f32 %v3634_v22, %v2136_v30 }
0x11a2   :  { %3635 = vpow2.f32 %v3397_v23  ;;  %v2138_v27 = vadd.f32 %v3634_v22, %v2137_v21 }
0x11a3   :  { %v2199_v50 = vpop.f32.mrf.mxu3  ;;  %v2269_v46 = vpop.f32.mrf.mxu2 }
0x11a4   :  { %v2270_v63 = vadd.f32 %v2269_v46, %v2250_v19  ;;  %v2142_v43 = vsel %vm2141_vm9, %v3634_v22, %v2138_v27 }
0x11a5   :  { %v2324_v54 = vpop.f32.mrf.mxu1  ;;  %v4640_v7 = vsel %vm2144_vm10, %v2146_v62, %v2142_v43 }
0x11a6   :  { %v2273_v56 = vadd.f32 %v4506_v55, %v2270_v63  ;;  %v2149_v28 = vmul.f32 2.0, %v4640_v7 }
0x11a8   :  { %v3636_v9 = vpop.eup %3635  ;;  %v3401_v42 = vmul.f32 -1.442695, %v2273_v56  ;;  %v3394_v39 = vadd.f32 -1.0, %v2149_v28 }
0x11a9   :  { %v2205_v52 = vadd.f32 1.0, %v3636_v9 }
0x11aa   :  { %3637 = vpow2.f32 %v3401_v42  ;;  %2153 = vrot.lane.b32.xlu2 %v3394_v39, %s3777_s19 }
0x11ab   :  { %3639 = vrcp.f32 %v2205_v52  ;;  %v2271_v4 = vpop.f32.mrf.mxu2  ;;  %v2341_v24 = vpop.f32.mrf.mxu3  ;;  %v2217_v49 = vand.u32 2147483648, %v2205_v52  ;;  %v2215_v32 = vand.u32 2147483647, %v2205_v52  ;;  %vm2211_vm12 = vweird.f32 %v2205_v52 }
0x11ac   :  { %v2342_v61 = vadd.f32 %v2341_v24, %v2322_v20 }
0x11ad   :  { %v2218_v2 = vor.u32 1.1754944e-38, %v2217_v49  ;;  %vm2216_vm14 = vcmp.eq.f32.partialorder %v2215_v32, 8.507059e+37  ;;  %v2151_v32 = vmul.f32 %v4640_v7, %v4551_v10 }
0x11ae   :  { %v2345_v33 = vadd.f32 %v4648_v53, %v2342_v61 }
0x11b0   :  { %v3638_v44 = vpop.eup %3637  ;;  %v3405_v31 = vmul.f32 -1.442695, %v2345_v33 }
0x11b1   :  { %v3640_v47 = vpop.eup %3639  ;;  %v2277_v48 = vadd.f32 1.0, %v3638_v44 }
0x11b2   :  { %v2207_v58 = vmul.f32 %v3640_v47, %v2205_v52  ;;  %3641 = vpow2.f32 %v3405_v31  ;;  %vm2212_vm11 = vweird.f32 %v3640_v47 }
0x11b3   :  { %3643 = vrcp.f32 %v2277_v48  ;;  %v2343_v6 = vpop.f32.mrf.mxu3  ;;  %vm2213_vm13 = vmor %vm2211_vm12, %vm2212_vm11  ;;  %v2289_v26 = vand.u32 2147483648, %v2277_v48  ;;  %v2287_v20 = vand.u32 2147483647, %v2277_v48  ;;  %vm2283_vm1 = vweird.f32 %v2277_v48 }
0x11b4   :  { %v2208_v15 = vsub.f32 1.0, %v2207_v58  ;;  %v2079_v6 = vmul.f32 %v4635_v60, %v4540_v36 }
0x11b5   :  { %v2290_v41 = vor.u32 1.1754944e-38, %v2289_v26  ;;  %vm2288_vm0 = vcmp.eq.f32.partialorder %v2287_v20, 8.507059e+37 }
0x11b6   :  { %v2209_v3 = vmul.f32 %v3640_v47, %v2208_v15 }
0x11b8   :  { %v3642_v35 = vpop.eup %3641  ;;  %v2210_v12 = vadd.f32 %v3640_v47, %v2209_v3 }
0x11b9   :  { %v3644_v37 = vpop.eup %3643  ;;  %v2349_v17 = vadd.f32 1.0, %v3642_v35 }
0x11ba   :  { %v2279_v16 = vmul.f32 %v3644_v37, %v2277_v48  ;;  %v2214_v19 = vsel %vm2213_vm13, %v3640_v47, %v2210_v12  ;;  %vm2284_vm15 = vweird.f32 %v3644_v37 }
0x11bb   :  { %3645 = vrcp.f32 %v2349_v17  ;;  %v4651_v5 = vsel %vm2216_vm14, %v2218_v2, %v2214_v19  ;;  %vm2285_vm2 = vmor %vm2283_vm1, %vm2284_vm15  ;;  %v2361_v46 = vand.u32 2147483648, %v2349_v17  ;;  %v2359_v43 = vand.u32 2147483647, %v2349_v17 }
0x11bc   :  { %v2280_v22 = vsub.f32 1.0, %v2279_v16  ;;  %v2221_v29 = vmul.f32 2.0, %v4651_v5  ;;  %vm2355_vm4 = vweird.f32 %v2349_v17  ;;  %v2223_v10 = vmul.f32 %v4651_v5, %v4546_v45 }
0x11bd   :  { %v2362_v56 = vor.u32 1.1754944e-38, %v2361_v46  ;;  %vm2360_vm7 = vcmp.eq.f32.partialorder %v2359_v43, 8.507059e+37 }
0x11be   :  { %v3398_v13 = vadd.f32 -1.0, %v2221_v29  ;;  %v2281_v18 = vmul.f32 %v3644_v37, %v2280_v22 }
0x11c0   :  { %2225 = vrot.lane.b32.xlu1 %v3398_v13, %s3777_s19  ;;  %v2282_v30 = vadd.f32 %v3644_v37, %v2281_v18 }
0x11c1   :  { %v3646_v25 = vpop.eup %3645 }
0x11c2   :  { %v2351_v23 = vmul.f32 %v3646_v25, %v2349_v17  ;;  %v2286_v21 = vsel %vm2285_vm2, %v3644_v37, %v2282_v30  ;;  %vm2356_vm3 = vweird.f32 %v3646_v25 }
0x11c3   :  { %v4655_v11 = vsel %vm2288_vm0, %v2290_v41, %v2286_v21  ;;  %vm2357_vm6 = vmor %vm2355_vm4, %vm2356_vm3 }
0x11c4   :  { %v2352_v27 = vsub.f32 1.0, %v2351_v23  ;;  %v2293_v50 = vmul.f32 2.0, %v4655_v11  ;;  %v2295_v36 = vmul.f32 %v4655_v11, %v4556_v0 }
0x11c6   :  { %v3402_v62 = vadd.f32 -1.0, %v2293_v50  ;;  %v2353_v63 = vmul.f32 %v3646_v25, %v2352_v27 }
0x11c8   :  { %2297 = vrot.lane.b32.xlu2 %v3402_v62, %s3777_s19  ;;  %v2354_v54 = vadd.f32 %v3646_v25, %v2353_v63 }
0x11ca   :  { %v2358_v28 = vsel %vm2357_vm6, %v3646_v25, %v2354_v54  ;;  %v3743_v54 = vld [vmem:[%s4898_s5 + $0x10] sm:$0xff] }
0x11cb   :  { %v4659_v9 = vsel %vm2360_vm7, %v2362_v56, %v2358_v28  ;;  %v3744_v56 = vld [vmem:[%s4897_s4 + $0x18] sm:$0xff]  ;;  %v3745_v28 = vld [vmem:[%s4897_s4 + $0x10] sm:$0xff] }
0x11cc   :  { %v2365_v42 = vmul.f32 2.0, %v4659_v9  ;;  %v2367_v0 = vmul.f32 %v4659_v9, %v4563_v51 }
0x11ce   :  { %v3406_v39 = vadd.f32 -1.0, %v2365_v42 }
0x11d0   :  { %2369 = vrot.lane.b32.xlu1 %v3406_v39, %s3777_s19 }
0x1204   :  { %v2154_v52 = vpop.permute.xlu2 %2153 }
0x1205   :  { %v2156_v4 = vmul.f32 %v2154_v52, %v4640_v7 }
0x1207   :  { %2158 = vrot.lane.b32.xlu1 %v2156_v4, %s3778_s20 }
0x120a   :  { %v2082_v24 = vpop.permute.xlu0 %2081 }
0x120b   :  { %v2084_v61 = vmul.f32 %v2082_v24, %v4635_v60 }
0x120d   :  { %2086 = vrot.lane.b32.xlu2 %v2084_v61, %s3778_s20  ;;  %v3746_v61 = vld [vmem:[%s4899_s6] ss:$0 sm:$0xff] }
0x1222   :  { %v2298_v33 = vpop.permute.xlu2 %2297 }
0x1223   :  { %v2300_v44 = vmul.f32 %v2298_v33, %v4655_v11 }
0x1225   :  { %2302 = vrot.lane.b32.xlu1 %v2300_v44, %s3778_s20 }
0x1232   :  { %v2226_v31 = vpop.permute.xlu1 %2225 }
0x1233   :  { %v2228_v47 = vmul.f32 %v2226_v31, %v4651_v5 }
0x1235   :  { %2230 = vrot.lane.b32.xlu0 %v2228_v47, %s3778_s20 }
0x1242   :  { %v2370_v48 = vpop.permute.xlu1 %2369 }
0x1243   :  { %v2372_v58 = vmul.f32 %v2370_v48, %v4659_v9 }
0x1245   :  { %2374 = vrot.lane.b32.xlu0 %v2372_v58, %s3778_s20 }
0x1267   :  { %v2087_v15 = vpop.permute.xlu2 %2086 }
0x1268   :  { %v2089_v49 = vadd.f32 %v2087_v15, %v2079_v6 }
0x126a   :  { %3647 = vtanh.f32 %v2089_v49 }
0x1270   :  { %v3648_v3 = vpop.eup %3647 }
0x1271   :  { %2092 = vrot.lane.b32.xlu1 %v3648_v3, %s3777_s19 }
0x1279   :  { %v2159_v35 = vpop.permute.xlu1 %2158 }
0x127a   :  { %v4678_v12 = vadd.f32 %v2159_v35, %v2151_v32 }
0x127c   :  { %3649 = vtanh.f32 %v4678_v12 }
0x1282   :  { %v3650_v37 = vpop.eup %3649 }
0x1283   :  { %2164 = vrot.lane.b32.xlu0 %v3650_v37, %s3777_s19 }
0x1297   :  { %v2303_v17 = vpop.permute.xlu1 %2302 }
0x1298   :  { %v4684_v2 = vadd.f32 %v2303_v17, %v2295_v36 }
0x129a   :  { %3651 = vtanh.f32 %v4684_v2 }
0x12a0   :  { %v3652_v16 = vpop.eup %3651 }
0x12a1   :  { %2308 = vrot.lane.b32.xlu0 %v3652_v16, %s3777_s19 }
0x12a7   :  { %v2231_v19 = vpop.permute.xlu0 %2230 }
0x12a8   :  { %v4690_v22 = vadd.f32 %v2231_v19, %v2223_v10 }
0x12aa   :  { %3653 = vtanh.f32 %v4690_v22 }
0x12b0   :  { %v3654_v29 = vpop.eup %3653 }
0x12b1   :  { %2236 = vrot.lane.b32.xlu2 %v3654_v29, %s3777_s19 }
0x12b7   :  { %v2375_v26 = vpop.permute.xlu0 %2374 }
0x12b8   :  { %v4696_v13 = vadd.f32 %v2375_v26, %v2367_v0 }
0x12ba   :  { %3655 = vtanh.f32 %v4696_v13 }
0x12c0   :  { %v3656_v18 = vpop.eup %3655 }
0x12c1   :  { %2380 = vrot.lane.b32.xlu2 %v3656_v18, %s3777_s19 }
0x12e3   :  { %v2093_v45 = vpop.permute.xlu1 %2092 }
0x12e4   :  { %v2095_v20 = vmul.f32 %v2093_v45, %v4635_v60 }
0x12e6   :  { %v2384_v30 = vpack.c.bf16 %v2095_v20, %v2095_v20 }
0x12e8   :  { %2387 = vrot.lane.b32.xlu0 %v2384_v30, %s3778_s20 }
0x12f5   :  { %v2165_v25 = vpop.permute.xlu0 %2164 }
0x12f6   :  { %v2167_v41 = vmul.f32 %v2165_v25, %v4640_v7 }
0x12f8   :  { %v2385_v23 = vpack.c.bf16 %v2167_v41, %v2167_v41 }
0x12fa   :  { %2406 = vrot.lane.b32.xlu2 %v2385_v23, %s3778_s20  ;;  %v4753_v23 = vld [vmem:[%s4899_s6 + $0x1] ss:$0 sm:$0xff] }
0x130b   :  { %v2237_v51 = vpop.permute.xlu2 %2236 }
0x130c   :  { %v2239_v21 = vmul.f32 %v2237_v51, %v4651_v5  ;;  %v3742_v5 = vld [vmem:[%s4898_s5 + $0x18] sm:$0xff] }
0x130e   :  { %v2463_v27 = vpack.c.bf16 %v2239_v21, %v2239_v21 }
0x1310   :  { %2478 = vrot.lane.b32.xlu1 %v2463_v27, %s3778_s20 }
0x1313   :  { %v2309_v50 = vpop.permute.xlu0 %2308 }
0x1314   :  { %v2311_v46 = vmul.f32 %v2309_v50, %v4655_v11 }
0x1316   :  { %v2535_v62 = vpack.c.bf16 %v2311_v46, %v2311_v46 }
0x1318   :  { %2550 = vrot.lane.b32.xlu2 %v2535_v62, %s3778_s20 }
0x131b   :  { %v2381_v60 = vpop.permute.xlu2 %2380 }
0x131c   :  { %v2383_v63 = vmul.f32 %v2381_v60, %v4659_v9 }
0x131e   :  { %v2607_v43 = vpack.c.bf16 %v2383_v63, %v2383_v63 }
0x1320   :  { %2622 = vrot.lane.b32.xlu1 %v2607_v43, %s3778_s20 }
0x1354   :  { %v2407_v7 = vpop.permute.xlu2 %2406 }
0x1355   :  { %3408 = vmatmul.msk.bf16.vlgmr.msrb.gmra.mxu2 %vm77_vm5, %v2407_v7  ;;  %3411 = vmatmul.msk.bf16.vlgmr.msrb.gmra.mxu1 %vm77_vm5, %v2407_v7 }
0x1356   :  { %2712 = vmatpush.bf16.msrb.mxu2 %v3742_v5  ;;  %2765 = vmatpush.bf16.msrb.mxu1 %v4475_v38 }
0x135a   :  { %v2388_v11 = vpop.permute.xlu0 %2387  ;;  %2713 = vmatpush.bf16.msrb.mxu2 %v3743_v54  ;;  %2766 = vmatpush.bf16.msrb.mxu1 %v4482_v40 }
0x135b   :  { %3407 = vmatmul.msk.bf16.vlgmr.msrb.gmra.mxu0 %vm77_vm5, %v2388_v11 }
0x135c   :  { %2693 = vmatpush.bf16.msrb.mxu0 %v3744_v56 }
0x1360   :  { %2694 = vmatpush.bf16.msrb.mxu0 %v3745_v28 }
0x1372   :  { %v2551_v9 = vpop.permute.xlu2 %2550 }
0x1373   :  { %3416 = vmatmul.msk.bf16.vlgmr.msra.gmra.mxu2 %vm77_vm5, %v2551_v9  ;;  %3419 = vmatmul.msk.bf16.vlgmr.msra.gmra.mxu1 %vm77_vm5, %v2551_v9 }
0x1374   :  { %2856 = vmatpush.bf16.msra.mxu2 %v4599_v8  ;;  %2916 = vmatpush.bf16.msra.mxu1 %v4475_v38 }
0x1378   :  { %2857 = vmatpush.bf16.msra.mxu2 %v4606_v57  ;;  %2917 = vmatpush.bf16.msra.mxu1 %v4482_v40 }
0x1382   :  { %v2479_v42 = vpop.permute.xlu1 %2478 }
0x1383   :  { %3412 = vmatmul.msk.bf16.vlgmr.msrb.gmra.mxu3 %vm77_vm5, %v2479_v42  ;;  %3415 = vmatmul.msk.bf16.vlgmr.msra.gmra.mxu0 %vm77_vm5, %v2479_v42 }
0x1384   :  { %2784 = vmatpush.bf16.msrb.mxu3 %v4489_v14  ;;  %2837 = vmatpush.bf16.msra.mxu0 %v4585_v59 }
0x1388   :  { %2785 = vmatpush.bf16.msrb.mxu3 %v4495_v34  ;;  %2838 = vmatpush.bf16.msra.mxu0 %v4591_v1 }
0x1392   :  { %v2623_v39 = vpop.permute.xlu1 %2622 }
0x1393   :  { %3420 = vmatmul.msk.bf16.vlgmr.msra.gmra.mxu3 %vm77_vm5, %v2623_v39 }
0x1394   :  { %2935 = vmatpush.bf16.msra.mxu3 %v4489_v14 }
0x1398   :  { %2936 = vmatpush.bf16.msra.mxu3 %v4495_v34 }
0x13d2   :  { %v2473_v38 = vpop.f32.mrf.mxu1 }
0x13d8   :  { %v2401_v40 = vpop.f32.mrf.mxu0  ;;  %v2420_v52 = vpop.f32.mrf.mxu2 }
0x13d9   :  { %v2421_v4 = vadd.f32 %v2420_v52, %v2401_v40 }
0x13da   :  { %v2475_v24 = vpop.f32.mrf.mxu1 }
0x13db   :  { %v2424_v33 = vadd.f32 %v3746_v61, %v2421_v4 }
0x13dd   :  { %v3409_v44 = vmul.f32 -1.442695, %v2424_v33 }
0x13df   :  { %3657 = vpow2.f32 %v3409_v44 }
0x13e0   :  { %v2403_v31 = vpop.f32.mrf.mxu0  ;;  %v2422_v47 = vpop.f32.mrf.mxu2 }
0x13e5   :  { %v3658_v48 = vpop.eup %3657 }
0x13e6   :  { %v2428_v58 = vadd.f32 1.0, %v3658_v48 }
0x13e8   :  { %3659 = vrcp.f32 %v2428_v58  ;;  %v2440_v49 = vand.u32 2147483648, %v2428_v58  ;;  %v2438_v32 = vand.u32 2147483647, %v2428_v58  ;;  %vm2434_vm9 = vweird.f32 %v2428_v58 }
0x13ea   :  { %v2441_v36 = vor.u32 1.1754944e-38, %v2440_v49  ;;  %vm2439_vm11 = vcmp.eq.f32.partialorder %v2438_v32, 8.507059e+37 }
0x13ee   :  { %v3660_v14 = vpop.eup %3659 }
0x13ef   :  { %v2430_v6 = vmul.f32 %v3660_v14, %v2428_v58  ;;  %vm2435_vm8 = vweird.f32 %v3660_v14 }
0x13f0   :  { %v2617_v34 = vpop.f32.mrf.mxu1  ;;  %vm2436_vm10 = vmor %vm2434_vm9, %vm2435_vm8 }
0x13f1   :  { %v2431_v15 = vsub.f32 1.0, %v2430_v6 }
0x13f3   :  { %v2432_v3 = vmul.f32 %v3660_v14, %v2431_v15 }
0x13f5   :  { %v2433_v35 = vadd.f32 %v3660_v14, %v2432_v3 }
0x13f6   :  { %v2564_v37 = vpop.f32.mrf.mxu2 }
0x13f7   :  { %v2437_v17 = vsel %vm2436_vm10, %v3660_v14, %v2433_v35 }
0x13f8   :  { %v2619_v16 = vpop.f32.mrf.mxu1  ;;  %v4745_v10 = vsel %vm2439_vm11, %v2441_v36, %v2437_v17 }
0x13f9   :  { %v2444_v19 = vmul.f32 2.0, %v4745_v10 }
0x13fb   :  { %v3410_v29 = vadd.f32 -1.0, %v2444_v19 }
0x13fd   :  { %2448 = vrot.lane.b32.xlu1 %v3410_v29, %s3777_s19 }
0x13fe   :  { %v2566_v0 = vpop.f32.mrf.mxu2 }
0x1400   :  { %v2545_v26 = vpop.f32.mrf.mxu0 }
0x1401   :  { %v2565_v18 = vadd.f32 %v2564_v37, %v2545_v26 }
0x1403   :  { %v2568_v45 = vadd.f32 %v4506_v55, %v2565_v18 }
0x1405   :  { %v3417_v20 = vmul.f32 -1.442695, %v2568_v45 }
0x1406   :  { %v2492_v30 = vpop.f32.mrf.mxu3 }
0x1407   :  { %3661 = vpow2.f32 %v3417_v20  ;;  %v2493_v25 = vadd.f32 %v2492_v30, %v2473_v38 }
0x1408   :  { %v2547_v41 = vpop.f32.mrf.mxu0 }
0x1409   :  { %v2496_v51 = vadd.f32 %v4753_v23, %v2493_v25 }
0x140b   :  { %v3413_v21 = vmul.f32 -1.442695, %v2496_v51 }
0x140d   :  { %v3662_v27 = vpop.eup %3661  ;;  %3663 = vpow2.f32 %v3413_v21 }
0x140e   :  { %v2572_v50 = vadd.f32 1.0, %v3662_v27  ;;  %v2494_v46 = vpop.f32.mrf.mxu3 }
0x1410   :  { %3665 = vrcp.f32 %v2572_v50  ;;  %v2584_v31 = vand.u32 2147483648, %v2572_v50  ;;  %vm2578_vm2 = vweird.f32 %v2572_v50  ;;  %v2582_v48 = vand.u32 2147483647, %v2572_v50 }
0x1412   :  { %vm2583_vm3 = vcmp.eq.f32.partialorder %v2582_v48, 8.507059e+37 }
0x1413   :  { %v3664_v62 = vpop.eup %3663 }
0x1414   :  { %v2500_v55 = vadd.f32 1.0, %v3664_v62  ;;  %v2446_v62 = vmul.f32 %v4745_v10, %v4678_v12 }
0x1416   :  { %v3666_v60 = vpop.eup %3665  ;;  %3667 = vrcp.f32 %v2500_v55  ;;  %v2636_v63 = vpop.f32.mrf.mxu3  ;;  %v2512_v38 = vand.u32 2147483648, %v2500_v55  ;;  %v2510_v52 = vand.u32 2147483647, %v2500_v55  ;;  %vm2506_vm13 = vweird.f32 %v2500_v55 }
0x1417   :  { %v2574_v43 = vmul.f32 %v3666_v60, %v2572_v50  ;;  %v2637_v7 = vadd.f32 %v2636_v63, %v2617_v34  ;;  %vm2579_vm14 = vweird.f32 %v3666_v60  ;;  %v2585_v34 = vor.u32 1.1754944e-38, %v2584_v31 }
0x1418   :  { %v2513_v44 = vor.u32 1.1754944e-38, %v2512_v38  ;;  %vm2511_vm1 = vcmp.eq.f32.partialorder %v2510_v52, 8.507059e+37  ;;  %vm2580_vm0 = vmor %vm2578_vm2, %vm2579_vm14 }
0x1419   :  { %v2640_v5 = vadd.f32 %v4648_v53, %v2637_v7  ;;  %v2575_v11 = vsub.f32 1.0, %v2574_v43 }
0x141b   :  { %v3421_v54 = vmul.f32 -1.442695, %v2640_v5  ;;  %v2576_v39 = vmul.f32 %v3666_v60, %v2575_v11 }
0x141c   :  { %v3668_v56 = vpop.eup %3667 }
0x141d   :  { %v2502_v28 = vmul.f32 %v3668_v56, %v2500_v55  ;;  %3669 = vpow2.f32 %v3421_v54  ;;  %vm2507_vm12 = vweird.f32 %v3668_v56  ;;  %v2577_v61 = vadd.f32 %v3666_v60, %v2576_v39 }
0x141e   :  { %v2638_v9 = vpop.f32.mrf.mxu3  ;;  %vm2508_vm15 = vmor %vm2506_vm13, %vm2507_vm12 }
0x141f   :  { %v2503_v42 = vsub.f32 1.0, %v2502_v28  ;;  %v2581_v6 = vsel %vm2580_vm0, %v3666_v60, %v2577_v61 }
0x1420   :  { %v4760_v49 = vsel %vm2583_vm3, %v2585_v34, %v2581_v6 }
0x1421   :  { %v2504_v40 = vmul.f32 %v3668_v56, %v2503_v42  ;;  %v2588_v35 = vmul.f32 2.0, %v4760_v49  ;;  %v2590_v12 = vmul.f32 %v4760_v49, %v4684_v2 }
0x1423   :  { %v3670_v4 = vpop.eup %3669  ;;  %v2505_v24 = vadd.f32 %v3668_v56, %v2504_v40  ;;  %v3418_v17 = vadd.f32 -1.0, %v2588_v35 }
0x1424   :  { %v2644_v33 = vadd.f32 1.0, %v3670_v4 }
0x1425   :  { %v2509_v47 = vsel %vm2508_vm15, %v3668_v56, %v2505_v24 }
0x1426   :  { %3671 = vrcp.f32 %v2644_v33  ;;  %v4757_v58 = vsel %vm2511_vm1, %v2513_v44, %v2509_v47  ;;  %v2656_v36 = vand.u32 2147483648, %v2644_v33  ;;  %v2654_v19 = vand.u32 2147483647, %v2644_v33 }
0x1427   :  { %v2516_v14 = vmul.f32 2.0, %v4757_v58  ;;  %vm2650_vm6 = vweird.f32 %v2644_v33  ;;  %v2518_v11 = vmul.f32 %v4757_v58, %v4690_v22 }
0x1428   :  { %v2657_v0 = vor.u32 1.1754944e-38, %v2656_v36  ;;  %vm2655_vm8 = vcmp.eq.f32.partialorder %v2654_v19, 8.507059e+37 }
0x1429   :  { %v3414_v15 = vadd.f32 -1.0, %v2516_v14 }
0x142b   :  { %2520 = vrot.lane.b32.xlu0 %v3414_v15, %s3777_s19 }
0x142c   :  { %v3672_v3 = vpop.eup %3671 }
0x142d   :  { %v2646_v32 = vmul.f32 %v3672_v3, %v2644_v33  ;;  %vm2651_vm4 = vweird.f32 %v3672_v3 }
0x142e   :  { %vm2652_vm7 = vmor %vm2650_vm6, %vm2651_vm4 }
0x142f   :  { %v2647_v37 = vsub.f32 1.0, %v2646_v32 }
0x1431   :  { %v2648_v16 = vmul.f32 %v3672_v3, %v2647_v37 }
0x1433   :  { %2592 = vrot.lane.b32.xlu0 %v3418_v17, %s3777_s19  ;;  %v2649_v29 = vadd.f32 %v3672_v3, %v2648_v16 }
0x1435   :  { %v2653_v26 = vsel %vm2652_vm7, %v3672_v3, %v2649_v29 }
0x1436   :  { %v2658_v18 = vsel %vm2655_vm8, %v2657_v0, %v2653_v26 }
0x1437   :  { %v2660_v45 = vmul.f32 2.0, %v2658_v18  ;;  %v2662_v43 = vmul.f32 %v2658_v18, %v4696_v13 }
0x1439   :  { %v3422_v20 = vadd.f32 -1.0, %v2660_v45 }
0x143b   :  { %2664 = vrot.lane.b32.xlu2 %v3422_v20, %s3777_s19 }
0x146f   :  { %v2449_v30 = vpop.permute.xlu1 %2448 }
0x1470   :  { %v2451_v25 = vmul.f32 %v2449_v30, %v4745_v10 }
0x1472   :  { %2453 = vrot.lane.b32.xlu2 %v2451_v25, %s3778_s20 }
0x1495   :  { %v2665_v41 = vpop.permute.xlu2 %2664 }
0x1496   :  { %v2667_v51 = vmul.f32 %v2665_v41, %v2658_v18 }
0x1498   :  { %2669 = vrot.lane.b32.xlu0 %v2667_v51, %s3778_s20 }
0x149d   :  { %v2521_v21 = vpop.permute.xlu0 %2520 }
0x149e   :  { %v2523_v27 = vmul.f32 %v2521_v21, %v4757_v58 }
0x14a0   :  { %2525 = vrot.lane.b32.xlu1 %v2523_v27, %s3778_s20 }
0x14a5   :  { %v2593_v50 = vpop.permute.xlu0 %2592 }
0x14a6   :  { %v2595_v46 = vmul.f32 %v2593_v50, %v4760_v49 }
0x14a8   :  { %2597 = vrot.lane.b32.xlu1 %v2595_v46, %s3778_s20 }
0x14cc   :  { %v2454_v55 = vpop.permute.xlu2 %2453 }
0x14cd   :  { %v2456_v60 = vadd.f32 %v2454_v55, %v2446_v62 }
0x14cf   :  { %3673 = vtanh.f32 %v2456_v60 }
0x14d5   :  { %v3674_v63 = vpop.eup %3673 }
0x14d6   :  { %2459 = vrot.lane.b32.xlu0 %v3674_v63, %s3777_s19 }
0x150a   :  { %v2670_v7 = vpop.permute.xlu0 %2669 }
0x150b   :  { %v4777_v5 = vadd.f32 %v2670_v7, %v2662_v43 }
0x150d   :  { %3675 = vtanh.f32 %v4777_v5 }
0x1512   :  { %v2526_v54 = vpop.permute.xlu1 %2525 }
0x1513   :  { %v3676_v56 = vpop.eup %3675  ;;  %v4782_v28 = vadd.f32 %v2526_v54, %v2518_v11 }
0x1514   :  { %2675 = vrot.lane.b32.xlu1 %v3676_v56, %s3777_s19 }
0x1515   :  { %3677 = vtanh.f32 %v4782_v28 }
0x151a   :  { %v2598_v13 = vpop.permute.xlu1 %2597 }
0x151b   :  { %v3678_v9 = vpop.eup %3677  ;;  %v4788_v42 = vadd.f32 %v2598_v13, %v2590_v12 }
0x151c   :  { %2531 = vrot.lane.b32.xlu2 %v3678_v9, %s3777_s19 }
0x151d   :  { %3679 = vtanh.f32 %v4788_v42 }
0x1523   :  { %v3680_v22 = vpop.eup %3679 }
0x1524   :  { %2603 = vrot.lane.b32.xlu2 %v3680_v22, %s3777_s19 }
0x1548   :  { %v2460_v39 = vpop.permute.xlu0 %2459 }
0x1549   :  { %v2462_v38 = vmul.f32 %v2460_v39, %v4745_v10 }
0x154b   :  { %v2679_v40 = vpack.c.bf16 %v2462_v38, %v2462_v38 }
0x154d   :  { %2682 = vrot.lane.b32.xlu1 %v2679_v40, %s3778_s20 }
0x1576   :  { %v2532_v52 = vpop.permute.xlu2 %2531 }
0x1577   :  { %v2534_v2 = vmul.f32 %v2532_v52, %v4757_v58 }
0x1579   :  { %v2680_v4 = vpack.c.bf16 %v2534_v2, %v2534_v2 }
0x157b   :  { %2701 = vrot.lane.b32.xlu0 %v2680_v4, %s3778_s20 }
0x157e   :  { %v2604_v24 = vpop.permute.xlu2 %2603 }
0x157f   :  { %v2606_v61 = vmul.f32 %v2604_v24, %v4760_v49 }
0x1581   :  { %v2758_v33 = vpack.c.bf16 %v2606_v61, %v2606_v61 }
0x1583   :  { %2773 = vrot.lane.b32.xlu0 %v2758_v33, %s3778_s20 }
0x1586   :  { %v2676_v44 = vpop.permute.xlu1 %2675 }
0x1587   :  { %v2678_v31 = vmul.f32 %v2676_v44, %v2658_v18 }
0x1589   :  { %v2830_v47 = vpack.c.bf16 %v2678_v31, %v2678_v31 }
0x158b   :  { %2845 = vrot.lane.b32.xlu2 %v2830_v47, %s3778_s20 }
0x15bf   :  { %v2683_v10 = vpop.permute.xlu1 %2682 }
0x15c0   :  { %3423 = vmatmul.msk.bf16.vlgmr.msrb.gmra.mxu0 %vm77_vm5, %v2683_v10 }
0x15c1   :  { %2988 = vmatpush.bf16.msrb.mxu0 %v4585_v59 }
0x15c5   :  { %2989 = vmatpush.bf16.msrb.mxu0 %v4591_v1 }
0x15e5   :  { %v2846_v14 = vpop.permute.xlu2 %2845 }
0x15ed   :  { %v2702_v48 = vpop.permute.xlu0 %2701 }
0x15ee   :  { %3424 = vmatmul.msk.bf16.vlgmr.msrb.gmra.mxu2 %vm77_vm5, %v2702_v48  ;;  %3427 = vmatmul.msk.bf16.vlgmr.msrb.gmra.mxu1 %vm77_vm5, %v2702_v48 }
0x15ef   :  { %3007 = vmatpush.bf16.msrb.mxu2 %v4599_v8  ;;  %3067 = vmatpush.bf16.msrb.mxu1 %v4585_v59 }
0x15f3   :  { %3008 = vmatpush.bf16.msrb.mxu2 %v4606_v57  ;;  %3068 = vmatpush.bf16.msrb.mxu1 %v4591_v1 }
0x15f5   :  { %v2774_v58 = vpop.permute.xlu0 %2773 }
0x15f6   :  { %3428 = vmatmul.msk.bf16.vlgmr.msrb.gmra.mxu3 %vm77_vm5, %v2774_v58  ;;  %3431 = vmatmul.msk.bf16.vlgmr.msra.gmra.mxu0 %vm77_vm5, %v2774_v58 }
0x15f7   :  { %3086 = vmatpush.bf16.msrb.mxu3 %v4599_v8 }
0x15fb   :  { %3087 = vmatpush.bf16.msrb.mxu3 %v4606_v57  ;;  %v4818_v57 = vld [vmem:[%s4899_s6 + $0x2] ss:$0 sm:$0xff] }
0x15fe   :  { %3432 = vmatmul.msk.bf16.vlgmr.msra.gmra.mxu2 %vm77_vm5, %v2846_v14 }
0x163d   :  { %v2696_v6 = vpop.f32.mrf.mxu0 }
0x1645   :  { %v2698_v34 = vpop.f32.mrf.mxu0 }
0x166b   :  { %v2768_v15 = vpop.f32.mrf.mxu1 }
0x1671   :  { %v2715_v59 = vpop.f32.mrf.mxu2 }
0x1672   :  { %v2716_v49 = vadd.f32 %v2715_v59, %v2696_v6 }
0x1673   :  { %v2770_v3 = vpop.f32.mrf.mxu1  ;;  %v2840_v32 = vpop.f32.mrf.mxu0 }
0x1674   :  { %v2719_v1 = vadd.f32 %v4753_v23, %v2716_v49 }
0x1676   :  { %v3425_v35 = vmul.f32 -1.442695, %v2719_v1 }
0x1678   :  { %3681 = vpow2.f32 %v3425_v35 }
0x1679   :  { %v2717_v37 = vpop.f32.mrf.mxu2  ;;  %v2787_v36 = vpop.f32.mrf.mxu3 }
0x167a   :  { %v2788_v17 = vadd.f32 %v2787_v36, %v2768_v15 }
0x167b   :  { %v2842_v8 = vpop.f32.mrf.mxu0 }
0x167c   :  { %v2791_v16 = vadd.f32 %v4818_v57, %v2788_v17 }
0x167e   :  { %v3682_v19 = vpop.eup %3681  ;;  %v3429_v29 = vmul.f32 -1.442695, %v2791_v16 }
0x167f   :  { %v2723_v0 = vadd.f32 1.0, %v3682_v19 }
0x1680   :  { %3683 = vpow2.f32 %v3429_v29 }
0x1681   :  { %3685 = vrcp.f32 %v2723_v0  ;;  %v2789_v26 = vpop.f32.mrf.mxu3  ;;  %v2859_v23 = vpop.f32.mrf.mxu2  ;;  %v2735_v50 = vand.u32 2147483648, %v2723_v0  ;;  %v2733_v62 = vand.u32 2147483647, %v2723_v0  ;;  %vm2729_vm10 = vweird.f32 %v2723_v0 }
0x1682   :  { %v2860_v18 = vadd.f32 %v2859_v23, %v2840_v32 }
0x1683   :  { %v2736_v7 = vor.u32 1.1754944e-38, %v2735_v50  ;;  %vm2734_vm12 = vcmp.eq.f32.partialorder %v2733_v62, 8.507059e+37 }
0x1684   :  { %v2863_v45 = vadd.f32 %v4648_v53, %v2860_v18 }
0x1686   :  { %v3684_v20 = vpop.eup %3683  ;;  %v3433_v30 = vmul.f32 -1.442695, %v2863_v45 }
0x1687   :  { %v3686_v25 = vpop.eup %3685  ;;  %v2795_v41 = vadd.f32 1.0, %v3684_v20 }
0x1688   :  { %v2725_v51 = vmul.f32 %v3686_v25, %v2723_v0  ;;  %3687 = vpow2.f32 %v3433_v30  ;;  %vm2730_vm9 = vweird.f32 %v3686_v25 }
0x1689   :  { %3689 = vrcp.f32 %v2795_v41  ;;  %v2861_v21 = vpop.f32.mrf.mxu2  ;;  %vm2731_vm11 = vmor %vm2729_vm10, %vm2730_vm9  ;;  %v2807_v9 = vand.u32 2147483648, %v2795_v41  ;;  %v2805_v38 = vand.u32 2147483647, %v2795_v41  ;;  %vm2801_vm14 = vweird.f32 %v2795_v41 }
0x168a   :  { %v2726_v27 = vsub.f32 1.0, %v2725_v51 }
0x168b   :  { %v2808_v2 = vor.u32 1.1754944e-38, %v2807_v9  ;;  %vm2806_vm1 = vcmp.eq.f32.partialorder %v2805_v38, 8.507059e+37 }
0x168c   :  { %v2727_v46 = vmul.f32 %v3686_v25, %v2726_v27 }
0x168e   :  { %v3688_v55 = vpop.eup %3687  ;;  %v2728_v60 = vadd.f32 %v3686_v25, %v2727_v46 }
0x168f   :  { %v3690_v63 = vpop.eup %3689  ;;  %v2867_v43 = vadd.f32 1.0, %v3688_v55 }
0x1690   :  { %v2797_v11 = vmul.f32 %v3690_v63, %v2795_v41  ;;  %v2732_v54 = vsel %vm2731_vm11, %v3686_v25, %v2728_v60  ;;  %vm2802_vm13 = vweird.f32 %v3690_v63 }
0x1691   :  { %3691 = vrcp.f32 %v2867_v43  ;;  %v4822_v56 = vsel %vm2734_vm12, %v2736_v7, %v2732_v54  ;;  %vm2803_vm15 = vmor %vm2801_vm14, %vm2802_vm13  ;;  %v2879_v31 = vand.u32 2147483648, %v2867_v43  ;;  %v2877_v48 = vand.u32 2147483647, %v2867_v43 }
0x1692   :  { %v2798_v12 = vsub.f32 1.0, %v2797_v11  ;;  %v2739_v13 = vmul.f32 2.0, %v4822_v56  ;;  %vm2873_vm0 = vweird.f32 %v2867_v43  ;;  %v2741_v19 = vmul.f32 %v4822_v56, %v4782_v28 }
0x1693   :  { %v2880_v14 = vor.u32 1.1754944e-38, %v2879_v31  ;;  %vm2878_vm4 = vcmp.eq.f32.partialorder %v2877_v48, 8.507059e+37 }
0x1694   :  { %v3426_v22 = vadd.f32 -1.0, %v2739_v13  ;;  %v2799_v39 = vmul.f32 %v3690_v63, %v2798_v12 }
0x1696   :  { %2743 = vrot.lane.b32.xlu0 %v3426_v22, %s3777_s19  ;;  %v2800_v40 = vadd.f32 %v3690_v63, %v2799_v39 }
0x1697   :  { %v3692_v52 = vpop.eup %3691 }
0x1698   :  { %v2869_v4 = vmul.f32 %v3692_v52, %v2867_v43  ;;  %v2804_v24 = vsel %vm2803_vm15, %v3690_v63, %v2800_v40  ;;  %vm2874_vm2 = vweird.f32 %v3692_v52 }
0x1699   :  { %v2809_v61 = vsel %vm2806_vm1, %v2808_v2, %v2804_v24  ;;  %vm2875_vm3 = vmor %vm2873_vm0, %vm2874_vm2 }
0x169a   :  { %v2870_v33 = vsub.f32 1.0, %v2869_v4  ;;  %v2811_v44 = vmul.f32 2.0, %v2809_v61  ;;  %v2813_v36 = vmul.f32 %v2809_v61, %v4788_v42 }
0x169c   :  { %v3430_v47 = vadd.f32 -1.0, %v2811_v44  ;;  %v2871_v10 = vmul.f32 %v3692_v52, %v2870_v33 }
0x169e   :  { %2815 = vrot.lane.b32.xlu2 %v3430_v47, %s3777_s19  ;;  %v2872_v58 = vadd.f32 %v3692_v52, %v2871_v10 }
0x16a0   :  { %v2876_v6 = vsel %vm2875_vm3, %v3692_v52, %v2872_v58 }
0x16a1   :  { %v2881_v34 = vsel %vm2878_vm4, %v2880_v14, %v2876_v6 }
0x16a2   :  { %v2883_v15 = vmul.f32 2.0, %v2881_v34  ;;  %v2885_v23 = vmul.f32 %v2881_v34, %v4777_v5 }
0x16a4   :  { %v3434_v59 = vadd.f32 -1.0, %v2883_v15 }
0x16a6   :  { %2887 = vrot.lane.b32.xlu1 %v3434_v59, %s3777_s19 }
0x16f8   :  { %v2816_v49 = vpop.permute.xlu2 %2815 }
0x16f9   :  { %v2818_v3 = vmul.f32 %v2816_v49, %v2809_v61 }
0x16fb   :  { %2820 = vrot.lane.b32.xlu2 %v2818_v3, %s3778_s20 }
0x1708   :  { %v2744_v32 = vpop.permute.xlu0 %2743 }
0x1709   :  { %v2746_v1 = vmul.f32 %v2744_v32, %v4822_v56 }
0x170b   :  { %2748 = vrot.lane.b32.xlu0 %v2746_v1, %s3778_s20 }
0x1718   :  { %v2888_v35 = vpop.permute.xlu1 %2887 }
0x1719   :  { %v2890_v37 = vmul.f32 %v2888_v35, %v2881_v34 }
0x171b   :  { %2892 = vrot.lane.b32.xlu1 %v2890_v37, %s3778_s20 }
0x1755   :  { %v2821_v17 = vpop.permute.xlu2 %2820 }
0x1756   :  { %v4833_v8 = vadd.f32 %v2821_v17, %v2813_v36 }
0x1758   :  { %3693 = vtanh.f32 %v4833_v8 }
0x175e   :  { %v3694_v16 = vpop.eup %3693 }
0x175f   :  { %2826 = vrot.lane.b32.xlu2 %v3694_v16, %s3777_s19 }
0x177d   :  { %v2749_v29 = vpop.permute.xlu0 %2748 }
0x177e   :  { %v2751_v0 = vadd.f32 %v2749_v29, %v2741_v19 }
0x1780   :  { %3695 = vtanh.f32 %v2751_v0 }
0x1786   :  { %v3696_v26 = vpop.eup %3695 }
0x1787   :  { %2754 = vrot.lane.b32.xlu0 %v3696_v26, %s3777_s19 }
0x178d   :  { %v2893_v42 = vpop.permute.xlu1 %2892 }
0x178e   :  { %v4841_v18 = vadd.f32 %v2893_v42, %v2885_v23 }
0x1790   :  { %3697 = vtanh.f32 %v4841_v18 }
0x1796   :  { %v3698_v45 = vpop.eup %3697 }
0x1797   :  { %2898 = vrot.lane.b32.xlu1 %v3698_v45, %s3777_s19 }
0x17b9   :  { %v2827_v20 = vpop.permute.xlu2 %2826 }
0x17ba   :  { %v2829_v30 = vmul.f32 %v2827_v20, %v2809_v61 }
0x17bc   :  { %v2903_v25 = vpack.c.bf16 %v2829_v30, %v2829_v30 }
0x17be   :  { %2924 = vrot.lane.b32.xlu2 %v2903_v25, %s3778_s20 }
0x17f9   :  { %v2755_v28 = vpop.permute.xlu0 %2754 }
0x17fa   :  { %v2757_v41 = vmul.f32 %v2755_v28, %v4822_v56 }
0x17fc   :  { %v2902_v51 = vpack.c.bf16 %v2757_v41, %v2757_v41 }
0x17fe   :  { %2905 = vrot.lane.b32.xlu0 %v2902_v51, %s3778_s20 }
0x1809   :  { %v2899_v5 = vpop.permute.xlu1 %2898 }
0x180a   :  { %v2901_v21 = vmul.f32 %v2899_v5, %v2881_v34 }
0x180c   :  { %v2981_v27 = vpack.c.bf16 %v2901_v21, %v2901_v21 }
0x180e   :  { %2996 = vrot.lane.b32.xlu1 %v2981_v27, %s3778_s20 }
0x1818   :  { %v2925_v50 = vpop.permute.xlu2 %2924 }
0x1819   :  { %3436 = vmatmul.msk.bf16.vlgmr.msra.gmra.mxu3 %vm77_vm5, %v2925_v50  ;;  %3439 = vmatmul.msk.bf16.vlgmr.msrb.gmra.mxu0 %vm77_vm5, %v2925_v50 }
0x1870   :  { %v2906_v46 = vpop.permute.xlu0 %2905 }
0x1871   :  { %3435 = vmatmul.msk.bf16.vlgmr.msra.gmra.mxu1 %vm77_vm5, %v2906_v46 }
0x1880   :  { %v2997_v62 = vpop.permute.xlu1 %2996 }
0x1881   :  { %3440 = vmatmul.msk.bf16.vlgmr.msrb.gmra.mxu2 %vm77_vm5, %v2997_v62 }
0x1896   :  { %v2991_v55 = vpop.f32.mrf.mxu0 }
0x189c   :  { %v2938_v60 = vpop.f32.mrf.mxu3 }
0x189e   :  { %v2993_v63 = vpop.f32.mrf.mxu0 }
0x189f   :  { %v3749_v63 = vld [vmem:[%s4899_s6 + $0x3] ss:$0 sm:$0xff] }
0x18a4   :  { %v2940_v43 = vpop.f32.mrf.mxu3 }
0x18ee   :  { %v2919_v7 = vpop.f32.mrf.mxu1 }
0x18ef   :  { %v2939_v11 = vadd.f32 %v2938_v60, %v2919_v7 }
0x18f1   :  { %v2942_v54 = vadd.f32 %v4818_v57, %v2939_v11 }
0x18f3   :  { %v3437_v56 = vmul.f32 -1.442695, %v2942_v54 }
0x18f5   :  { %3699 = vpow2.f32 %v3437_v56 }
0x18f6   :  { %v2921_v12 = vpop.f32.mrf.mxu1 }
0x18fb   :  { %v3700_v13 = vpop.eup %3699 }
0x18fc   :  { %v2946_v9 = vadd.f32 1.0, %v3700_v13 }
0x18fe   :  { %3701 = vrcp.f32 %v2946_v9  ;;  %v2958_v4 = vand.u32 2147483648, %v2946_v9  ;;  %v2956_v33 = vand.u32 2147483647, %v2946_v9  ;;  %vm2952_vm7 = vweird.f32 %v2946_v9 }
0x1900   :  { %v2959_v31 = vor.u32 1.1754944e-38, %v2958_v4  ;;  %vm2957_vm9 = vcmp.eq.f32.partialorder %v2956_v33, 8.507059e+37 }
0x1904   :  { %v3702_v22 = vpop.eup %3701  ;;  %v3010_v39 = vpop.f32.mrf.mxu2 }
0x1905   :  { %v2948_v38 = vmul.f32 %v3702_v22, %v2946_v9  ;;  %v3011_v40 = vadd.f32 %v3010_v39, %v2991_v55  ;;  %vm2953_vm6 = vweird.f32 %v3702_v22 }
0x1906   :  { %vm2954_vm8 = vmor %vm2952_vm7, %vm2953_vm6 }
0x1907   :  { %v2949_v52 = vsub.f32 1.0, %v2948_v38  ;;  %v3014_v2 = vadd.f32 %v4648_v53, %v3011_v40 }
0x1909   :  { %v2950_v24 = vmul.f32 %v3702_v22, %v2949_v52  ;;  %v3441_v61 = vmul.f32 -1.442695, %v3014_v2 }
0x190b   :  { %3703 = vpow2.f32 %v3441_v61  ;;  %v2951_v57 = vadd.f32 %v3702_v22, %v2950_v24 }
0x190c   :  { %v3012_v44 = vpop.f32.mrf.mxu2 }
0x190d   :  { %v2955_v47 = vsel %vm2954_vm8, %v3702_v22, %v2951_v57 }
0x190e   :  { %v2960_v10 = vsel %vm2957_vm9, %v2959_v31, %v2955_v47 }
0x190f   :  { %v2962_v48 = vmul.f32 2.0, %v2960_v10  ;;  %v2964_v26 = vmul.f32 %v2960_v10, %v4833_v8 }
0x1911   :  { %v3704_v58 = vpop.eup %3703  ;;  %v3438_v14 = vadd.f32 -1.0, %v2962_v48  ;;  %v3135_v48 = vld [vmem:[%s4900_s7 + $0x18] sm:$0xff] }
0x1912   :  { %v3018_v6 = vadd.f32 1.0, %v3704_v58  ;;  %v3134_v58 = vld [vmem:[%s4900_s7 + $0x10] sm:$0xff]  ;;  %3157 = vmatpush.msra.mxu0 %v3135_v48 }
0x1913   :  { %2966 = vrot.lane.b32.xlu2 %v3438_v14, %s3777_s19  ;;  %v3133_v14 = vld [vmem:[%s4900_s7 + $0x8] sm:$0xff] }
0x1914   :  { %3705 = vrcp.f32 %v3018_v6  ;;  %v3030_v59 = vand.u32 2147483648, %v3018_v6  ;;  %v3028_v3 = vand.u32 2147483647, %v3018_v6  ;;  %vm3024_vm11 = vweird.f32 %v3018_v6  ;;  %3158 = vmatpush.msra.mxu0 %v3134_v58 }
0x1916   :  { %v3031_v1 = vor.u32 1.1754944e-38, %v3030_v59  ;;  %vm3029_vm13 = vcmp.eq.f32.partialorder %v3028_v3, 8.507059e+37  ;;  %3159 = vmatpush.msra.mxu0 %v3133_v14  ;;  %v3476_v59 = vld [vmem:[%s4901_s8] ss:$0 sm:$0xff] }
0x191a   :  { %v3706_v53 = vpop.eup %3705 }
0x191b   :  { %v3020_v34 = vmul.f32 %v3706_v53, %v3018_v6  ;;  %vm3025_vm10 = vweird.f32 %v3706_v53  ;;  %v3132_v6 = vld [vmem:[%s4900_s7] sm:$0xff] }
0x191c   :  { %vm3026_vm12 = vmor %vm3024_vm11, %vm3025_vm10  ;;  %3160 = vmatpush.msra.mxu0 %v3132_v6 }
0x191d   :  { %v3021_v15 = vsub.f32 1.0, %v3020_v34 }
0x191f   :  { %v3022_v49 = vmul.f32 %v3706_v53, %v3021_v15 }
0x1921   :  { %v3023_v32 = vadd.f32 %v3706_v53, %v3022_v49 }
0x1923   :  { %v3027_v35 = vsel %vm3026_vm12, %v3706_v53, %v3023_v32 }
0x1924   :  { %v3032_v37 = vsel %vm3029_vm13, %v3031_v1, %v3027_v35 }
0x1925   :  { %v3034_v36 = vmul.f32 2.0, %v3032_v37  ;;  %v3036_v20 = vmul.f32 %v3032_v37, %v4841_v18 }
0x1927   :  { %v3442_v17 = vadd.f32 -1.0, %v3034_v36 }
0x1929   :  { %3038 = vrot.lane.b32.xlu1 %v3442_v17, %s3777_s19 }
0x196d   :  { %v2967_v16 = vpop.permute.xlu2 %2966 }
0x196e   :  { %v2969_v19 = vmul.f32 %v2967_v16, %v2960_v10 }
0x1970   :  { %2971 = vrot.lane.b32.xlu1 %v2969_v19, %s3778_s20 }
0x199b   :  { %v3039_v29 = vpop.permute.xlu1 %3038 }
0x199c   :  { %v3041_v0 = vmul.f32 %v3039_v29, %v3032_v37 }
0x199e   :  { %3043 = vrot.lane.b32.xlu0 %v3041_v0, %s3778_s20 }
0x19e2   :  { %v2972_v23 = vpop.permute.xlu1 %2971 }
0x19e3   :  { %v2974_v42 = vadd.f32 %v2972_v23, %v2964_v26 }
0x19e5   :  { %3707 = vtanh.f32 %v2974_v42 }
0x19eb   :  { %v3708_v45 = vpop.eup %3707 }
0x19ec   :  { %2977 = vrot.lane.b32.xlu0 %v3708_v45, %s3777_s19 }
0x1a10   :  { %v3044_v30 = vpop.permute.xlu0 %3043 }
0x1a11   :  { %v3046_v25 = vadd.f32 %v3044_v30, %v3036_v20 }
0x1a13   :  { %3709 = vtanh.f32 %v3046_v25 }
0x1a19   :  { %v3710_v28 = vpop.eup %3709 }
0x1a1a   :  { %3049 = vrot.lane.b32.xlu2 %v3710_v28, %s3777_s19 }
0x1a5e   :  { %v2978_v41 = vpop.permute.xlu0 %2977 }
0x1a5f   :  { %v2980_v51 = vmul.f32 %v2978_v41, %v2960_v10 }
0x1a61   :  { %v3053_v5 = vpack.c.bf16 %v2980_v51, %v2980_v51 }
0x1a63   :  { %3056 = vrot.lane.b32.xlu2 %v3053_v5, %s3778_s20 }
0x1a74   :  { %v3050_v8 = vpop.permute.xlu2 %3049 }
0x1a75   :  { %v3052_v21 = vmul.f32 %v3050_v8, %v3032_v37 }
0x1a77   :  { %v3054_v27 = vpack.c.bf16 %v3052_v21, %v3052_v21 }
0x1a79   :  { %3075 = vrot.lane.b32.xlu1 %v3054_v27, %s3778_s20 }
0x1abd   :  { %v3057_v50 = vpop.permute.xlu2 %3056 }
0x1abe   :  { %3443 = vmatmul.msk.bf16.vlgmr.msrb.gmra.mxu1 %vm77_vm5, %v3057_v50 }
0x1aeb   :  { %v3076_v18 = vpop.permute.xlu1 %3075 }
0x1aec   :  { %3444 = vmatmul.msk.bf16.vlgmr.msrb.gmra.mxu3 %vm77_vm5, %v3076_v18 }
0x1b3b   :  { %v3070_v46 = vpop.f32.mrf.mxu1 }
0x1b43   :  { %v3072_v62 = vpop.f32.mrf.mxu1 }
0x1b6f   :  { %v3089_v55 = vpop.f32.mrf.mxu3 }
0x1b70   :  { %v3090_v60 = vadd.f32 %v3089_v55, %v3070_v46 }
0x1b72   :  { %v3093_v43 = vadd.f32 %v3749_v63, %v3090_v60 }
0x1b74   :  { %v3445_v7 = vmul.f32 -1.442695, %v3093_v43 }
0x1b76   :  { %3711 = vpow2.f32 %v3445_v7 }
0x1b77   :  { %v3091_v11 = vpop.f32.mrf.mxu3 }
0x1b7c   :  { %v3712_v54 = vpop.eup %3711 }
0x1b7d   :  { %v3097_v56 = vadd.f32 1.0, %v3712_v54 }
0x1b7f   :  { %3713 = vrcp.f32 %v3097_v56  ;;  %v3109_v22 = vand.u32 2147483648, %v3097_v56  ;;  %v3107_v38 = vand.u32 2147483647, %v3097_v56  ;;  %vm3103_vm15 = vweird.f32 %v3097_v56 }
0x1b81   :  { %v3110_v52 = vor.u32 1.1754944e-38, %v3109_v22  ;;  %vm3108_vm2 = vcmp.eq.f32.partialorder %v3107_v38, 8.507059e+37 }
0x1b85   :  { %v3714_v12 = vpop.eup %3713 }
0x1b86   :  { %v3099_v13 = vmul.f32 %v3714_v12, %v3097_v56  ;;  %vm3104_vm14 = vweird.f32 %v3714_v12 }
0x1b87   :  { %vm3105_vm1 = vmor %vm3103_vm15, %vm3104_vm14 }
0x1b88   :  { %v3100_v9 = vsub.f32 1.0, %v3099_v13 }
0x1b8a   :  { %v3101_v39 = vmul.f32 %v3714_v12, %v3100_v9 }
0x1b8c   :  { %v3102_v40 = vadd.f32 %v3714_v12, %v3101_v39 }
0x1b8e   :  { %v3106_v2 = vsel %vm3105_vm1, %v3714_v12, %v3102_v40 }
0x1b8f   :  { %v3111_v4 = vsel %vm3108_vm2, %v3110_v52, %v3106_v2 }
0x1b90   :  { %v3113_v24 = vmul.f32 2.0, %v3111_v4  ;;  %v3115_v44 = vmul.f32 %v3111_v4, %v3046_v25 }
0x1b92   :  { %v3446_v61 = vadd.f32 -1.0, %v3113_v24 }
0x1b94   :  { %3117 = vrot.lane.b32.xlu0 %v3446_v61, %s3777_s19 }
0x1c06   :  { %v3118_v33 = vpop.permute.xlu0 %3117 }
0x1c07   :  { %v3120_v57 = vmul.f32 %v3118_v33, %v3111_v4 }
0x1c09   :  { %3122 = vrot.lane.b32.xlu1 %v3120_v57, %s3778_s20 }
0x1c7b   :  { %v3123_v31 = vpop.permute.xlu1 %3122 }
0x1c7c   :  { %v3125_v47 = vadd.f32 %v3123_v31, %v3115_v44 }
0x1c7e   :  { %3715 = vtanh.f32 %v3125_v47 }
0x1c84   :  { %v3716_v10 = vpop.eup %3715 }
0x1c85   :  { %3128 = vrot.lane.b32.xlu2 %v3716_v10, %s3777_s19 }
0x1cdf   :  { %v3129_v53 = vpop.permute.xlu2 %3128 }
0x1ce0   :  { %v3131_v34 = vmul.f32 %v3129_v53, %v3111_v4 }
0x1ce2   :  { %3141 = vrot.lane.b32.xlu0 %v3131_v34, %s3778_s20 }
0x1d54   :  { %v3142_v15 = vpop.permute.xlu0 %3141 }
0x1d55   :  { %3447 = vmatmul.msk.f32.vlgmr.msra.gmra.mxu0 %vm77_vm5, %v3142_v15 }
0x1dd2   :  { %v3162_v49 = vpop.f32.mrf.mxu0 }
0x1dd3   :  { %v3163_v3 = vadd.f32 %v3476_v59, %v3162_v49 }
0x1dd5   :  { %3165 = vst [vmem:[#allocation2] sm:$0x3] %v3163_v3 }
0x1dd6   :  { %3176 = dma.vmem_to_hbm [thread:$0]  %s3172_s22, 32, %s3174_s25, [#allocation3]  }
0x1dd7   :  { %3774 = dma.done.wait [#allocation3], 32  }
0x1dd8   :  { %3775 = vsyncadd [#allocation3], 4294967264 }
0x1dd9   :  { %3181 = vsyncpa [#allocation3], 1 }

</bundles_post_ra>
